<compile_context>
chip_gen: v7x
topology: tpu7x:2x2x1
jax: 0.10.0
libtpu: 0.0.40
codegen_flags: <defaults>
</compile_context>

<pallas_src>
import functools

import jax
import jax.numpy as jnp
from jax.experimental import pallas as pl
from jax.experimental.pallas import tpu as pltpu


def _round_up(x, m):
    return ((x + m - 1) // m) * m


# ----------------------------------------------------------------------------
# Fused projector-block kernel: conv3x3(pad=1, no bias) -> ReLU -> conv3x3.
# One grid step processes ALL batch images of ONE projector (teacher/student).
# ----------------------------------------------------------------------------
def _fused_projector_kernel(mask_ref, x_ref, w1_ref, w2_ref, o_ref,
                            xpad_ref, xcol_ref, hpad_ref, hcol_ref,
                            *, H, W, off, n_images):
    # mask_ref: (2, HW) bf16 resident column-validity masks (dx=-1 / dx=+1)
    # x_ref   : (1, N, Cin_p, HW)  bf16 flattened NCHW images (spatial in lanes)
    # w1_ref  : (1, Cmid_p, 9*Cin_p)  bf16 pre-packed conv1 weights
    # w2_ref  : (1, Cout,   9*Cmid_p) bf16 pre-packed conv2 weights
    # o_ref   : (1, N, Cout, HW) f32
    # xpad/hpad: (C_p, HW + 2*off) bf16 zero-halo flat buffers
    # xcol/hcol: (9*C_p, N*HW)     bf16 im2col staging buffers
    HW = H * W
    cin_p = xpad_ref.shape[0]
    cmid_p = hpad_ref.shape[0]

    ok_m1 = mask_ref[0:1, :]          # 1.0 where source col x-1 is in range
    ok_p1 = mask_ref[1:2, :]          # 1.0 where source col x+1 is in range

    def stage_image(pad_ref, col_ref, n, c):
        # Scatter the 9 conv taps of image `n` into the im2col scratch so the
        # whole 3x3 conv becomes a single MXU matmul with K = 9*c.
        t = 0
        for dy in (-1, 0, 1):
            for dx in (-1, 0, 1):
                start = off + dy * W + dx            # static lane offset
                tap = pad_ref[:, start:start + HW]   # (c, HW) bf16
                if dx == -1:
                    tap = tap * ok_m1
                elif dx == 1:
                    tap = tap * ok_p1
                col_ref[t * c:(t + 1) * c, n * HW:(n + 1) * HW] = tap
                t += 1

    # ---- conv1 staging: zero only the halo lanes (interior fully rewritten).
    halo1 = jnp.zeros((cin_p, off), jnp.bfloat16)
    xpad_ref[:, :off] = halo1
    xpad_ref[:, off + HW:] = halo1
    for n in range(n_images):
        xpad_ref[:, off:off + HW] = x_ref[0, n]
        stage_image(xpad_ref, xcol_ref, n, cin_p)

    # ---- conv1: one K=9*Cin matmul, f32 accumulate, ReLU. Stays in VMEM.
    hidden = jnp.maximum(
        jnp.dot(w1_ref[0], xcol_ref[...], preferred_element_type=jnp.float32),
        0.0).astype(jnp.bfloat16)                    # (Cmid_p, N*HW)

    # ---- conv2 staging.
    halo2 = jnp.zeros((cmid_p, off), jnp.bfloat16)
    hpad_ref[:, :off] = halo2
    hpad_ref[:, off + HW:] = halo2
    for n in range(n_images):
        hpad_ref[:, off:off + HW] = hidden[:, n * HW:(n + 1) * HW]
        stage_image(hpad_ref, hcol_ref, n, cmid_p)

    # ---- conv2: one K=9*Cmid matmul; store per image (lane-dense HW slabs).
    out = jnp.dot(w2_ref[0], hcol_ref[...], preferred_element_type=jnp.float32)
    for n in range(n_images):
        o_ref[0, n] = out[:, n * HW:(n + 1) * HW].astype(o_ref.dtype)


# ----------------------------------------------------------------------------
# Wrapper: weight packing + pallas_call.
# ----------------------------------------------------------------------------
def _pack_conv_weights(w_goihw, cin_pad, cout_pad):
    """(G, Cout, Cin, 3, 3) OIHW f32 -> (G, cout_pad, 9*cin_pad) bf16.

    K layout is tap-major (t = ky*3 + kx), then input channel, matching the
    kernel's im2col staging order. Padded channel slots are zero-filled.
    """
    G, cout, cin, _, _ = w_goihw.shape
    w = jnp.transpose(w_goihw, (0, 1, 3, 4, 2))            # (G, Cout, ky, kx, Cin)
    w = jnp.pad(w, ((0, 0), (0, cout_pad - cout), (0, 0), (0, 0),
                    (0, cin_pad - cin)))
    return w.reshape(G, cout_pad, 9 * cin_pad).astype(jnp.bfloat16)


def fused_projector_block(x, w1, w2, *, H, W):
    """conv3x3(pad=1, no bias) -> ReLU -> conv3x3(pad=1, no bias), batched.

    x : (G, N, Cin, H*W) float32  -- G independent projectors (e.g. teachers)
    w1: (G, Cmid, Cin, 3, 3) float32 (OIHW, per projector)
    w2: (G, Cout, Cmid, 3, 3) float32
    returns (G, N, Cout, H*W) float32
    """
    G, N, cin, HW = x.shape
    assert HW == H * W
    _, cmid, cin1, kh1, kw1 = w1.shape
    _, cout, cmid2, kh2, kw2 = w2.shape
    assert cin1 == cin and cmid2 == cmid and kh1 == kw1 == kh2 == kw2 == 3

    # Channels padded to the bf16 sublane tile so all scratch stores align.
    cin_p = _round_up(cin, 16)
    cmid_p = _round_up(cmid, 16)
    k1, k2 = 9 * cin_p, 9 * cmid_p

    off = _round_up(W + 1, 128)        # lane-aligned halo offset
    pad_w = HW + 2 * off

    # Wrapper-side prep (tiny XLA ops): bf16 weights/activations halve HBM DMA
    # and remove all per-tap in-kernel casts. Zero-padded channels are inert.
    x_bf = jnp.pad(x.astype(jnp.bfloat16),
                   ((0, 0), (0, 0), (0, cin_p - cin), (0, 0)))
    w1_p = _pack_conv_weights(w1, cin_p, cmid_p)            # (G, cmid_p, k1)
    w2_p = _pack_conv_weights(w2, cmid_p, cout)             # (G, cout,   k2)

    # Precomputed column-validity masks for the dx = -1 / +1 taps.
    col = jnp.arange(HW, dtype=jnp.int32) % W
    masks = jnp.stack([col > 0, col < W - 1]).astype(jnp.bfloat16)  # (2, HW)

    kern = functools.partial(_fused_projector_kernel, H=H, W=W, off=off,
                             n_images=N)
    flops = int(2 * G * N * HW * (cmid_p * k1 + cout * k2))
    bytes_accessed = int(2 * (x_bf.size + w1_p.size + w2_p.size)
                         + 4 * G * N * cout * HW)

    return pl.pallas_call(
        kern,
        out_shape=jax.ShapeDtypeStruct((G, N, cout, HW), jnp.float32),
        grid=(G,),
        in_specs=[
            pl.BlockSpec((2, HW), lambda g: (0, 0)),                  # resident
            pl.BlockSpec((1, N, cin_p, HW), lambda g: (g, 0, 0, 0)),
            pl.BlockSpec((1, cmid_p, k1), lambda g: (g, 0, 0)),
            pl.BlockSpec((1, cout, k2), lambda g: (g, 0, 0)),
        ],
        out_specs=pl.BlockSpec((1, N, cout, HW), lambda g: (g, 0, 0, 0)),
        scratch_shapes=[
            pltpu.VMEM((cin_p, pad_w), jnp.bfloat16),
            pltpu.VMEM((k1, N * HW), jnp.bfloat16),
            pltpu.VMEM((cmid_p, pad_w), jnp.bfloat16),
            pltpu.VMEM((k2, N * HW), jnp.bfloat16),
        ],
        compiler_params=pltpu.CompilerParams(
            dimension_semantics=("parallel",),
            vmem_limit_bytes=48 * 1024 * 1024),
        cost_estimate=pl.CostEstimate(flops=flops, transcendentals=0,
                                      bytes_accessed=bytes_accessed),
    )(masks, x_bf, w1_p, w2_p)


# ----------------------------------------------------------------------------
# Parameter init: Kaiming normal (fan_in, nonlinearity='relu'), matching
# torch.nn.init.kaiming_normal_. Stored as stacked OIHW f32 (module-faithful);
# packing/casting to the kernel layout happens in the wrapper.
# ----------------------------------------------------------------------------
def _kaiming_oihw(key, cin, cout):
    std = (2.0 / (cin * 9)) ** 0.5
    return jax.random.normal(key, (cout, cin, 3, 3), jnp.float32) * std


def init_fka_params(key, channel_t, channel_s, channel_h, n_teachers):
    fpm_w1, fpm_w2, ifpm_w1, ifpm_w2 = [], [], [], []
    for _ in range(n_teachers):
        key, k1, k2, k3, k4 = jax.random.split(key, 5)
        fpm_w1.append(_kaiming_oihw(k1, channel_t, channel_h))
        fpm_w2.append(_kaiming_oihw(k2, channel_h, channel_h))
        ifpm_w1.append(_kaiming_oihw(k3, channel_h, channel_t))
        ifpm_w2.append(_kaiming_oihw(k4, channel_t, channel_t))
    key, k1, k2 = jax.random.split(key, 3)
    return {
        "fpm_w1": jnp.stack(fpm_w1), "fpm_w2": jnp.stack(fpm_w2),
        "ifpm_w1": jnp.stack(ifpm_w1), "ifpm_w2": jnp.stack(ifpm_w2),
        "student_w1": _kaiming_oihw(k1, channel_s, channel_h)[None],
        "student_w2": _kaiming_oihw(k2, channel_h, channel_h)[None],
    }


# ----------------------------------------------------------------------------
# FKAModule.forward  (selected_teachers=None path)
# ----------------------------------------------------------------------------
def fka_forward(params, teacher_features, student_feature):
    """teacher_features: list of (N, Ct, H, W); student_feature: (N, Cs, H, W).

    Returns (teacher_projected, teacher_reconstructed, student_projected),
    all NCHW, matching the PyTorch module.
    """
    # TODO(synk): the selected_teachers branch (per-sample dynamic teacher
    # routing) is data-dependent module selection and is not implemented here.
    T = len(teacher_features)
    N, Ct, H, W = teacher_features[0].shape
    HW = H * W

    # Stack teachers and flatten spatial dims (metadata-only reshapes).
    tf = jnp.stack([f.reshape(N, Ct, HW) for f in teacher_features], axis=0)

    proj = fused_projector_block(tf, params["fpm_w1"], params["fpm_w2"],
                                 H=H, W=W)
    recon = fused_projector_block(proj, params["ifpm_w1"], params["ifpm_w2"],
                                  H=H, W=W)

    Ns, Cs, Hs, Ws = student_feature.shape
    sf = student_feature.reshape(1, Ns, Cs, Hs * Ws)
    sp = fused_projector_block(sf, params["student_w1"], params["student_w2"],
                               H=Hs, W=Ws)

    Ch = proj.shape[2]
    projected = [proj[i].reshape(N, Ch, H, W) for i in range(T)]
    reconstructed = [recon[i].reshape(N, Ct, H, W) for i in range(T)]
    student_projected = sp[0].reshape(Ns, sp.shape[2], Hs, Ws)
    return projected, reconstructed, student_projected


# ----------------------------------------------------------------------------
# Pure-JAX (f32) reference of the module, for correctness checking.
# ----------------------------------------------------------------------------
def _conv3x3_ref(x, w):
    return jax.lax.conv_general_dilated(
        x, w, window_strides=(1, 1), padding=((1, 1), (1, 1)),
        dimension_numbers=("NCHW", "OIHW", "NCHW"))


def _block_ref(x, w1, w2):
    return _conv3x3_ref(jax.nn.relu(_conv3x3_ref(x, w1)), w2)


def _rel_err(a, b):
    return float(jnp.linalg.norm(a - b) / (jnp.linalg.norm(b) + 1e-6))


if __name__ == "__main__":
    channel_t, channel_s, channel_h, n_teachers = 4, 6, 8, 2
    N, H, W = 2, 16, 16

    key = jax.random.PRNGKey(0)
    key, kp = jax.random.split(key)
    params = init_fka_params(kp, channel_t, channel_s, channel_h, n_teachers)

    teacher_features = []
    for _ in range(n_teachers):
        key, kt = jax.random.split(key)
        teacher_features.append(
            jax.random.normal(kt, (N, channel_t, H, W), jnp.float32))
    key, ks = jax.random.split(key)
    student_feature = jax.random.normal(ks, (N, channel_s, H, W), jnp.float32)

    fwd = jax.jit(fka_forward)
    t_proj, t_recon, s_proj = fwd(params, teacher_features, student_feature)
    jax.block_until_ready((t_proj, t_recon, s_proj))

    # Shape checks (match the PyTorch module).
    assert len(t_proj) == n_teachers and len(t_recon) == n_teachers
    assert all(t.shape == (N, channel_h, H, W) for t in t_proj)
    assert all(t.shape == (N, channel_t, H, W) for t in t_recon)
    assert s_proj.shape == (N, channel_h, H, W)
    assert all(bool(jnp.all(jnp.isfinite(t)))
               for t in t_proj + t_recon + [s_proj])

    # Numerical check against the f32 reference (kernel uses bf16 MXU
    # operands, so compare in relative Frobenius norm).
    for i in range(n_teachers):
        p_ref = _block_ref(teacher_features[i],
                           params["fpm_w1"][i], params["fpm_w2"][i])
        r_ref = _block_ref(p_ref, params["ifpm_w1"][i], params["ifpm_w2"][i])
        assert _rel_err(t_proj[i], p_ref) < 3e-2
        assert _rel_err(t_recon[i], r_ref) < 3e-2
    s_ref = _block_ref(student_feature,
                       params["student_w1"][0], params["student_w2"][0])
    assert _rel_err(s_proj, s_ref) < 3e-2

    print("KERNEL_OK")
</pallas_src>

<mosaic_0001>
module attributes {stable_mosaic.version = 11 : i64} {
  func.func @_fused_projector_kernel(%arg0: i32, %arg1: memref<2x256xbf16, #tpu.memory_space<vmem>>, %arg2: memref<1x2x16x256xbf16, #tpu.memory_space<vmem>>, %arg3: memref<1x16x144xbf16, #tpu.memory_space<vmem>>, %arg4: memref<1x8x144xbf16, #tpu.memory_space<vmem>>, %arg5: memref<1x2x8x256xf32, #tpu.memory_space<vmem>>, %arg6: memref<16x512xbf16, #tpu.memory_space<vmem>>, %arg7: memref<144x512xbf16, #tpu.memory_space<vmem>>, %arg8: memref<16x512xbf16, #tpu.memory_space<vmem>>, %arg9: memref<144x512xbf16, #tpu.memory_space<vmem>>) attributes {dimension_semantics = [#tpu.dimension_semantics<parallel>], iteration_bounds = array<i64: 1>, scalar_prefetch = 0 : i64, scratch_operands = 4 : i64, tpu.core_type = #tpu.core_type<tc>, window_params = [{pipeline_mode = #tpu.pipeline_mode<synchronous>, transform_indices = @transform_0, window_bounds = array<i64: 2, 256>}, {transform_indices = @transform_1, window_bounds = array<i64: 1, 2, 16, 256>}, {transform_indices = @transform_2, window_bounds = array<i64: 1, 16, 144>}, {transform_indices = @transform_3, window_bounds = array<i64: 1, 8, 144>}, {transform_indices = @transform_4, window_bounds = array<i64: 1, 2, 8, 256>}]} {
    %c0 = arith.constant 0 : index
    %c0_0 = arith.constant 0 : index
    %0 = vector.load %arg1[%c0, %c0_0] : memref<2x256xbf16, #tpu.memory_space<vmem>>, vector<1x256xbf16>
    %c1 = arith.constant 1 : index
    %c0_1 = arith.constant 0 : index
    %1 = vector.load %arg1[%c1, %c0_1] : memref<2x256xbf16, #tpu.memory_space<vmem>>, vector<1x256xbf16>
    %cst = arith.constant 0.000000e+00 : bf16
    %2 = vector.broadcast %cst : bf16 to vector<16x128xbf16>
    %c0_2 = arith.constant 0 : index
    %c0_3 = arith.constant 0 : index
    %3 = vector.load %arg6[%c0_2, %c0_3] : memref<16x512xbf16, #tpu.memory_space<vmem>>, vector<16x128xbf16>
    tpu.vector_store %arg6[%c0_2, %c0_3], %2 {strides = array<i32>} : memref<16x512xbf16, #tpu.memory_space<vmem>>, vector<16x128xbf16>,
    %c0_4 = arith.constant 0 : index
    %c384 = arith.constant 384 : index
    %4 = vector.load %arg6[%c0_4, %c384] : memref<16x512xbf16, #tpu.memory_space<vmem>>, vector<16x128xbf16>
    tpu.vector_store %arg6[%c0_4, %c384], %2 {strides = array<i32>} : memref<16x512xbf16, #tpu.memory_space<vmem>>, vector<16x128xbf16>,
    %c0_5 = arith.constant 0 : index
    %c0_6 = arith.constant 0 : index
    %c0_7 = arith.constant 0 : index
    %c0_8 = arith.constant 0 : index
    %5 = vector.load %arg2[%c0_5, %c0_6, %c0_7, %c0_8] : memref<1x2x16x256xbf16, #tpu.memory_space<vmem>>, vector<1x1x16x256xbf16>
    %6 = vector.shape_cast %5 : vector<1x1x16x256xbf16> to vector<16x256xbf16>
    %c0_9 = arith.constant 0 : index
    %c128 = arith.constant 128 : index
    %7 = vector.load %arg6[%c0_9, %c128] : memref<16x512xbf16, #tpu.memory_space<vmem>>, vector<16x256xbf16>
    tpu.vector_store %arg6[%c0_9, %c128], %6 {strides = array<i32>} : memref<16x512xbf16, #tpu.memory_space<vmem>>, vector<16x256xbf16>,
    %c0_10 = arith.constant 0 : index
    %c111 = arith.constant 111 : index
    %8 = vector.load %arg6[%c0_10, %c111] : memref<16x512xbf16, #tpu.memory_space<vmem>>, vector<16x256xbf16>
    %9 = vector.broadcast %0 : vector<1x256xbf16> to vector<16x256xbf16>
    %10 = arith.mulf %8, %9 : vector<16x256xbf16>
    %c0_11 = arith.constant 0 : index
    %c0_12 = arith.constant 0 : index
    %11 = vector.load %arg7[%c0_11, %c0_12] : memref<144x512xbf16, #tpu.memory_space<vmem>>, vector<16x256xbf16>
    tpu.vector_store %arg7[%c0_11, %c0_12], %10 {strides = array<i32>} : memref<144x512xbf16, #tpu.memory_space<vmem>>, vector<16x256xbf16>,
    %c0_13 = arith.constant 0 : index
    %c112 = arith.constant 112 : index
    %12 = vector.load %arg6[%c0_13, %c112] : memref<16x512xbf16, #tpu.memory_space<vmem>>, vector<16x256xbf16>
    %c16 = arith.constant 16 : index
    %c0_14 = arith.constant 0 : index
    %13 = vector.load %arg7[%c16, %c0_14] : memref<144x512xbf16, #tpu.memory_space<vmem>>, vector<16x256xbf16>
    tpu.vector_store %arg7[%c16, %c0_14], %12 {strides = array<i32>} : memref<144x512xbf16, #tpu.memory_space<vmem>>, vector<16x256xbf16>,
    %c0_15 = arith.constant 0 : index
    %c113 = arith.constant 113 : index
    %14 = vector.load %arg6[%c0_15, %c113] : memref<16x512xbf16, #tpu.memory_space<vmem>>, vector<16x256xbf16>
    %15 = vector.broadcast %1 : vector<1x256xbf16> to vector<16x256xbf16>
    %16 = arith.mulf %14, %15 : vector<16x256xbf16>
    %c32 = arith.constant 32 : index
    %c0_16 = arith.constant 0 : index
    %17 = vector.load %arg7[%c32, %c0_16] : memref<144x512xbf16, #tpu.memory_space<vmem>>, vector<16x256xbf16>
    tpu.vector_store %arg7[%c32, %c0_16], %16 {strides = array<i32>} : memref<144x512xbf16, #tpu.memory_space<vmem>>, vector<16x256xbf16>,
    %c0_17 = arith.constant 0 : index
    %c127 = arith.constant 127 : index
    %18 = vector.load %arg6[%c0_17, %c127] : memref<16x512xbf16, #tpu.memory_space<vmem>>, vector<16x256xbf16>
    %19 = vector.broadcast %0 : vector<1x256xbf16> to vector<16x256xbf16>
    %20 = arith.mulf %18, %19 : vector<16x256xbf16>
    %c48 = arith.constant 48 : index
    %c0_18 = arith.constant 0 : index
    %21 = vector.load %arg7[%c48, %c0_18] : memref<144x512xbf16, #tpu.memory_space<vmem>>, vector<16x256xbf16>
    tpu.vector_store %arg7[%c48, %c0_18], %20 {strides = array<i32>} : memref<144x512xbf16, #tpu.memory_space<vmem>>, vector<16x256xbf16>,
    %c0_19 = arith.constant 0 : index
    %c128_20 = arith.constant 128 : index
    %22 = vector.load %arg6[%c0_19, %c128_20] : memref<16x512xbf16, #tpu.memory_space<vmem>>, vector<16x256xbf16>
    %c64 = arith.constant 64 : index
    %c0_21 = arith.constant 0 : index
    %23 = vector.load %arg7[%c64, %c0_21] : memref<144x512xbf16, #tpu.memory_space<vmem>>, vector<16x256xbf16>
    tpu.vector_store %arg7[%c64, %c0_21], %22 {strides = array<i32>} : memref<144x512xbf16, #tpu.memory_space<vmem>>, vector<16x256xbf16>,
    %c0_22 = arith.constant 0 : index
    %c129 = arith.constant 129 : index
    %24 = vector.load %arg6[%c0_22, %c129] : memref<16x512xbf16, #tpu.memory_space<vmem>>, vector<16x256xbf16>
    %25 = vector.broadcast %1 : vector<1x256xbf16> to vector<16x256xbf16>
    %26 = arith.mulf %24, %25 : vector<16x256xbf16>
    %c80 = arith.constant 80 : index
    %c0_23 = arith.constant 0 : index
    %27 = vector.load %arg7[%c80, %c0_23] : memref<144x512xbf16, #tpu.memory_space<vmem>>, vector<16x256xbf16>
    tpu.vector_store %arg7[%c80, %c0_23], %26 {strides = array<i32>} : memref<144x512xbf16, #tpu.memory_space<vmem>>, vector<16x256xbf16>,
    %c0_24 = arith.constant 0 : index
    %c143 = arith.constant 143 : index
    %28 = vector.load %arg6[%c0_24, %c143] : memref<16x512xbf16, #tpu.memory_space<vmem>>, vector<16x256xbf16>
    %29 = vector.broadcast %0 : vector<1x256xbf16> to vector<16x256xbf16>
    %30 = arith.mulf %28, %29 : vector<16x256xbf16>
    %c96 = arith.constant 96 : index
    %c0_25 = arith.constant 0 : index
    %31 = vector.load %arg7[%c96, %c0_25] : memref<144x512xbf16, #tpu.memory_space<vmem>>, vector<16x256xbf16>
    tpu.vector_store %arg7[%c96, %c0_25], %30 {strides = array<i32>} : memref<144x512xbf16, #tpu.memory_space<vmem>>, vector<16x256xbf16>,
    %c0_26 = arith.constant 0 : index
    %c144 = arith.constant 144 : index
    %32 = vector.load %arg6[%c0_26, %c144] : memref<16x512xbf16, #tpu.memory_space<vmem>>, vector<16x256xbf16>
    %c112_27 = arith.constant 112 : index
    %c0_28 = arith.constant 0 : index
    %33 = vector.load %arg7[%c112_27, %c0_28] : memref<144x512xbf16, #tpu.memory_space<vmem>>, vector<16x256xbf16>
    tpu.vector_store %arg7[%c112_27, %c0_28], %32 {strides = array<i32>} : memref<144x512xbf16, #tpu.memory_space<vmem>>, vector<16x256xbf16>,
    %c0_29 = arith.constant 0 : index
    %c145 = arith.constant 145 : index
    %34 = vector.load %arg6[%c0_29, %c145] : memref<16x512xbf16, #tpu.memory_space<vmem>>, vector<16x256xbf16>
    %35 = vector.broadcast %1 : vector<1x256xbf16> to vector<16x256xbf16>
    %36 = arith.mulf %34, %35 : vector<16x256xbf16>
    %c128_30 = arith.constant 128 : index
    %c0_31 = arith.constant 0 : index
    %37 = vector.load %arg7[%c128_30, %c0_31] : memref<144x512xbf16, #tpu.memory_space<vmem>>, vector<16x256xbf16>
    tpu.vector_store %arg7[%c128_30, %c0_31], %36 {strides = array<i32>} : memref<144x512xbf16, #tpu.memory_space<vmem>>, vector<16x256xbf16>,
    %c0_32 = arith.constant 0 : index
    %c1_33 = arith.constant 1 : index
    %c0_34 = arith.constant 0 : index
    %c0_35 = arith.constant 0 : index
    %38 = vector.load %arg2[%c0_32, %c1_33, %c0_34, %c0_35] : memref<1x2x16x256xbf16, #tpu.memory_space<vmem>>, vector<1x1x16x256xbf16>
    %39 = vector.shape_cast %38 : vector<1x1x16x256xbf16> to vector<16x256xbf16>
    %c0_36 = arith.constant 0 : index
    %c128_37 = arith.constant 128 : index
    %40 = vector.load %arg6[%c0_36, %c128_37] : memref<16x512xbf16, #tpu.memory_space<vmem>>, vector<16x256xbf16>
    tpu.vector_store %arg6[%c0_36, %c128_37], %39 {strides = array<i32>} : memref<16x512xbf16, #tpu.memory_space<vmem>>, vector<16x256xbf16>,
    %c0_38 = arith.constant 0 : index
    %c111_39 = arith.constant 111 : index
    %41 = vector.load %arg6[%c0_38, %c111_39] : memref<16x512xbf16, #tpu.memory_space<vmem>>, vector<16x256xbf16>
    %42 = vector.broadcast %0 : vector<1x256xbf16> to vector<16x256xbf16>
    %43 = arith.mulf %41, %42 : vector<16x256xbf16>
    %c0_40 = arith.constant 0 : index
    %c256 = arith.constant 256 : index
    %44 = vector.load %arg7[%c0_40, %c256] : memref<144x512xbf16, #tpu.memory_space<vmem>>, vector<16x256xbf16>
    tpu.vector_store %arg7[%c0_40, %c256], %43 {strides = array<i32>} : memref<144x512xbf16, #tpu.memory_space<vmem>>, vector<16x256xbf16>,
    %c0_41 = arith.constant 0 : index
    %c112_42 = arith.constant 112 : index
    %45 = vector.load %arg6[%c0_41, %c112_42] : memref<16x512xbf16, #tpu.memory_space<vmem>>, vector<16x256xbf16>
    %c16_43 = arith.constant 16 : index
    %c256_44 = arith.constant 256 : index
    %46 = vector.load %arg7[%c16_43, %c256_44] : memref<144x512xbf16, #tpu.memory_space<vmem>>, vector<16x256xbf16>
    tpu.vector_store %arg7[%c16_43, %c256_44], %45 {strides = array<i32>} : memref<144x512xbf16, #tpu.memory_space<vmem>>, vector<16x256xbf16>,
    %c0_45 = arith.constant 0 : index
    %c113_46 = arith.constant 113 : index
    %47 = vector.load %arg6[%c0_45, %c113_46] : memref<16x512xbf16, #tpu.memory_space<vmem>>, vector<16x256xbf16>
    %48 = vector.broadcast %1 : vector<1x256xbf16> to vector<16x256xbf16>
    %49 = arith.mulf %47, %48 : vector<16x256xbf16>
    %c32_47 = arith.constant 32 : index
    %c256_48 = arith.constant 256 : index
    %50 = vector.load %arg7[%c32_47, %c256_48] : memref<144x512xbf16, #tpu.memory_space<vmem>>, vector<16x256xbf16>
    tpu.vector_store %arg7[%c32_47, %c256_48], %49 {strides = array<i32>} : memref<144x512xbf16, #tpu.memory_space<vmem>>, vector<16x256xbf16>,
    %c0_49 = arith.constant 0 : index
    %c127_50 = arith.constant 127 : index
    %51 = vector.load %arg6[%c0_49, %c127_50] : memref<16x512xbf16, #tpu.memory_space<vmem>>, vector<16x256xbf16>
    %52 = vector.broadcast %0 : vector<1x256xbf16> to vector<16x256xbf16>
    %53 = arith.mulf %51, %52 : vector<16x256xbf16>
    %c48_51 = arith.constant 48 : index
    %c256_52 = arith.constant 256 : index
    %54 = vector.load %arg7[%c48_51, %c256_52] : memref<144x512xbf16, #tpu.memory_space<vmem>>, vector<16x256xbf16>
    tpu.vector_store %arg7[%c48_51, %c256_52], %53 {strides = array<i32>} : memref<144x512xbf16, #tpu.memory_space<vmem>>, vector<16x256xbf16>,
    %c0_53 = arith.constant 0 : index
    %c128_54 = arith.constant 128 : index
    %55 = vector.load %arg6[%c0_53, %c128_54] : memref<16x512xbf16, #tpu.memory_space<vmem>>, vector<16x256xbf16>
    %c64_55 = arith.constant 64 : index
    %c256_56 = arith.constant 256 : index
    %56 = vector.load %arg7[%c64_55, %c256_56] : memref<144x512xbf16, #tpu.memory_space<vmem>>, vector<16x256xbf16>
    tpu.vector_store %arg7[%c64_55, %c256_56], %55 {strides = array<i32>} : memref<144x512xbf16, #tpu.memory_space<vmem>>, vector<16x256xbf16>,
    %c0_57 = arith.constant 0 : index
    %c129_58 = arith.constant 129 : index
    %57 = vector.load %arg6[%c0_57, %c129_58] : memref<16x512xbf16, #tpu.memory_space<vmem>>, vector<16x256xbf16>
    %58 = vector.broadcast %1 : vector<1x256xbf16> to vector<16x256xbf16>
    %59 = arith.mulf %57, %58 : vector<16x256xbf16>
    %c80_59 = arith.constant 80 : index
    %c256_60 = arith.constant 256 : index
    %60 = vector.load %arg7[%c80_59, %c256_60] : memref<144x512xbf16, #tpu.memory_space<vmem>>, vector<16x256xbf16>
    tpu.vector_store %arg7[%c80_59, %c256_60], %59 {strides = array<i32>} : memref<144x512xbf16, #tpu.memory_space<vmem>>, vector<16x256xbf16>,
    %c0_61 = arith.constant 0 : index
    %c143_62 = arith.constant 143 : index
    %61 = vector.load %arg6[%c0_61, %c143_62] : memref<16x512xbf16, #tpu.memory_space<vmem>>, vector<16x256xbf16>
    %62 = vector.broadcast %0 : vector<1x256xbf16> to vector<16x256xbf16>
    %63 = arith.mulf %61, %62 : vector<16x256xbf16>
    %c96_63 = arith.constant 96 : index
    %c256_64 = arith.constant 256 : index
    %64 = vector.load %arg7[%c96_63, %c256_64] : memref<144x512xbf16, #tpu.memory_space<vmem>>, vector<16x256xbf16>
    tpu.vector_store %arg7[%c96_63, %c256_64], %63 {strides = array<i32>} : memref<144x512xbf16, #tpu.memory_space<vmem>>, vector<16x256xbf16>,
    %c0_65 = arith.constant 0 : index
    %c144_66 = arith.constant 144 : index
    %65 = vector.load %arg6[%c0_65, %c144_66] : memref<16x512xbf16, #tpu.memory_space<vmem>>, vector<16x256xbf16>
    %c112_67 = arith.constant 112 : index
    %c256_68 = arith.constant 256 : index
    %66 = vector.load %arg7[%c112_67, %c256_68] : memref<144x512xbf16, #tpu.memory_space<vmem>>, vector<16x256xbf16>
    tpu.vector_store %arg7[%c112_67, %c256_68], %65 {strides = array<i32>} : memref<144x512xbf16, #tpu.memory_space<vmem>>, vector<16x256xbf16>,
    %c0_69 = arith.constant 0 : index
    %c145_70 = arith.constant 145 : index
    %67 = vector.load %arg6[%c0_69, %c145_70] : memref<16x512xbf16, #tpu.memory_space<vmem>>, vector<16x256xbf16>
    %68 = vector.broadcast %1 : vector<1x256xbf16> to vector<16x256xbf16>
    %69 = arith.mulf %67, %68 : vector<16x256xbf16>
    %c128_71 = arith.constant 128 : index
    %c256_72 = arith.constant 256 : index
    %70 = vector.load %arg7[%c128_71, %c256_72] : memref<144x512xbf16, #tpu.memory_space<vmem>>, vector<16x256xbf16>
    tpu.vector_store %arg7[%c128_71, %c256_72], %69 {strides = array<i32>} : memref<144x512xbf16, #tpu.memory_space<vmem>>, vector<16x256xbf16>,
    %c0_73 = arith.constant 0 : index
    %c0_74 = arith.constant 0 : index
    %c0_75 = arith.constant 0 : index
    %71 = vector.load %arg3[%c0_73, %c0_74, %c0_75] : memref<1x16x144xbf16, #tpu.memory_space<vmem>>, vector<1x16x144xbf16>
    %72 = vector.shape_cast %71 : vector<1x16x144xbf16> to vector<16x144xbf16>
    %c0_76 = arith.constant 0 : index
    %c0_77 = arith.constant 0 : index
    %73 = vector.load %arg7[%c0_76, %c0_77] : memref<144x512xbf16, #tpu.memory_space<vmem>>, vector<144x512xbf16>
    %cst_78 = arith.constant dense<0.000000e+00> : vector<16x512xf32>
    %74 = tpu.matmul %72, %73, %cst_78 {dimension_numbers = #tpu.dot_dimension_numbers<[1], [0], [0], [1], [0, 0, 1, 1], [], []>} : vector<16x144xbf16>, vector<144x512xbf16>, vector<16x512xf32> -> vector<16x512xf32>
    %cst_79 = arith.constant 0.000000e+00 : f32
    %75 = vector.broadcast %cst_79 : f32 to vector<16x512xf32>
    %76 = arith.maximumf %74, %75 : vector<16x512xf32>
    %77 = arith.truncf %76 : vector<16x512xf32> to vector<16x512xbf16>
    %cst_80 = arith.constant 0.000000e+00 : bf16
    %78 = vector.broadcast %cst_80 : bf16 to vector<16x128xbf16>
    %c0_81 = arith.constant 0 : index
    %c0_82 = arith.constant 0 : index
    %79 = vector.load %arg8[%c0_81, %c0_82] : memref<16x512xbf16, #tpu.memory_space<vmem>>, vector<16x128xbf16>
    tpu.vector_store %arg8[%c0_81, %c0_82], %78 {strides = array<i32>} : memref<16x512xbf16, #tpu.memory_space<vmem>>, vector<16x128xbf16>,
    %c0_83 = arith.constant 0 : index
    %c384_84 = arith.constant 384 : index
    %80 = vector.load %arg8[%c0_83, %c384_84] : memref<16x512xbf16, #tpu.memory_space<vmem>>, vector<16x128xbf16>
    tpu.vector_store %arg8[%c0_83, %c384_84], %78 {strides = array<i32>} : memref<16x512xbf16, #tpu.memory_space<vmem>>, vector<16x128xbf16>,
    %81 = vector.extract_strided_slice %77 {offsets = [0, 0], sizes = [16, 256], strides = [1, 1]} : vector<16x512xbf16> to vector<16x256xbf16>
    %c0_85 = arith.constant 0 : index
    %c128_86 = arith.constant 128 : index
    %82 = vector.load %arg8[%c0_85, %c128_86] : memref<16x512xbf16, #tpu.memory_space<vmem>>, vector<16x256xbf16>
    tpu.vector_store %arg8[%c0_85, %c128_86], %81 {strides = array<i32>} : memref<16x512xbf16, #tpu.memory_space<vmem>>, vector<16x256xbf16>,
    %c0_87 = arith.constant 0 : index
    %c111_88 = arith.constant 111 : index
    %83 = vector.load %arg8[%c0_87, %c111_88] : memref<16x512xbf16, #tpu.memory_space<vmem>>, vector<16x256xbf16>
    %84 = vector.broadcast %0 : vector<1x256xbf16> to vector<16x256xbf16>
    %85 = arith.mulf %83, %84 : vector<16x256xbf16>
    %c0_89 = arith.constant 0 : index
    %c0_90 = arith.constant 0 : index
    %86 = vector.load %arg9[%c0_89, %c0_90] : memref<144x512xbf16, #tpu.memory_space<vmem>>, vector<16x256xbf16>
    tpu.vector_store %arg9[%c0_89, %c0_90], %85 {strides = array<i32>} : memref<144x512xbf16, #tpu.memory_space<vmem>>, vector<16x256xbf16>,
    %c0_91 = arith.constant 0 : index
    %c112_92 = arith.constant 112 : index
    %87 = vector.load %arg8[%c0_91, %c112_92] : memref<16x512xbf16, #tpu.memory_space<vmem>>, vector<16x256xbf16>
    %c16_93 = arith.constant 16 : index
    %c0_94 = arith.constant 0 : index
    %88 = vector.load %arg9[%c16_93, %c0_94] : memref<144x512xbf16, #tpu.memory_space<vmem>>, vector<16x256xbf16>
    tpu.vector_store %arg9[%c16_93, %c0_94], %87 {strides = array<i32>} : memref<144x512xbf16, #tpu.memory_space<vmem>>, vector<16x256xbf16>,
    %c0_95 = arith.constant 0 : index
    %c113_96 = arith.constant 113 : index
    %89 = vector.load %arg8[%c0_95, %c113_96] : memref<16x512xbf16, #tpu.memory_space<vmem>>, vector<16x256xbf16>
    %90 = vector.broadcast %1 : vector<1x256xbf16> to vector<16x256xbf16>
    %91 = arith.mulf %89, %90 : vector<16x256xbf16>
    %c32_97 = arith.constant 32 : index
    %c0_98 = arith.constant 0 : index
    %92 = vector.load %arg9[%c32_97, %c0_98] : memref<144x512xbf16, #tpu.memory_space<vmem>>, vector<16x256xbf16>
    tpu.vector_store %arg9[%c32_97, %c0_98], %91 {strides = array<i32>} : memref<144x512xbf16, #tpu.memory_space<vmem>>, vector<16x256xbf16>,
    %c0_99 = arith.constant 0 : index
    %c127_100 = arith.constant 127 : index
    %93 = vector.load %arg8[%c0_99, %c127_100] : memref<16x512xbf16, #tpu.memory_space<vmem>>, vector<16x256xbf16>
    %94 = vector.broadcast %0 : vector<1x256xbf16> to vector<16x256xbf16>
    %95 = arith.mulf %93, %94 : vector<16x256xbf16>
    %c48_101 = arith.constant 48 : index
    %c0_102 = arith.constant 0 : index
    %96 = vector.load %arg9[%c48_101, %c0_102] : memref<144x512xbf16, #tpu.memory_space<vmem>>, vector<16x256xbf16>
    tpu.vector_store %arg9[%c48_101, %c0_102], %95 {strides = array<i32>} : memref<144x512xbf16, #tpu.memory_space<vmem>>, vector<16x256xbf16>,
    %c0_103 = arith.constant 0 : index
    %c128_104 = arith.constant 128 : index
    %97 = vector.load %arg8[%c0_103, %c128_104] : memref<16x512xbf16, #tpu.memory_space<vmem>>, vector<16x256xbf16>
    %c64_105 = arith.constant 64 : index
    %c0_106 = arith.constant 0 : index
    %98 = vector.load %arg9[%c64_105, %c0_106] : memref<144x512xbf16, #tpu.memory_space<vmem>>, vector<16x256xbf16>
    tpu.vector_store %arg9[%c64_105, %c0_106], %97 {strides = array<i32>} : memref<144x512xbf16, #tpu.memory_space<vmem>>, vector<16x256xbf16>,
    %c0_107 = arith.constant 0 : index
    %c129_108 = arith.constant 129 : index
    %99 = vector.load %arg8[%c0_107, %c129_108] : memref<16x512xbf16, #tpu.memory_space<vmem>>, vector<16x256xbf16>
    %100 = vector.broadcast %1 : vector<1x256xbf16> to vector<16x256xbf16>
    %101 = arith.mulf %99, %100 : vector<16x256xbf16>
    %c80_109 = arith.constant 80 : index
    %c0_110 = arith.constant 0 : index
    %102 = vector.load %arg9[%c80_109, %c0_110] : memref<144x512xbf16, #tpu.memory_space<vmem>>, vector<16x256xbf16>
    tpu.vector_store %arg9[%c80_109, %c0_110], %101 {strides = array<i32>} : memref<144x512xbf16, #tpu.memory_space<vmem>>, vector<16x256xbf16>,
    %c0_111 = arith.constant 0 : index
    %c143_112 = arith.constant 143 : index
    %103 = vector.load %arg8[%c0_111, %c143_112] : memref<16x512xbf16, #tpu.memory_space<vmem>>, vector<16x256xbf16>
    %104 = vector.broadcast %0 : vector<1x256xbf16> to vector<16x256xbf16>
    %105 = arith.mulf %103, %104 : vector<16x256xbf16>
    %c96_113 = arith.constant 96 : index
    %c0_114 = arith.constant 0 : index
    %106 = vector.load %arg9[%c96_113, %c0_114] : memref<144x512xbf16, #tpu.memory_space<vmem>>, vector<16x256xbf16>
    tpu.vector_store %arg9[%c96_113, %c0_114], %105 {strides = array<i32>} : memref<144x512xbf16, #tpu.memory_space<vmem>>, vector<16x256xbf16>,
    %c0_115 = arith.constant 0 : index
    %c144_116 = arith.constant 144 : index
    %107 = vector.load %arg8[%c0_115, %c144_116] : memref<16x512xbf16, #tpu.memory_space<vmem>>, vector<16x256xbf16>
    %c112_117 = arith.constant 112 : index
    %c0_118 = arith.constant 0 : index
    %108 = vector.load %arg9[%c112_117, %c0_118] : memref<144x512xbf16, #tpu.memory_space<vmem>>, vector<16x256xbf16>
    tpu.vector_store %arg9[%c112_117, %c0_118], %107 {strides = array<i32>} : memref<144x512xbf16, #tpu.memory_space<vmem>>, vector<16x256xbf16>,
    %c0_119 = arith.constant 0 : index
    %c145_120 = arith.constant 145 : index
    %109 = vector.load %arg8[%c0_119, %c145_120] : memref<16x512xbf16, #tpu.memory_space<vmem>>, vector<16x256xbf16>
    %110 = vector.broadcast %1 : vector<1x256xbf16> to vector<16x256xbf16>
    %111 = arith.mulf %109, %110 : vector<16x256xbf16>
    %c128_121 = arith.constant 128 : index
    %c0_122 = arith.constant 0 : index
    %112 = vector.load %arg9[%c128_121, %c0_122] : memref<144x512xbf16, #tpu.memory_space<vmem>>, vector<16x256xbf16>
    tpu.vector_store %arg9[%c128_121, %c0_122], %111 {strides = array<i32>} : memref<144x512xbf16, #tpu.memory_space<vmem>>, vector<16x256xbf16>,
    %113 = vector.extract_strided_slice %77 {offsets = [0, 256], sizes = [16, 256], strides = [1, 1]} : vector<16x512xbf16> to vector<16x256xbf16>
    %c0_123 = arith.constant 0 : index
    %c128_124 = arith.constant 128 : index
    %114 = vector.load %arg8[%c0_123, %c128_124] : memref<16x512xbf16, #tpu.memory_space<vmem>>, vector<16x256xbf16>
    tpu.vector_store %arg8[%c0_123, %c128_124], %113 {strides = array<i32>} : memref<16x512xbf16, #tpu.memory_space<vmem>>, vector<16x256xbf16>,
    %c0_125 = arith.constant 0 : index
    %c111_126 = arith.constant 111 : index
    %115 = vector.load %arg8[%c0_125, %c111_126] : memref<16x512xbf16, #tpu.memory_space<vmem>>, vector<16x256xbf16>
    %116 = vector.broadcast %0 : vector<1x256xbf16> to vector<16x256xbf16>
    %117 = arith.mulf %115, %116 : vector<16x256xbf16>
    %c0_127 = arith.constant 0 : index
    %c256_128 = arith.constant 256 : index
    %118 = vector.load %arg9[%c0_127, %c256_128] : memref<144x512xbf16, #tpu.memory_space<vmem>>, vector<16x256xbf16>
    tpu.vector_store %arg9[%c0_127, %c256_128], %117 {strides = array<i32>} : memref<144x512xbf16, #tpu.memory_space<vmem>>, vector<16x256xbf16>,
    %c0_129 = arith.constant 0 : index
    %c112_130 = arith.constant 112 : index
    %119 = vector.load %arg8[%c0_129, %c112_130] : memref<16x512xbf16, #tpu.memory_space<vmem>>, vector<16x256xbf16>
    %c16_131 = arith.constant 16 : index
    %c256_132 = arith.constant 256 : index
    %120 = vector.load %arg9[%c16_131, %c256_132] : memref<144x512xbf16, #tpu.memory_space<vmem>>, vector<16x256xbf16>
    tpu.vector_store %arg9[%c16_131, %c256_132], %119 {strides = array<i32>} : memref<144x512xbf16, #tpu.memory_space<vmem>>, vector<16x256xbf16>,
    %c0_133 = arith.constant 0 : index
    %c113_134 = arith.constant 113 : index
    %121 = vector.load %arg8[%c0_133, %c113_134] : memref<16x512xbf16, #tpu.memory_space<vmem>>, vector<16x256xbf16>
    %122 = vector.broadcast %1 : vector<1x256xbf16> to vector<16x256xbf16>
    %123 = arith.mulf %121, %122 : vector<16x256xbf16>
    %c32_135 = arith.constant 32 : index
    %c256_136 = arith.constant 256 : index
    %124 = vector.load %arg9[%c32_135, %c256_136] : memref<144x512xbf16, #tpu.memory_space<vmem>>, vector<16x256xbf16>
    tpu.vector_store %arg9[%c32_135, %c256_136], %123 {strides = array<i32>} : memref<144x512xbf16, #tpu.memory_space<vmem>>, vector<16x256xbf16>,
    %c0_137 = arith.constant 0 : index
    %c127_138 = arith.constant 127 : index
    %125 = vector.load %arg8[%c0_137, %c127_138] : memref<16x512xbf16, #tpu.memory_space<vmem>>, vector<16x256xbf16>
    %126 = vector.broadcast %0 : vector<1x256xbf16> to vector<16x256xbf16>
    %127 = arith.mulf %125, %126 : vector<16x256xbf16>
    %c48_139 = arith.constant 48 : index
    %c256_140 = arith.constant 256 : index
    %128 = vector.load %arg9[%c48_139, %c256_140] : memref<144x512xbf16, #tpu.memory_space<vmem>>, vector<16x256xbf16>
    tpu.vector_store %arg9[%c48_139, %c256_140], %127 {strides = array<i32>} : memref<144x512xbf16, #tpu.memory_space<vmem>>, vector<16x256xbf16>,
    %c0_141 = arith.constant 0 : index
    %c128_142 = arith.constant 128 : index
    %129 = vector.load %arg8[%c0_141, %c128_142] : memref<16x512xbf16, #tpu.memory_space<vmem>>, vector<16x256xbf16>
    %c64_143 = arith.constant 64 : index
    %c256_144 = arith.constant 256 : index
    %130 = vector.load %arg9[%c64_143, %c256_144] : memref<144x512xbf16, #tpu.memory_space<vmem>>, vector<16x256xbf16>
    tpu.vector_store %arg9[%c64_143, %c256_144], %129 {strides = array<i32>} : memref<144x512xbf16, #tpu.memory_space<vmem>>, vector<16x256xbf16>,
    %c0_145 = arith.constant 0 : index
    %c129_146 = arith.constant 129 : index
    %131 = vector.load %arg8[%c0_145, %c129_146] : memref<16x512xbf16, #tpu.memory_space<vmem>>, vector<16x256xbf16>
    %132 = vector.broadcast %1 : vector<1x256xbf16> to vector<16x256xbf16>
    %133 = arith.mulf %131, %132 : vector<16x256xbf16>
    %c80_147 = arith.constant 80 : index
    %c256_148 = arith.constant 256 : index
    %134 = vector.load %arg9[%c80_147, %c256_148] : memref<144x512xbf16, #tpu.memory_space<vmem>>, vector<16x256xbf16>
    tpu.vector_store %arg9[%c80_147, %c256_148], %133 {strides = array<i32>} : memref<144x512xbf16, #tpu.memory_space<vmem>>, vector<16x256xbf16>,
    %c0_149 = arith.constant 0 : index
    %c143_150 = arith.constant 143 : index
    %135 = vector.load %arg8[%c0_149, %c143_150] : memref<16x512xbf16, #tpu.memory_space<vmem>>, vector<16x256xbf16>
    %136 = vector.broadcast %0 : vector<1x256xbf16> to vector<16x256xbf16>
    %137 = arith.mulf %135, %136 : vector<16x256xbf16>
    %c96_151 = arith.constant 96 : index
    %c256_152 = arith.constant 256 : index
    %138 = vector.load %arg9[%c96_151, %c256_152] : memref<144x512xbf16, #tpu.memory_space<vmem>>, vector<16x256xbf16>
    tpu.vector_store %arg9[%c96_151, %c256_152], %137 {strides = array<i32>} : memref<144x512xbf16, #tpu.memory_space<vmem>>, vector<16x256xbf16>,
    %c0_153 = arith.constant 0 : index
    %c144_154 = arith.constant 144 : index
    %139 = vector.load %arg8[%c0_153, %c144_154] : memref<16x512xbf16, #tpu.memory_space<vmem>>, vector<16x256xbf16>
    %c112_155 = arith.constant 112 : index
    %c256_156 = arith.constant 256 : index
    %140 = vector.load %arg9[%c112_155, %c256_156] : memref<144x512xbf16, #tpu.memory_space<vmem>>, vector<16x256xbf16>
    tpu.vector_store %arg9[%c112_155, %c256_156], %139 {strides = array<i32>} : memref<144x512xbf16, #tpu.memory_space<vmem>>, vector<16x256xbf16>,
    %c0_157 = arith.constant 0 : index
    %c145_158 = arith.constant 145 : index
    %141 = vector.load %arg8[%c0_157, %c145_158] : memref<16x512xbf16, #tpu.memory_space<vmem>>, vector<16x256xbf16>
    %142 = vector.broadcast %1 : vector<1x256xbf16> to vector<16x256xbf16>
    %143 = arith.mulf %141, %142 : vector<16x256xbf16>
    %c128_159 = arith.constant 128 : index
    %c256_160 = arith.constant 256 : index
    %144 = vector.load %arg9[%c128_159, %c256_160] : memref<144x512xbf16, #tpu.memory_space<vmem>>, vector<16x256xbf16>
    tpu.vector_store %arg9[%c128_159, %c256_160], %143 {strides = array<i32>} : memref<144x512xbf16, #tpu.memory_space<vmem>>, vector<16x256xbf16>,
    %c0_161 = arith.constant 0 : index
    %c0_162 = arith.constant 0 : index
    %c0_163 = arith.constant 0 : index
    %145 = vector.load %arg4[%c0_161, %c0_162, %c0_163] : memref<1x8x144xbf16, #tpu.memory_space<vmem>>, vector<1x8x144xbf16>
    %146 = vector.shape_cast %145 : vector<1x8x144xbf16> to vector<8x144xbf16>
    %c0_164 = arith.constant 0 : index
    %c0_165 = arith.constant 0 : index
    %147 = vector.load %arg9[%c0_164, %c0_165] : memref<144x512xbf16, #tpu.memory_space<vmem>>, vector<144x512xbf16>
    %cst_166 = arith.constant dense<0.000000e+00> : vector<8x512xf32>
    %148 = tpu.matmul %146, %147, %cst_166 {dimension_numbers = #tpu.dot_dimension_numbers<[1], [0], [0], [1], [0, 0, 1, 1], [], []>} : vector<8x144xbf16>, vector<144x512xbf16>, vector<8x512xf32> -> vector<8x512xf32>
    %149 = vector.extract_strided_slice %148 {offsets = [0, 0], sizes = [8, 256], strides = [1, 1]} : vector<8x512xf32> to vector<8x256xf32>
    %c0_167 = arith.constant 0 : index
    %c0_168 = arith.constant 0 : index
    %c0_169 = arith.constant 0 : index
    %c0_170 = arith.constant 0 : index
    %150 = vector.load %arg5[%c0_167, %c0_168, %c0_169, %c0_170] : memref<1x2x8x256xf32, #tpu.memory_space<vmem>>, vector<1x1x8x256xf32>
    %151 = vector.shape_cast %150 : vector<1x1x8x256xf32> to vector<8x256xf32>
    %152 = vector.shape_cast %149 : vector<8x256xf32> to vector<1x1x8x256xf32>
    tpu.vector_store %arg5[%c0_167, %c0_168, %c0_169, %c0_170], %152 {strides = array<i32>} : memref<1x2x8x256xf32, #tpu.memory_space<vmem>>, vector<1x1x8x256xf32>,
    %153 = vector.extract_strided_slice %148 {offsets = [0, 256], sizes = [8, 256], strides = [1, 1]} : vector<8x512xf32> to vector<8x256xf32>
    %c0_171 = arith.constant 0 : index
    %c1_172 = arith.constant 1 : index
    %c0_173 = arith.constant 0 : index
    %c0_174 = arith.constant 0 : index
    %154 = vector.load %arg5[%c0_171, %c1_172, %c0_173, %c0_174] : memref<1x2x8x256xf32, #tpu.memory_space<vmem>>, vector<1x1x8x256xf32>
    %155 = vector.shape_cast %154 : vector<1x1x8x256xf32> to vector<8x256xf32>
    %156 = vector.shape_cast %153 : vector<8x256xf32> to vector<1x1x8x256xf32>
    tpu.vector_store %arg5[%c0_171, %c1_172, %c0_173, %c0_174], %156 {strides = array<i32>} : memref<1x2x8x256xf32, #tpu.memory_space<vmem>>, vector<1x1x8x256xf32>,
    return
  }
  func.func @transform_0(%arg0: i32) -> (i32, i32) {
    %c0_i32 = arith.constant 0 : i32
    %c0_i32_0 = arith.constant 0 : i32
    %c0_i32_1 = arith.constant 0 : i32
    return %c0_i32, %c0_i32_0 : i32, i32
  }
  func.func @transform_1(%arg0: i32) -> (i32, i32, i32, i32) {
    %c0_i32 = arith.constant 0 : i32
    %c0_i32_0 = arith.constant 0 : i32
    %c0_i32_1 = arith.constant 0 : i32
    %c0_i32_2 = arith.constant 0 : i32
    return %arg0, %c0_i32, %c0_i32_0, %c0_i32_1 : i32, i32, i32, i32
  }
  func.func @transform_2(%arg0: i32) -> (i32, i32, i32) {
    %c0_i32 = arith.constant 0 : i32
    %c0_i32_0 = arith.constant 0 : i32
    %c0_i32_1 = arith.constant 0 : i32
    return %arg0, %c0_i32, %c0_i32_0 : i32, i32, i32
  }
  func.func @transform_3(%arg0: i32) -> (i32, i32, i32) {
    %c0_i32 = arith.constant 0 : i32
    %c0_i32_0 = arith.constant 0 : i32
    %c0_i32_1 = arith.constant 0 : i32
    return %arg0, %c0_i32, %c0_i32_0 : i32, i32, i32
  }
  func.func @transform_4(%arg0: i32) -> (i32, i32, i32, i32) {
    %c0_i32 = arith.constant 0 : i32
    %c0_i32_0 = arith.constant 0 : i32
    %c0_i32_1 = arith.constant 0 : i32
    %c0_i32_2 = arith.constant 0 : i32
    return %arg0, %c0_i32, %c0_i32_0, %c0_i32_1 : i32, i32, i32, i32
  }
}

module attributes {stable_mosaic.version = 11 : i64} {
  func.func @_fused_projector_kernel(%arg0: i32, %arg1: memref<2x256xbf16, #tpu.memory_space<vmem>>, %arg2: memref<1x2x16x256xbf16, #tpu.memory_space<vmem>>, %arg3: memref<1x16x144xbf16, #tpu.memory_space<vmem>>, %arg4: memref<1x8x144xbf16, #tpu.memory_space<vmem>>, %arg5: memref<1x2x8x256xf32, #tpu.memory_space<vmem>>, %arg6: memref<16x512xbf16, #tpu.memory_space<vmem>>, %arg7: memref<144x512xbf16, #tpu.memory_space<vmem>>, %arg8: memref<16x512xbf16, #tpu.memory_space<vmem>>, %arg9: memref<144x512xbf16, #tpu.memory_space<vmem>>) attributes {dimension_semantics = [#tpu.dimension_semantics<parallel>], iteration_bounds = array<i64: 2>, scalar_prefetch = 0 : i64, scratch_operands = 4 : i64, tpu.core_type = #tpu.core_type<tc>, window_params = [{pipeline_mode = #tpu.pipeline_mode<synchronous>, transform_indices = @transform_0, window_bounds = array<i64: 2, 256>}, {transform_indices = @transform_1, window_bounds = array<i64: 1, 2, 16, 256>}, {transform_indices = @transform_2, window_bounds = array<i64: 1, 16, 144>}, {transform_indices = @transform_3, window_bounds = array<i64: 1, 8, 144>}, {transform_indices = @transform_4, window_bounds = array<i64: 1, 2, 8, 256>}]} {
    %c0 = arith.constant 0 : index
    %c0_0 = arith.constant 0 : index
    %0 = vector.load %arg1[%c0, %c0_0] : memref<2x256xbf16, #tpu.memory_space<vmem>>, vector<1x256xbf16>
    %c1 = arith.constant 1 : index
    %c0_1 = arith.constant 0 : index
    %1 = vector.load %arg1[%c1, %c0_1] : memref<2x256xbf16, #tpu.memory_space<vmem>>, vector<1x256xbf16>
    %cst = arith.constant 0.000000e+00 : bf16
    %2 = vector.broadcast %cst : bf16 to vector<16x128xbf16>
    %c0_2 = arith.constant 0 : index
    %c0_3 = arith.constant 0 : index
    %3 = vector.load %arg6[%c0_2, %c0_3] : memref<16x512xbf16, #tpu.memory_space<vmem>>, vector<16x128xbf16>
    tpu.vector_store %arg6[%c0_2, %c0_3], %2 {strides = array<i32>} : memref<16x512xbf16, #tpu.memory_space<vmem>>, vector<16x128xbf16>,
    %c0_4 = arith.constant 0 : index
    %c384 = arith.constant 384 : index
    %4 = vector.load %arg6[%c0_4, %c384] : memref<16x512xbf16, #tpu.memory_space<vmem>>, vector<16x128xbf16>
    tpu.vector_store %arg6[%c0_4, %c384], %2 {strides = array<i32>} : memref<16x512xbf16, #tpu.memory_space<vmem>>, vector<16x128xbf16>,
    %c0_5 = arith.constant 0 : index
    %c0_6 = arith.constant 0 : index
    %c0_7 = arith.constant 0 : index
    %c0_8 = arith.constant 0 : index
    %5 = vector.load %arg2[%c0_5, %c0_6, %c0_7, %c0_8] : memref<1x2x16x256xbf16, #tpu.memory_space<vmem>>, vector<1x1x16x256xbf16>
    %6 = vector.shape_cast %5 : vector<1x1x16x256xbf16> to vector<16x256xbf16>
    %c0_9 = arith.constant 0 : index
    %c128 = arith.constant 128 : index
    %7 = vector.load %arg6[%c0_9, %c128] : memref<16x512xbf16, #tpu.memory_space<vmem>>, vector<16x256xbf16>
    tpu.vector_store %arg6[%c0_9, %c128], %6 {strides = array<i32>} : memref<16x512xbf16, #tpu.memory_space<vmem>>, vector<16x256xbf16>,
    %c0_10 = arith.constant 0 : index
    %c111 = arith.constant 111 : index
    %8 = vector.load %arg6[%c0_10, %c111] : memref<16x512xbf16, #tpu.memory_space<vmem>>, vector<16x256xbf16>
    %9 = vector.broadcast %0 : vector<1x256xbf16> to vector<16x256xbf16>
    %10 = arith.mulf %8, %9 : vector<16x256xbf16>
    %c0_11 = arith.constant 0 : index
    %c0_12 = arith.constant 0 : index
    %11 = vector.load %arg7[%c0_11, %c0_12] : memref<144x512xbf16, #tpu.memory_space<vmem>>, vector<16x256xbf16>
    tpu.vector_store %arg7[%c0_11, %c0_12], %10 {strides = array<i32>} : memref<144x512xbf16, #tpu.memory_space<vmem>>, vector<16x256xbf16>,
    %c0_13 = arith.constant 0 : index
    %c112 = arith.constant 112 : index
    %12 = vector.load %arg6[%c0_13, %c112] : memref<16x512xbf16, #tpu.memory_space<vmem>>, vector<16x256xbf16>
    %c16 = arith.constant 16 : index
    %c0_14 = arith.constant 0 : index
    %13 = vector.load %arg7[%c16, %c0_14] : memref<144x512xbf16, #tpu.memory_space<vmem>>, vector<16x256xbf16>
    tpu.vector_store %arg7[%c16, %c0_14], %12 {strides = array<i32>} : memref<144x512xbf16, #tpu.memory_space<vmem>>, vector<16x256xbf16>,
    %c0_15 = arith.constant 0 : index
    %c113 = arith.constant 113 : index
    %14 = vector.load %arg6[%c0_15, %c113] : memref<16x512xbf16, #tpu.memory_space<vmem>>, vector<16x256xbf16>
    %15 = vector.broadcast %1 : vector<1x256xbf16> to vector<16x256xbf16>
    %16 = arith.mulf %14, %15 : vector<16x256xbf16>
    %c32 = arith.constant 32 : index
    %c0_16 = arith.constant 0 : index
    %17 = vector.load %arg7[%c32, %c0_16] : memref<144x512xbf16, #tpu.memory_space<vmem>>, vector<16x256xbf16>
    tpu.vector_store %arg7[%c32, %c0_16], %16 {strides = array<i32>} : memref<144x512xbf16, #tpu.memory_space<vmem>>, vector<16x256xbf16>,
    %c0_17 = arith.constant 0 : index
    %c127 = arith.constant 127 : index
    %18 = vector.load %arg6[%c0_17, %c127] : memref<16x512xbf16, #tpu.memory_space<vmem>>, vector<16x256xbf16>
    %19 = vector.broadcast %0 : vector<1x256xbf16> to vector<16x256xbf16>
    %20 = arith.mulf %18, %19 : vector<16x256xbf16>
    %c48 = arith.constant 48 : index
    %c0_18 = arith.constant 0 : index
    %21 = vector.load %arg7[%c48, %c0_18] : memref<144x512xbf16, #tpu.memory_space<vmem>>, vector<16x256xbf16>
    tpu.vector_store %arg7[%c48, %c0_18], %20 {strides = array<i32>} : memref<144x512xbf16, #tpu.memory_space<vmem>>, vector<16x256xbf16>,
    %c0_19 = arith.constant 0 : index
    %c128_20 = arith.constant 128 : index
    %22 = vector.load %arg6[%c0_19, %c128_20] : memref<16x512xbf16, #tpu.memory_space<vmem>>, vector<16x256xbf16>
    %c64 = arith.constant 64 : index
    %c0_21 = arith.constant 0 : index
    %23 = vector.load %arg7[%c64, %c0_21] : memref<144x512xbf16, #tpu.memory_space<vmem>>, vector<16x256xbf16>
    tpu.vector_store %arg7[%c64, %c0_21], %22 {strides = array<i32>} : memref<144x512xbf16, #tpu.memory_space<vmem>>, vector<16x256xbf16>,
    %c0_22 = arith.constant 0 : index
    %c129 = arith.constant 129 : index
    %24 = vector.load %arg6[%c0_22, %c129] : memref<16x512xbf16, #tpu.memory_space<vmem>>, vector<16x256xbf16>
    %25 = vector.broadcast %1 : vector<1x256xbf16> to vector<16x256xbf16>
    %26 = arith.mulf %24, %25 : vector<16x256xbf16>
    %c80 = arith.constant 80 : index
    %c0_23 = arith.constant 0 : index
    %27 = vector.load %arg7[%c80, %c0_23] : memref<144x512xbf16, #tpu.memory_space<vmem>>, vector<16x256xbf16>
    tpu.vector_store %arg7[%c80, %c0_23], %26 {strides = array<i32>} : memref<144x512xbf16, #tpu.memory_space<vmem>>, vector<16x256xbf16>,
    %c0_24 = arith.constant 0 : index
    %c143 = arith.constant 143 : index
    %28 = vector.load %arg6[%c0_24, %c143] : memref<16x512xbf16, #tpu.memory_space<vmem>>, vector<16x256xbf16>
    %29 = vector.broadcast %0 : vector<1x256xbf16> to vector<16x256xbf16>
    %30 = arith.mulf %28, %29 : vector<16x256xbf16>
    %c96 = arith.constant 96 : index
    %c0_25 = arith.constant 0 : index
    %31 = vector.load %arg7[%c96, %c0_25] : memref<144x512xbf16, #tpu.memory_space<vmem>>, vector<16x256xbf16>
    tpu.vector_store %arg7[%c96, %c0_25], %30 {strides = array<i32>} : memref<144x512xbf16, #tpu.memory_space<vmem>>, vector<16x256xbf16>,
    %c0_26 = arith.constant 0 : index
    %c144 = arith.constant 144 : index
    %32 = vector.load %arg6[%c0_26, %c144] : memref<16x512xbf16, #tpu.memory_space<vmem>>, vector<16x256xbf16>
    %c112_27 = arith.constant 112 : index
    %c0_28 = arith.constant 0 : index
    %33 = vector.load %arg7[%c112_27, %c0_28] : memref<144x512xbf16, #tpu.memory_space<vmem>>, vector<16x256xbf16>
    tpu.vector_store %arg7[%c112_27, %c0_28], %32 {strides = array<i32>} : memref<144x512xbf16, #tpu.memory_space<vmem>>, vector<16x256xbf16>,
    %c0_29 = arith.constant 0 : index
    %c145 = arith.constant 145 : index
    %34 = vector.load %arg6[%c0_29, %c145] : memref<16x512xbf16, #tpu.memory_space<vmem>>, vector<16x256xbf16>
    %35 = vector.broadcast %1 : vector<1x256xbf16> to vector<16x256xbf16>
    %36 = arith.mulf %34, %35 : vector<16x256xbf16>
    %c128_30 = arith.constant 128 : index
    %c0_31 = arith.constant 0 : index
    %37 = vector.load %arg7[%c128_30, %c0_31] : memref<144x512xbf16, #tpu.memory_space<vmem>>, vector<16x256xbf16>
    tpu.vector_store %arg7[%c128_30, %c0_31], %36 {strides = array<i32>} : memref<144x512xbf16, #tpu.memory_space<vmem>>, vector<16x256xbf16>,
    %c0_32 = arith.constant 0 : index
    %c1_33 = arith.constant 1 : index
    %c0_34 = arith.constant 0 : index
    %c0_35 = arith.constant 0 : index
    %38 = vector.load %arg2[%c0_32, %c1_33, %c0_34, %c0_35] : memref<1x2x16x256xbf16, #tpu.memory_space<vmem>>, vector<1x1x16x256xbf16>
    %39 = vector.shape_cast %38 : vector<1x1x16x256xbf16> to vector<16x256xbf16>
    %c0_36 = arith.constant 0 : index
    %c128_37 = arith.constant 128 : index
    %40 = vector.load %arg6[%c0_36, %c128_37] : memref<16x512xbf16, #tpu.memory_space<vmem>>, vector<16x256xbf16>
    tpu.vector_store %arg6[%c0_36, %c128_37], %39 {strides = array<i32>} : memref<16x512xbf16, #tpu.memory_space<vmem>>, vector<16x256xbf16>,
    %c0_38 = arith.constant 0 : index
    %c111_39 = arith.constant 111 : index
    %41 = vector.load %arg6[%c0_38, %c111_39] : memref<16x512xbf16, #tpu.memory_space<vmem>>, vector<16x256xbf16>
    %42 = vector.broadcast %0 : vector<1x256xbf16> to vector<16x256xbf16>
    %43 = arith.mulf %41, %42 : vector<16x256xbf16>
    %c0_40 = arith.constant 0 : index
    %c256 = arith.constant 256 : index
    %44 = vector.load %arg7[%c0_40, %c256] : memref<144x512xbf16, #tpu.memory_space<vmem>>, vector<16x256xbf16>
    tpu.vector_store %arg7[%c0_40, %c256], %43 {strides = array<i32>} : memref<144x512xbf16, #tpu.memory_space<vmem>>, vector<16x256xbf16>,
    %c0_41 = arith.constant 0 : index
    %c112_42 = arith.constant 112 : index
    %45 = vector.load %arg6[%c0_41, %c112_42] : memref<16x512xbf16, #tpu.memory_space<vmem>>, vector<16x256xbf16>
    %c16_43 = arith.constant 16 : index
    %c256_44 = arith.constant 256 : index
    %46 = vector.load %arg7[%c16_43, %c256_44] : memref<144x512xbf16, #tpu.memory_space<vmem>>, vector<16x256xbf16>
    tpu.vector_store %arg7[%c16_43, %c256_44], %45 {strides = array<i32>} : memref<144x512xbf16, #tpu.memory_space<vmem>>, vector<16x256xbf16>,
    %c0_45 = arith.constant 0 : index
    %c113_46 = arith.constant 113 : index
    %47 = vector.load %arg6[%c0_45, %c113_46] : memref<16x512xbf16, #tpu.memory_space<vmem>>, vector<16x256xbf16>
    %48 = vector.broadcast %1 : vector<1x256xbf16> to vector<16x256xbf16>
    %49 = arith.mulf %47, %48 : vector<16x256xbf16>
    %c32_47 = arith.constant 32 : index
    %c256_48 = arith.constant 256 : index
    %50 = vector.load %arg7[%c32_47, %c256_48] : memref<144x512xbf16, #tpu.memory_space<vmem>>, vector<16x256xbf16>
    tpu.vector_store %arg7[%c32_47, %c256_48], %49 {strides = array<i32>} : memref<144x512xbf16, #tpu.memory_space<vmem>>, vector<16x256xbf16>,
    %c0_49 = arith.constant 0 : index
    %c127_50 = arith.constant 127 : index
    %51 = vector.load %arg6[%c0_49, %c127_50] : memref<16x512xbf16, #tpu.memory_space<vmem>>, vector<16x256xbf16>
    %52 = vector.broadcast %0 : vector<1x256xbf16> to vector<16x256xbf16>
    %53 = arith.mulf %51, %52 : vector<16x256xbf16>
    %c48_51 = arith.constant 48 : index
    %c256_52 = arith.constant 256 : index
    %54 = vector.load %arg7[%c48_51, %c256_52] : memref<144x512xbf16, #tpu.memory_space<vmem>>, vector<16x256xbf16>
    tpu.vector_store %arg7[%c48_51, %c256_52], %53 {strides = array<i32>} : memref<144x512xbf16, #tpu.memory_space<vmem>>, vector<16x256xbf16>,
    %c0_53 = arith.constant 0 : index
    %c128_54 = arith.constant 128 : index
    %55 = vector.load %arg6[%c0_53, %c128_54] : memref<16x512xbf16, #tpu.memory_space<vmem>>, vector<16x256xbf16>
    %c64_55 = arith.constant 64 : index
    %c256_56 = arith.constant 256 : index
    %56 = vector.load %arg7[%c64_55, %c256_56] : memref<144x512xbf16, #tpu.memory_space<vmem>>, vector<16x256xbf16>
    tpu.vector_store %arg7[%c64_55, %c256_56], %55 {strides = array<i32>} : memref<144x512xbf16, #tpu.memory_space<vmem>>, vector<16x256xbf16>,
    %c0_57 = arith.constant 0 : index
    %c129_58 = arith.constant 129 : index
    %57 = vector.load %arg6[%c0_57, %c129_58] : memref<16x512xbf16, #tpu.memory_space<vmem>>, vector<16x256xbf16>
    %58 = vector.broadcast %1 : vector<1x256xbf16> to vector<16x256xbf16>
    %59 = arith.mulf %57, %58 : vector<16x256xbf16>
    %c80_59 = arith.constant 80 : index
    %c256_60 = arith.constant 256 : index
    %60 = vector.load %arg7[%c80_59, %c256_60] : memref<144x512xbf16, #tpu.memory_space<vmem>>, vector<16x256xbf16>
    tpu.vector_store %arg7[%c80_59, %c256_60], %59 {strides = array<i32>} : memref<144x512xbf16, #tpu.memory_space<vmem>>, vector<16x256xbf16>,
    %c0_61 = arith.constant 0 : index
    %c143_62 = arith.constant 143 : index
    %61 = vector.load %arg6[%c0_61, %c143_62] : memref<16x512xbf16, #tpu.memory_space<vmem>>, vector<16x256xbf16>
    %62 = vector.broadcast %0 : vector<1x256xbf16> to vector<16x256xbf16>
    %63 = arith.mulf %61, %62 : vector<16x256xbf16>
    %c96_63 = arith.constant 96 : index
    %c256_64 = arith.constant 256 : index
    %64 = vector.load %arg7[%c96_63, %c256_64] : memref<144x512xbf16, #tpu.memory_space<vmem>>, vector<16x256xbf16>
    tpu.vector_store %arg7[%c96_63, %c256_64], %63 {strides = array<i32>} : memref<144x512xbf16, #tpu.memory_space<vmem>>, vector<16x256xbf16>,
    %c0_65 = arith.constant 0 : index
    %c144_66 = arith.constant 144 : index
    %65 = vector.load %arg6[%c0_65, %c144_66] : memref<16x512xbf16, #tpu.memory_space<vmem>>, vector<16x256xbf16>
    %c112_67 = arith.constant 112 : index
    %c256_68 = arith.constant 256 : index
    %66 = vector.load %arg7[%c112_67, %c256_68] : memref<144x512xbf16, #tpu.memory_space<vmem>>, vector<16x256xbf16>
    tpu.vector_store %arg7[%c112_67, %c256_68], %65 {strides = array<i32>} : memref<144x512xbf16, #tpu.memory_space<vmem>>, vector<16x256xbf16>,
    %c0_69 = arith.constant 0 : index
    %c145_70 = arith.constant 145 : index
    %67 = vector.load %arg6[%c0_69, %c145_70] : memref<16x512xbf16, #tpu.memory_space<vmem>>, vector<16x256xbf16>
    %68 = vector.broadcast %1 : vector<1x256xbf16> to vector<16x256xbf16>
    %69 = arith.mulf %67, %68 : vector<16x256xbf16>
    %c128_71 = arith.constant 128 : index
    %c256_72 = arith.constant 256 : index
    %70 = vector.load %arg7[%c128_71, %c256_72] : memref<144x512xbf16, #tpu.memory_space<vmem>>, vector<16x256xbf16>
    tpu.vector_store %arg7[%c128_71, %c256_72], %69 {strides = array<i32>} : memref<144x512xbf16, #tpu.memory_space<vmem>>, vector<16x256xbf16>,
    %c0_73 = arith.constant 0 : index
    %c0_74 = arith.constant 0 : index
    %c0_75 = arith.constant 0 : index
    %71 = vector.load %arg3[%c0_73, %c0_74, %c0_75] : memref<1x16x144xbf16, #tpu.memory_space<vmem>>, vector<1x16x144xbf16>
    %72 = vector.shape_cast %71 : vector<1x16x144xbf16> to vector<16x144xbf16>
    %c0_76 = arith.constant 0 : index
    %c0_77 = arith.constant 0 : index
    %73 = vector.load %arg7[%c0_76, %c0_77] : memref<144x512xbf16, #tpu.memory_space<vmem>>, vector<144x512xbf16>
    %cst_78 = arith.constant dense<0.000000e+00> : vector<16x512xf32>
    %74 = tpu.matmul %72, %73, %cst_78 {dimension_numbers = #tpu.dot_dimension_numbers<[1], [0], [0], [1], [0, 0, 1, 1], [], []>} : vector<16x144xbf16>, vector<144x512xbf16>, vector<16x512xf32> -> vector<16x512xf32>
    %cst_79 = arith.constant 0.000000e+00 : f32
    %75 = vector.broadcast %cst_79 : f32 to vector<16x512xf32>
    %76 = arith.maximumf %74, %75 : vector<16x512xf32>
    %77 = arith.truncf %76 : vector<16x512xf32> to vector<16x512xbf16>
    %cst_80 = arith.constant 0.000000e+00 : bf16
    %78 = vector.broadcast %cst_80 : bf16 to vector<16x128xbf16>
    %c0_81 = arith.constant 0 : index
    %c0_82 = arith.constant 0 : index
    %79 = vector.load %arg8[%c0_81, %c0_82] : memref<16x512xbf16, #tpu.memory_space<vmem>>, vector<16x128xbf16>
    tpu.vector_store %arg8[%c0_81, %c0_82], %78 {strides = array<i32>} : memref<16x512xbf16, #tpu.memory_space<vmem>>, vector<16x128xbf16>,
    %c0_83 = arith.constant 0 : index
    %c384_84 = arith.constant 384 : index
    %80 = vector.load %arg8[%c0_83, %c384_84] : memref<16x512xbf16, #tpu.memory_space<vmem>>, vector<16x128xbf16>
    tpu.vector_store %arg8[%c0_83, %c384_84], %78 {strides = array<i32>} : memref<16x512xbf16, #tpu.memory_space<vmem>>, vector<16x128xbf16>,
    %81 = vector.extract_strided_slice %77 {offsets = [0, 0], sizes = [16, 256], strides = [1, 1]} : vector<16x512xbf16> to vector<16x256xbf16>
    %c0_85 = arith.constant 0 : index
    %c128_86 = arith.constant 128 : index
    %82 = vector.load %arg8[%c0_85, %c128_86] : memref<16x512xbf16, #tpu.memory_space<vmem>>, vector<16x256xbf16>
    tpu.vector_store %arg8[%c0_85, %c128_86], %81 {strides = array<i32>} : memref<16x512xbf16, #tpu.memory_space<vmem>>, vector<16x256xbf16>,
    %c0_87 = arith.constant 0 : index
    %c111_88 = arith.constant 111 : index
    %83 = vector.load %arg8[%c0_87, %c111_88] : memref<16x512xbf16, #tpu.memory_space<vmem>>, vector<16x256xbf16>
    %84 = vector.broadcast %0 : vector<1x256xbf16> to vector<16x256xbf16>
    %85 = arith.mulf %83, %84 : vector<16x256xbf16>
    %c0_89 = arith.constant 0 : index
    %c0_90 = arith.constant 0 : index
    %86 = vector.load %arg9[%c0_89, %c0_90] : memref<144x512xbf16, #tpu.memory_space<vmem>>, vector<16x256xbf16>
    tpu.vector_store %arg9[%c0_89, %c0_90], %85 {strides = array<i32>} : memref<144x512xbf16, #tpu.memory_space<vmem>>, vector<16x256xbf16>,
    %c0_91 = arith.constant 0 : index
    %c112_92 = arith.constant 112 : index
    %87 = vector.load %arg8[%c0_91, %c112_92] : memref<16x512xbf16, #tpu.memory_space<vmem>>, vector<16x256xbf16>
    %c16_93 = arith.constant 16 : index
    %c0_94 = arith.constant 0 : index
    %88 = vector.load %arg9[%c16_93, %c0_94] : memref<144x512xbf16, #tpu.memory_space<vmem>>, vector<16x256xbf16>
    tpu.vector_store %arg9[%c16_93, %c0_94], %87 {strides = array<i32>} : memref<144x512xbf16, #tpu.memory_space<vmem>>, vector<16x256xbf16>,
    %c0_95 = arith.constant 0 : index
    %c113_96 = arith.constant 113 : index
    %89 = vector.load %arg8[%c0_95, %c113_96] : memref<16x512xbf16, #tpu.memory_space<vmem>>, vector<16x256xbf16>
    %90 = vector.broadcast %1 : vector<1x256xbf16> to vector<16x256xbf16>
    %91 = arith.mulf %89, %90 : vector<16x256xbf16>
    %c32_97 = arith.constant 32 : index
    %c0_98 = arith.constant 0 : index
    %92 = vector.load %arg9[%c32_97, %c0_98] : memref<144x512xbf16, #tpu.memory_space<vmem>>, vector<16x256xbf16>
    tpu.vector_store %arg9[%c32_97, %c0_98], %91 {strides = array<i32>} : memref<144x512xbf16, #tpu.memory_space<vmem>>, vector<16x256xbf16>,
    %c0_99 = arith.constant 0 : index
    %c127_100 = arith.constant 127 : index
    %93 = vector.load %arg8[%c0_99, %c127_100] : memref<16x512xbf16, #tpu.memory_space<vmem>>, vector<16x256xbf16>
    %94 = vector.broadcast %0 : vector<1x256xbf16> to vector<16x256xbf16>
    %95 = arith.mulf %93, %94 : vector<16x256xbf16>
    %c48_101 = arith.constant 48 : index
    %c0_102 = arith.constant 0 : index
    %96 = vector.load %arg9[%c48_101, %c0_102] : memref<144x512xbf16, #tpu.memory_space<vmem>>, vector<16x256xbf16>
    tpu.vector_store %arg9[%c48_101, %c0_102], %95 {strides = array<i32>} : memref<144x512xbf16, #tpu.memory_space<vmem>>, vector<16x256xbf16>,
    %c0_103 = arith.constant 0 : index
    %c128_104 = arith.constant 128 : index
    %97 = vector.load %arg8[%c0_103, %c128_104] : memref<16x512xbf16, #tpu.memory_space<vmem>>, vector<16x256xbf16>
    %c64_105 = arith.constant 64 : index
    %c0_106 = arith.constant 0 : index
    %98 = vector.load %arg9[%c64_105, %c0_106] : memref<144x512xbf16, #tpu.memory_space<vmem>>, vector<16x256xbf16>
    tpu.vector_store %arg9[%c64_105, %c0_106], %97 {strides = array<i32>} : memref<144x512xbf16, #tpu.memory_space<vmem>>, vector<16x256xbf16>,
    %c0_107 = arith.constant 0 : index
    %c129_108 = arith.constant 129 : index
    %99 = vector.load %arg8[%c0_107, %c129_108] : memref<16x512xbf16, #tpu.memory_space<vmem>>, vector<16x256xbf16>
    %100 = vector.broadcast %1 : vector<1x256xbf16> to vector<16x256xbf16>
    %101 = arith.mulf %99, %100 : vector<16x256xbf16>
    %c80_109 = arith.constant 80 : index
    %c0_110 = arith.constant 0 : index
    %102 = vector.load %arg9[%c80_109, %c0_110] : memref<144x512xbf16, #tpu.memory_space<vmem>>, vector<16x256xbf16>
    tpu.vector_store %arg9[%c80_109, %c0_110], %101 {strides = array<i32>} : memref<144x512xbf16, #tpu.memory_space<vmem>>, vector<16x256xbf16>,
    %c0_111 = arith.constant 0 : index
    %c143_112 = arith.constant 143 : index
    %103 = vector.load %arg8[%c0_111, %c143_112] : memref<16x512xbf16, #tpu.memory_space<vmem>>, vector<16x256xbf16>
    %104 = vector.broadcast %0 : vector<1x256xbf16> to vector<16x256xbf16>
    %105 = arith.mulf %103, %104 : vector<16x256xbf16>
    %c96_113 = arith.constant 96 : index
    %c0_114 = arith.constant 0 : index
    %106 = vector.load %arg9[%c96_113, %c0_114] : memref<144x512xbf16, #tpu.memory_space<vmem>>, vector<16x256xbf16>
    tpu.vector_store %arg9[%c96_113, %c0_114], %105 {strides = array<i32>} : memref<144x512xbf16, #tpu.memory_space<vmem>>, vector<16x256xbf16>,
    %c0_115 = arith.constant 0 : index
    %c144_116 = arith.constant 144 : index
    %107 = vector.load %arg8[%c0_115, %c144_116] : memref<16x512xbf16, #tpu.memory_space<vmem>>, vector<16x256xbf16>
    %c112_117 = arith.constant 112 : index
    %c0_118 = arith.constant 0 : index
    %108 = vector.load %arg9[%c112_117, %c0_118] : memref<144x512xbf16, #tpu.memory_space<vmem>>, vector<16x256xbf16>
    tpu.vector_store %arg9[%c112_117, %c0_118], %107 {strides = array<i32>} : memref<144x512xbf16, #tpu.memory_space<vmem>>, vector<16x256xbf16>,
    %c0_119 = arith.constant 0 : index
    %c145_120 = arith.constant 145 : index
    %109 = vector.load %arg8[%c0_119, %c145_120] : memref<16x512xbf16, #tpu.memory_space<vmem>>, vector<16x256xbf16>
    %110 = vector.broadcast %1 : vector<1x256xbf16> to vector<16x256xbf16>
    %111 = arith.mulf %109, %110 : vector<16x256xbf16>
    %c128_121 = arith.constant 128 : index
    %c0_122 = arith.constant 0 : index
    %112 = vector.load %arg9[%c128_121, %c0_122] : memref<144x512xbf16, #tpu.memory_space<vmem>>, vector<16x256xbf16>
    tpu.vector_store %arg9[%c128_121, %c0_122], %111 {strides = array<i32>} : memref<144x512xbf16, #tpu.memory_space<vmem>>, vector<16x256xbf16>,
    %113 = vector.extract_strided_slice %77 {offsets = [0, 256], sizes = [16, 256], strides = [1, 1]} : vector<16x512xbf16> to vector<16x256xbf16>
    %c0_123 = arith.constant 0 : index
    %c128_124 = arith.constant 128 : index
    %114 = vector.load %arg8[%c0_123, %c128_124] : memref<16x512xbf16, #tpu.memory_space<vmem>>, vector<16x256xbf16>
    tpu.vector_store %arg8[%c0_123, %c128_124], %113 {strides = array<i32>} : memref<16x512xbf16, #tpu.memory_space<vmem>>, vector<16x256xbf16>,
    %c0_125 = arith.constant 0 : index
    %c111_126 = arith.constant 111 : index
    %115 = vector.load %arg8[%c0_125, %c111_126] : memref<16x512xbf16, #tpu.memory_space<vmem>>, vector<16x256xbf16>
    %116 = vector.broadcast %0 : vector<1x256xbf16> to vector<16x256xbf16>
    %117 = arith.mulf %115, %116 : vector<16x256xbf16>
    %c0_127 = arith.constant 0 : index
    %c256_128 = arith.constant 256 : index
    %118 = vector.load %arg9[%c0_127, %c256_128] : memref<144x512xbf16, #tpu.memory_space<vmem>>, vector<16x256xbf16>
    tpu.vector_store %arg9[%c0_127, %c256_128], %117 {strides = array<i32>} : memref<144x512xbf16, #tpu.memory_space<vmem>>, vector<16x256xbf16>,
    %c0_129 = arith.constant 0 : index
    %c112_130 = arith.constant 112 : index
    %119 = vector.load %arg8[%c0_129, %c112_130] : memref<16x512xbf16, #tpu.memory_space<vmem>>, vector<16x256xbf16>
    %c16_131 = arith.constant 16 : index
    %c256_132 = arith.constant 256 : index
    %120 = vector.load %arg9[%c16_131, %c256_132] : memref<144x512xbf16, #tpu.memory_space<vmem>>, vector<16x256xbf16>
    tpu.vector_store %arg9[%c16_131, %c256_132], %119 {strides = array<i32>} : memref<144x512xbf16, #tpu.memory_space<vmem>>, vector<16x256xbf16>,
    %c0_133 = arith.constant 0 : index
    %c113_134 = arith.constant 113 : index
    %121 = vector.load %arg8[%c0_133, %c113_134] : memref<16x512xbf16, #tpu.memory_space<vmem>>, vector<16x256xbf16>
    %122 = vector.broadcast %1 : vector<1x256xbf16> to vector<16x256xbf16>
    %123 = arith.mulf %121, %122 : vector<16x256xbf16>
    %c32_135 = arith.constant 32 : index
    %c256_136 = arith.constant 256 : index
    %124 = vector.load %arg9[%c32_135, %c256_136] : memref<144x512xbf16, #tpu.memory_space<vmem>>, vector<16x256xbf16>
    tpu.vector_store %arg9[%c32_135, %c256_136], %123 {strides = array<i32>} : memref<144x512xbf16, #tpu.memory_space<vmem>>, vector<16x256xbf16>,
    %c0_137 = arith.constant 0 : index
    %c127_138 = arith.constant 127 : index
    %125 = vector.load %arg8[%c0_137, %c127_138] : memref<16x512xbf16, #tpu.memory_space<vmem>>, vector<16x256xbf16>
    %126 = vector.broadcast %0 : vector<1x256xbf16> to vector<16x256xbf16>
    %127 = arith.mulf %125, %126 : vector<16x256xbf16>
    %c48_139 = arith.constant 48 : index
    %c256_140 = arith.constant 256 : index
    %128 = vector.load %arg9[%c48_139, %c256_140] : memref<144x512xbf16, #tpu.memory_space<vmem>>, vector<16x256xbf16>
    tpu.vector_store %arg9[%c48_139, %c256_140], %127 {strides = array<i32>} : memref<144x512xbf16, #tpu.memory_space<vmem>>, vector<16x256xbf16>,
    %c0_141 = arith.constant 0 : index
    %c128_142 = arith.constant 128 : index
    %129 = vector.load %arg8[%c0_141, %c128_142] : memref<16x512xbf16, #tpu.memory_space<vmem>>, vector<16x256xbf16>
    %c64_143 = arith.constant 64 : index
    %c256_144 = arith.constant 256 : index
    %130 = vector.load %arg9[%c64_143, %c256_144] : memref<144x512xbf16, #tpu.memory_space<vmem>>, vector<16x256xbf16>
    tpu.vector_store %arg9[%c64_143, %c256_144], %129 {strides = array<i32>} : memref<144x512xbf16, #tpu.memory_space<vmem>>, vector<16x256xbf16>,
    %c0_145 = arith.constant 0 : index
    %c129_146 = arith.constant 129 : index
    %131 = vector.load %arg8[%c0_145, %c129_146] : memref<16x512xbf16, #tpu.memory_space<vmem>>, vector<16x256xbf16>
    %132 = vector.broadcast %1 : vector<1x256xbf16> to vector<16x256xbf16>
    %133 = arith.mulf %131, %132 : vector<16x256xbf16>
    %c80_147 = arith.constant 80 : index
    %c256_148 = arith.constant 256 : index
    %134 = vector.load %arg9[%c80_147, %c256_148] : memref<144x512xbf16, #tpu.memory_space<vmem>>, vector<16x256xbf16>
    tpu.vector_store %arg9[%c80_147, %c256_148], %133 {strides = array<i32>} : memref<144x512xbf16, #tpu.memory_space<vmem>>, vector<16x256xbf16>,
    %c0_149 = arith.constant 0 : index
    %c143_150 = arith.constant 143 : index
    %135 = vector.load %arg8[%c0_149, %c143_150] : memref<16x512xbf16, #tpu.memory_space<vmem>>, vector<16x256xbf16>
    %136 = vector.broadcast %0 : vector<1x256xbf16> to vector<16x256xbf16>
    %137 = arith.mulf %135, %136 : vector<16x256xbf16>
    %c96_151 = arith.constant 96 : index
    %c256_152 = arith.constant 256 : index
    %138 = vector.load %arg9[%c96_151, %c256_152] : memref<144x512xbf16, #tpu.memory_space<vmem>>, vector<16x256xbf16>
    tpu.vector_store %arg9[%c96_151, %c256_152], %137 {strides = array<i32>} : memref<144x512xbf16, #tpu.memory_space<vmem>>, vector<16x256xbf16>,
    %c0_153 = arith.constant 0 : index
    %c144_154 = arith.constant 144 : index
    %139 = vector.load %arg8[%c0_153, %c144_154] : memref<16x512xbf16, #tpu.memory_space<vmem>>, vector<16x256xbf16>
    %c112_155 = arith.constant 112 : index
    %c256_156 = arith.constant 256 : index
    %140 = vector.load %arg9[%c112_155, %c256_156] : memref<144x512xbf16, #tpu.memory_space<vmem>>, vector<16x256xbf16>
    tpu.vector_store %arg9[%c112_155, %c256_156], %139 {strides = array<i32>} : memref<144x512xbf16, #tpu.memory_space<vmem>>, vector<16x256xbf16>,
    %c0_157 = arith.constant 0 : index
    %c145_158 = arith.constant 145 : index
    %141 = vector.load %arg8[%c0_157, %c145_158] : memref<16x512xbf16, #tpu.memory_space<vmem>>, vector<16x256xbf16>
    %142 = vector.broadcast %1 : vector<1x256xbf16> to vector<16x256xbf16>
    %143 = arith.mulf %141, %142 : vector<16x256xbf16>
    %c128_159 = arith.constant 128 : index
    %c256_160 = arith.constant 256 : index
    %144 = vector.load %arg9[%c128_159, %c256_160] : memref<144x512xbf16, #tpu.memory_space<vmem>>, vector<16x256xbf16>
    tpu.vector_store %arg9[%c128_159, %c256_160], %143 {strides = array<i32>} : memref<144x512xbf16, #tpu.memory_space<vmem>>, vector<16x256xbf16>,
    %c0_161 = arith.constant 0 : index
    %c0_162 = arith.constant 0 : index
    %c0_163 = arith.constant 0 : index
    %145 = vector.load %arg4[%c0_161, %c0_162, %c0_163] : memref<1x8x144xbf16, #tpu.memory_space<vmem>>, vector<1x8x144xbf16>
    %146 = vector.shape_cast %145 : vector<1x8x144xbf16> to vector<8x144xbf16>
    %c0_164 = arith.constant 0 : index
    %c0_165 = arith.constant 0 : index
    %147 = vector.load %arg9[%c0_164, %c0_165] : memref<144x512xbf16, #tpu.memory_space<vmem>>, vector<144x512xbf16>
    %cst_166 = arith.constant dense<0.000000e+00> : vector<8x512xf32>
    %148 = tpu.matmul %146, %147, %cst_166 {dimension_numbers = #tpu.dot_dimension_numbers<[1], [0], [0], [1], [0, 0, 1, 1], [], []>} : vector<8x144xbf16>, vector<144x512xbf16>, vector<8x512xf32> -> vector<8x512xf32>
    %149 = vector.extract_strided_slice %148 {offsets = [0, 0], sizes = [8, 256], strides = [1, 1]} : vector<8x512xf32> to vector<8x256xf32>
    %c0_167 = arith.constant 0 : index
    %c0_168 = arith.constant 0 : index
    %c0_169 = arith.constant 0 : index
    %c0_170 = arith.constant 0 : index
    %150 = vector.load %arg5[%c0_167, %c0_168, %c0_169, %c0_170] : memref<1x2x8x256xf32, #tpu.memory_space<vmem>>, vector<1x1x8x256xf32>
    %151 = vector.shape_cast %150 : vector<1x1x8x256xf32> to vector<8x256xf32>
    %152 = vector.shape_cast %149 : vector<8x256xf32> to vector<1x1x8x256xf32>
    tpu.vector_store %arg5[%c0_167, %c0_168, %c0_169, %c0_170], %152 {strides = array<i32>} : memref<1x2x8x256xf32, #tpu.memory_space<vmem>>, vector<1x1x8x256xf32>,
    %153 = vector.extract_strided_slice %148 {offsets = [0, 256], sizes = [8, 256], strides = [1, 1]} : vector<8x512xf32> to vector<8x256xf32>
    %c0_171 = arith.constant 0 : index
    %c1_172 = arith.constant 1 : index
    %c0_173 = arith.constant 0 : index
    %c0_174 = arith.constant 0 : index
    %154 = vector.load %arg5[%c0_171, %c1_172, %c0_173, %c0_174] : memref<1x2x8x256xf32, #tpu.memory_space<vmem>>, vector<1x1x8x256xf32>
    %155 = vector.shape_cast %154 : vector<1x1x8x256xf32> to vector<8x256xf32>
    %156 = vector.shape_cast %153 : vector<8x256xf32> to vector<1x1x8x256xf32>
    tpu.vector_store %arg5[%c0_171, %c1_172, %c0_173, %c0_174], %156 {strides = array<i32>} : memref<1x2x8x256xf32, #tpu.memory_space<vmem>>, vector<1x1x8x256xf32>,
    return
  }
  func.func @transform_0(%arg0: i32) -> (i32, i32) {
    %c0_i32 = arith.constant 0 : i32
    %c0_i32_0 = arith.constant 0 : i32
    %c0_i32_1 = arith.constant 0 : i32
    return %c0_i32, %c0_i32_0 : i32, i32
  }
  func.func @transform_1(%arg0: i32) -> (i32, i32, i32, i32) {
    %c0_i32 = arith.constant 0 : i32
    %c0_i32_0 = arith.constant 0 : i32
    %c0_i32_1 = arith.constant 0 : i32
    %c0_i32_2 = arith.constant 0 : i32
    return %arg0, %c0_i32, %c0_i32_0, %c0_i32_1 : i32, i32, i32, i32
  }
  func.func @transform_2(%arg0: i32) -> (i32, i32, i32) {
    %c0_i32 = arith.constant 0 : i32
    %c0_i32_0 = arith.constant 0 : i32
    %c0_i32_1 = arith.constant 0 : i32
    return %arg0, %c0_i32, %c0_i32_0 : i32, i32, i32
  }
  func.func @transform_3(%arg0: i32) -> (i32, i32, i32) {
    %c0_i32 = arith.constant 0 : i32
    %c0_i32_0 = arith.constant 0 : i32
    %c0_i32_1 = arith.constant 0 : i32
    return %arg0, %c0_i32, %c0_i32_0 : i32, i32, i32
  }
  func.func @transform_4(%arg0: i32) -> (i32, i32, i32, i32) {
    %c0_i32 = arith.constant 0 : i32
    %c0_i32_0 = arith.constant 0 : i32
    %c0_i32_1 = arith.constant 0 : i32
    %c0_i32_2 = arith.constant 0 : i32
    return %arg0, %c0_i32, %c0_i32_0, %c0_i32_1 : i32, i32, i32, i32
  }
}

module attributes {stable_mosaic.version = 11 : i64} {
  func.func @_fused_projector_kernel(%arg0: i32, %arg1: memref<2x256xbf16, #tpu.memory_space<vmem>>, %arg2: memref<1x2x16x256xbf16, #tpu.memory_space<vmem>>, %arg3: memref<1x16x144xbf16, #tpu.memory_space<vmem>>, %arg4: memref<1x4x144xbf16, #tpu.memory_space<vmem>>, %arg5: memref<1x2x4x256xf32, #tpu.memory_space<vmem>>, %arg6: memref<16x512xbf16, #tpu.memory_space<vmem>>, %arg7: memref<144x512xbf16, #tpu.memory_space<vmem>>, %arg8: memref<16x512xbf16, #tpu.memory_space<vmem>>, %arg9: memref<144x512xbf16, #tpu.memory_space<vmem>>) attributes {dimension_semantics = [#tpu.dimension_semantics<parallel>], iteration_bounds = array<i64: 2>, scalar_prefetch = 0 : i64, scratch_operands = 4 : i64, tpu.core_type = #tpu.core_type<tc>, window_params = [{pipeline_mode = #tpu.pipeline_mode<synchronous>, transform_indices = @transform_0, window_bounds = array<i64: 2, 256>}, {transform_indices = @transform_1, window_bounds = array<i64: 1, 2, 16, 256>}, {transform_indices = @transform_2, window_bounds = array<i64: 1, 16, 144>}, {transform_indices = @transform_3, window_bounds = array<i64: 1, 4, 144>}, {transform_indices = @transform_4, window_bounds = array<i64: 1, 2, 4, 256>}]} {
    %c0 = arith.constant 0 : index
    %c0_0 = arith.constant 0 : index
    %0 = vector.load %arg1[%c0, %c0_0] : memref<2x256xbf16, #tpu.memory_space<vmem>>, vector<1x256xbf16>
    %c1 = arith.constant 1 : index
    %c0_1 = arith.constant 0 : index
    %1 = vector.load %arg1[%c1, %c0_1] : memref<2x256xbf16, #tpu.memory_space<vmem>>, vector<1x256xbf16>
    %cst = arith.constant 0.000000e+00 : bf16
    %2 = vector.broadcast %cst : bf16 to vector<16x128xbf16>
    %c0_2 = arith.constant 0 : index
    %c0_3 = arith.constant 0 : index
    %3 = vector.load %arg6[%c0_2, %c0_3] : memref<16x512xbf16, #tpu.memory_space<vmem>>, vector<16x128xbf16>
    tpu.vector_store %arg6[%c0_2, %c0_3], %2 {strides = array<i32>} : memref<16x512xbf16, #tpu.memory_space<vmem>>, vector<16x128xbf16>,
    %c0_4 = arith.constant 0 : index
    %c384 = arith.constant 384 : index
    %4 = vector.load %arg6[%c0_4, %c384] : memref<16x512xbf16, #tpu.memory_space<vmem>>, vector<16x128xbf16>
    tpu.vector_store %arg6[%c0_4, %c384], %2 {strides = array<i32>} : memref<16x512xbf16, #tpu.memory_space<vmem>>, vector<16x128xbf16>,
    %c0_5 = arith.constant 0 : index
    %c0_6 = arith.constant 0 : index
    %c0_7 = arith.constant 0 : index
    %c0_8 = arith.constant 0 : index
    %5 = vector.load %arg2[%c0_5, %c0_6, %c0_7, %c0_8] : memref<1x2x16x256xbf16, #tpu.memory_space<vmem>>, vector<1x1x16x256xbf16>
    %6 = vector.shape_cast %5 : vector<1x1x16x256xbf16> to vector<16x256xbf16>
    %c0_9 = arith.constant 0 : index
    %c128 = arith.constant 128 : index
    %7 = vector.load %arg6[%c0_9, %c128] : memref<16x512xbf16, #tpu.memory_space<vmem>>, vector<16x256xbf16>
    tpu.vector_store %arg6[%c0_9, %c128], %6 {strides = array<i32>} : memref<16x512xbf16, #tpu.memory_space<vmem>>, vector<16x256xbf16>,
    %c0_10 = arith.constant 0 : index
    %c111 = arith.constant 111 : index
    %8 = vector.load %arg6[%c0_10, %c111] : memref<16x512xbf16, #tpu.memory_space<vmem>>, vector<16x256xbf16>
    %9 = vector.broadcast %0 : vector<1x256xbf16> to vector<16x256xbf16>
    %10 = arith.mulf %8, %9 : vector<16x256xbf16>
    %c0_11 = arith.constant 0 : index
    %c0_12 = arith.constant 0 : index
    %11 = vector.load %arg7[%c0_11, %c0_12] : memref<144x512xbf16, #tpu.memory_space<vmem>>, vector<16x256xbf16>
    tpu.vector_store %arg7[%c0_11, %c0_12], %10 {strides = array<i32>} : memref<144x512xbf16, #tpu.memory_space<vmem>>, vector<16x256xbf16>,
    %c0_13 = arith.constant 0 : index
    %c112 = arith.constant 112 : index
    %12 = vector.load %arg6[%c0_13, %c112] : memref<16x512xbf16, #tpu.memory_space<vmem>>, vector<16x256xbf16>
    %c16 = arith.constant 16 : index
    %c0_14 = arith.constant 0 : index
    %13 = vector.load %arg7[%c16, %c0_14] : memref<144x512xbf16, #tpu.memory_space<vmem>>, vector<16x256xbf16>
    tpu.vector_store %arg7[%c16, %c0_14], %12 {strides = array<i32>} : memref<144x512xbf16, #tpu.memory_space<vmem>>, vector<16x256xbf16>,
    %c0_15 = arith.constant 0 : index
    %c113 = arith.constant 113 : index
    %14 = vector.load %arg6[%c0_15, %c113] : memref<16x512xbf16, #tpu.memory_space<vmem>>, vector<16x256xbf16>
    %15 = vector.broadcast %1 : vector<1x256xbf16> to vector<16x256xbf16>
    %16 = arith.mulf %14, %15 : vector<16x256xbf16>
    %c32 = arith.constant 32 : index
    %c0_16 = arith.constant 0 : index
    %17 = vector.load %arg7[%c32, %c0_16] : memref<144x512xbf16, #tpu.memory_space<vmem>>, vector<16x256xbf16>
    tpu.vector_store %arg7[%c32, %c0_16], %16 {strides = array<i32>} : memref<144x512xbf16, #tpu.memory_space<vmem>>, vector<16x256xbf16>,
    %c0_17 = arith.constant 0 : index
    %c127 = arith.constant 127 : index
    %18 = vector.load %arg6[%c0_17, %c127] : memref<16x512xbf16, #tpu.memory_space<vmem>>, vector<16x256xbf16>
    %19 = vector.broadcast %0 : vector<1x256xbf16> to vector<16x256xbf16>
    %20 = arith.mulf %18, %19 : vector<16x256xbf16>
    %c48 = arith.constant 48 : index
    %c0_18 = arith.constant 0 : index
    %21 = vector.load %arg7[%c48, %c0_18] : memref<144x512xbf16, #tpu.memory_space<vmem>>, vector<16x256xbf16>
    tpu.vector_store %arg7[%c48, %c0_18], %20 {strides = array<i32>} : memref<144x512xbf16, #tpu.memory_space<vmem>>, vector<16x256xbf16>,
    %c0_19 = arith.constant 0 : index
    %c128_20 = arith.constant 128 : index
    %22 = vector.load %arg6[%c0_19, %c128_20] : memref<16x512xbf16, #tpu.memory_space<vmem>>, vector<16x256xbf16>
    %c64 = arith.constant 64 : index
    %c0_21 = arith.constant 0 : index
    %23 = vector.load %arg7[%c64, %c0_21] : memref<144x512xbf16, #tpu.memory_space<vmem>>, vector<16x256xbf16>
    tpu.vector_store %arg7[%c64, %c0_21], %22 {strides = array<i32>} : memref<144x512xbf16, #tpu.memory_space<vmem>>, vector<16x256xbf16>,
    %c0_22 = arith.constant 0 : index
    %c129 = arith.constant 129 : index
    %24 = vector.load %arg6[%c0_22, %c129] : memref<16x512xbf16, #tpu.memory_space<vmem>>, vector<16x256xbf16>
    %25 = vector.broadcast %1 : vector<1x256xbf16> to vector<16x256xbf16>
    %26 = arith.mulf %24, %25 : vector<16x256xbf16>
    %c80 = arith.constant 80 : index
    %c0_23 = arith.constant 0 : index
    %27 = vector.load %arg7[%c80, %c0_23] : memref<144x512xbf16, #tpu.memory_space<vmem>>, vector<16x256xbf16>
    tpu.vector_store %arg7[%c80, %c0_23], %26 {strides = array<i32>} : memref<144x512xbf16, #tpu.memory_space<vmem>>, vector<16x256xbf16>,
    %c0_24 = arith.constant 0 : index
    %c143 = arith.constant 143 : index
    %28 = vector.load %arg6[%c0_24, %c143] : memref<16x512xbf16, #tpu.memory_space<vmem>>, vector<16x256xbf16>
    %29 = vector.broadcast %0 : vector<1x256xbf16> to vector<16x256xbf16>
    %30 = arith.mulf %28, %29 : vector<16x256xbf16>
    %c96 = arith.constant 96 : index
    %c0_25 = arith.constant 0 : index
    %31 = vector.load %arg7[%c96, %c0_25] : memref<144x512xbf16, #tpu.memory_space<vmem>>, vector<16x256xbf16>
    tpu.vector_store %arg7[%c96, %c0_25], %30 {strides = array<i32>} : memref<144x512xbf16, #tpu.memory_space<vmem>>, vector<16x256xbf16>,
    %c0_26 = arith.constant 0 : index
    %c144 = arith.constant 144 : index
    %32 = vector.load %arg6[%c0_26, %c144] : memref<16x512xbf16, #tpu.memory_space<vmem>>, vector<16x256xbf16>
    %c112_27 = arith.constant 112 : index
    %c0_28 = arith.constant 0 : index
    %33 = vector.load %arg7[%c112_27, %c0_28] : memref<144x512xbf16, #tpu.memory_space<vmem>>, vector<16x256xbf16>
    tpu.vector_store %arg7[%c112_27, %c0_28], %32 {strides = array<i32>} : memref<144x512xbf16, #tpu.memory_space<vmem>>, vector<16x256xbf16>,
    %c0_29 = arith.constant 0 : index
    %c145 = arith.constant 145 : index
    %34 = vector.load %arg6[%c0_29, %c145] : memref<16x512xbf16, #tpu.memory_space<vmem>>, vector<16x256xbf16>
    %35 = vector.broadcast %1 : vector<1x256xbf16> to vector<16x256xbf16>
    %36 = arith.mulf %34, %35 : vector<16x256xbf16>
    %c128_30 = arith.constant 128 : index
    %c0_31 = arith.constant 0 : index
    %37 = vector.load %arg7[%c128_30, %c0_31] : memref<144x512xbf16, #tpu.memory_space<vmem>>, vector<16x256xbf16>
    tpu.vector_store %arg7[%c128_30, %c0_31], %36 {strides = array<i32>} : memref<144x512xbf16, #tpu.memory_space<vmem>>, vector<16x256xbf16>,
    %c0_32 = arith.constant 0 : index
    %c1_33 = arith.constant 1 : index
    %c0_34 = arith.constant 0 : index
    %c0_35 = arith.constant 0 : index
    %38 = vector.load %arg2[%c0_32, %c1_33, %c0_34, %c0_35] : memref<1x2x16x256xbf16, #tpu.memory_space<vmem>>, vector<1x1x16x256xbf16>
    %39 = vector.shape_cast %38 : vector<1x1x16x256xbf16> to vector<16x256xbf16>
    %c0_36 = arith.constant 0 : index
    %c128_37 = arith.constant 128 : index
    %40 = vector.load %arg6[%c0_36, %c128_37] : memref<16x512xbf16, #tpu.memory_space<vmem>>, vector<16x256xbf16>
    tpu.vector_store %arg6[%c0_36, %c128_37], %39 {strides = array<i32>} : memref<16x512xbf16, #tpu.memory_space<vmem>>, vector<16x256xbf16>,
    %c0_38 = arith.constant 0 : index
    %c111_39 = arith.constant 111 : index
    %41 = vector.load %arg6[%c0_38, %c111_39] : memref<16x512xbf16, #tpu.memory_space<vmem>>, vector<16x256xbf16>
    %42 = vector.broadcast %0 : vector<1x256xbf16> to vector<16x256xbf16>
    %43 = arith.mulf %41, %42 : vector<16x256xbf16>
    %c0_40 = arith.constant 0 : index
    %c256 = arith.constant 256 : index
    %44 = vector.load %arg7[%c0_40, %c256] : memref<144x512xbf16, #tpu.memory_space<vmem>>, vector<16x256xbf16>
    tpu.vector_store %arg7[%c0_40, %c256], %43 {strides = array<i32>} : memref<144x512xbf16, #tpu.memory_space<vmem>>, vector<16x256xbf16>,
    %c0_41 = arith.constant 0 : index
    %c112_42 = arith.constant 112 : index
    %45 = vector.load %arg6[%c0_41, %c112_42] : memref<16x512xbf16, #tpu.memory_space<vmem>>, vector<16x256xbf16>
    %c16_43 = arith.constant 16 : index
    %c256_44 = arith.constant 256 : index
    %46 = vector.load %arg7[%c16_43, %c256_44] : memref<144x512xbf16, #tpu.memory_space<vmem>>, vector<16x256xbf16>
    tpu.vector_store %arg7[%c16_43, %c256_44], %45 {strides = array<i32>} : memref<144x512xbf16, #tpu.memory_space<vmem>>, vector<16x256xbf16>,
    %c0_45 = arith.constant 0 : index
    %c113_46 = arith.constant 113 : index
    %47 = vector.load %arg6[%c0_45, %c113_46] : memref<16x512xbf16, #tpu.memory_space<vmem>>, vector<16x256xbf16>
    %48 = vector.broadcast %1 : vector<1x256xbf16> to vector<16x256xbf16>
    %49 = arith.mulf %47, %48 : vector<16x256xbf16>
    %c32_47 = arith.constant 32 : index
    %c256_48 = arith.constant 256 : index
    %50 = vector.load %arg7[%c32_47, %c256_48] : memref<144x512xbf16, #tpu.memory_space<vmem>>, vector<16x256xbf16>
    tpu.vector_store %arg7[%c32_47, %c256_48], %49 {strides = array<i32>} : memref<144x512xbf16, #tpu.memory_space<vmem>>, vector<16x256xbf16>,
    %c0_49 = arith.constant 0 : index
    %c127_50 = arith.constant 127 : index
    %51 = vector.load %arg6[%c0_49, %c127_50] : memref<16x512xbf16, #tpu.memory_space<vmem>>, vector<16x256xbf16>
    %52 = vector.broadcast %0 : vector<1x256xbf16> to vector<16x256xbf16>
    %53 = arith.mulf %51, %52 : vector<16x256xbf16>
    %c48_51 = arith.constant 48 : index
    %c256_52 = arith.constant 256 : index
    %54 = vector.load %arg7[%c48_51, %c256_52] : memref<144x512xbf16, #tpu.memory_space<vmem>>, vector<16x256xbf16>
    tpu.vector_store %arg7[%c48_51, %c256_52], %53 {strides = array<i32>} : memref<144x512xbf16, #tpu.memory_space<vmem>>, vector<16x256xbf16>,
    %c0_53 = arith.constant 0 : index
    %c128_54 = arith.constant 128 : index
    %55 = vector.load %arg6[%c0_53, %c128_54] : memref<16x512xbf16, #tpu.memory_space<vmem>>, vector<16x256xbf16>
    %c64_55 = arith.constant 64 : index
    %c256_56 = arith.constant 256 : index
    %56 = vector.load %arg7[%c64_55, %c256_56] : memref<144x512xbf16, #tpu.memory_space<vmem>>, vector<16x256xbf16>
    tpu.vector_store %arg7[%c64_55, %c256_56], %55 {strides = array<i32>} : memref<144x512xbf16, #tpu.memory_space<vmem>>, vector<16x256xbf16>,
    %c0_57 = arith.constant 0 : index
    %c129_58 = arith.constant 129 : index
    %57 = vector.load %arg6[%c0_57, %c129_58] : memref<16x512xbf16, #tpu.memory_space<vmem>>, vector<16x256xbf16>
    %58 = vector.broadcast %1 : vector<1x256xbf16> to vector<16x256xbf16>
    %59 = arith.mulf %57, %58 : vector<16x256xbf16>
    %c80_59 = arith.constant 80 : index
    %c256_60 = arith.constant 256 : index
    %60 = vector.load %arg7[%c80_59, %c256_60] : memref<144x512xbf16, #tpu.memory_space<vmem>>, vector<16x256xbf16>
    tpu.vector_store %arg7[%c80_59, %c256_60], %59 {strides = array<i32>} : memref<144x512xbf16, #tpu.memory_space<vmem>>, vector<16x256xbf16>,
    %c0_61 = arith.constant 0 : index
    %c143_62 = arith.constant 143 : index
    %61 = vector.load %arg6[%c0_61, %c143_62] : memref<16x512xbf16, #tpu.memory_space<vmem>>, vector<16x256xbf16>
    %62 = vector.broadcast %0 : vector<1x256xbf16> to vector<16x256xbf16>
    %63 = arith.mulf %61, %62 : vector<16x256xbf16>
    %c96_63 = arith.constant 96 : index
    %c256_64 = arith.constant 256 : index
    %64 = vector.load %arg7[%c96_63, %c256_64] : memref<144x512xbf16, #tpu.memory_space<vmem>>, vector<16x256xbf16>
    tpu.vector_store %arg7[%c96_63, %c256_64], %63 {strides = array<i32>} : memref<144x512xbf16, #tpu.memory_space<vmem>>, vector<16x256xbf16>,
    %c0_65 = arith.constant 0 : index
    %c144_66 = arith.constant 144 : index
    %65 = vector.load %arg6[%c0_65, %c144_66] : memref<16x512xbf16, #tpu.memory_space<vmem>>, vector<16x256xbf16>
    %c112_67 = arith.constant 112 : index
    %c256_68 = arith.constant 256 : index
    %66 = vector.load %arg7[%c112_67, %c256_68] : memref<144x512xbf16, #tpu.memory_space<vmem>>, vector<16x256xbf16>
    tpu.vector_store %arg7[%c112_67, %c256_68], %65 {strides = array<i32>} : memref<144x512xbf16, #tpu.memory_space<vmem>>, vector<16x256xbf16>,
    %c0_69 = arith.constant 0 : index
    %c145_70 = arith.constant 145 : index
    %67 = vector.load %arg6[%c0_69, %c145_70] : memref<16x512xbf16, #tpu.memory_space<vmem>>, vector<16x256xbf16>
    %68 = vector.broadcast %1 : vector<1x256xbf16> to vector<16x256xbf16>
    %69 = arith.mulf %67, %68 : vector<16x256xbf16>
    %c128_71 = arith.constant 128 : index
    %c256_72 = arith.constant 256 : index
    %70 = vector.load %arg7[%c128_71, %c256_72] : memref<144x512xbf16, #tpu.memory_space<vmem>>, vector<16x256xbf16>
    tpu.vector_store %arg7[%c128_71, %c256_72], %69 {strides = array<i32>} : memref<144x512xbf16, #tpu.memory_space<vmem>>, vector<16x256xbf16>,
    %c0_73 = arith.constant 0 : index
    %c0_74 = arith.constant 0 : index
    %c0_75 = arith.constant 0 : index
    %71 = vector.load %arg3[%c0_73, %c0_74, %c0_75] : memref<1x16x144xbf16, #tpu.memory_space<vmem>>, vector<1x16x144xbf16>
    %72 = vector.shape_cast %71 : vector<1x16x144xbf16> to vector<16x144xbf16>
    %c0_76 = arith.constant 0 : index
    %c0_77 = arith.constant 0 : index
    %73 = vector.load %arg7[%c0_76, %c0_77] : memref<144x512xbf16, #tpu.memory_space<vmem>>, vector<144x512xbf16>
    %cst_78 = arith.constant dense<0.000000e+00> : vector<16x512xf32>
    %74 = tpu.matmul %72, %73, %cst_78 {dimension_numbers = #tpu.dot_dimension_numbers<[1], [0], [0], [1], [0, 0, 1, 1], [], []>} : vector<16x144xbf16>, vector<144x512xbf16>, vector<16x512xf32> -> vector<16x512xf32>
    %cst_79 = arith.constant 0.000000e+00 : f32
    %75 = vector.broadcast %cst_79 : f32 to vector<16x512xf32>
    %76 = arith.maximumf %74, %75 : vector<16x512xf32>
    %77 = arith.truncf %76 : vector<16x512xf32> to vector<16x512xbf16>
    %cst_80 = arith.constant 0.000000e+00 : bf16
    %78 = vector.broadcast %cst_80 : bf16 to vector<16x128xbf16>
    %c0_81 = arith.constant 0 : index
    %c0_82 = arith.constant 0 : index
    %79 = vector.load %arg8[%c0_81, %c0_82] : memref<16x512xbf16, #tpu.memory_space<vmem>>, vector<16x128xbf16>
    tpu.vector_store %arg8[%c0_81, %c0_82], %78 {strides = array<i32>} : memref<16x512xbf16, #tpu.memory_space<vmem>>, vector<16x128xbf16>,
    %c0_83 = arith.constant 0 : index
    %c384_84 = arith.constant 384 : index
    %80 = vector.load %arg8[%c0_83, %c384_84] : memref<16x512xbf16, #tpu.memory_space<vmem>>, vector<16x128xbf16>
    tpu.vector_store %arg8[%c0_83, %c384_84], %78 {strides = array<i32>} : memref<16x512xbf16, #tpu.memory_space<vmem>>, vector<16x128xbf16>,
    %81 = vector.extract_strided_slice %77 {offsets = [0, 0], sizes = [16, 256], strides = [1, 1]} : vector<16x512xbf16> to vector<16x256xbf16>
    %c0_85 = arith.constant 0 : index
    %c128_86 = arith.constant 128 : index
    %82 = vector.load %arg8[%c0_85, %c128_86] : memref<16x512xbf16, #tpu.memory_space<vmem>>, vector<16x256xbf16>
    tpu.vector_store %arg8[%c0_85, %c128_86], %81 {strides = array<i32>} : memref<16x512xbf16, #tpu.memory_space<vmem>>, vector<16x256xbf16>,
    %c0_87 = arith.constant 0 : index
    %c111_88 = arith.constant 111 : index
    %83 = vector.load %arg8[%c0_87, %c111_88] : memref<16x512xbf16, #tpu.memory_space<vmem>>, vector<16x256xbf16>
    %84 = vector.broadcast %0 : vector<1x256xbf16> to vector<16x256xbf16>
    %85 = arith.mulf %83, %84 : vector<16x256xbf16>
    %c0_89 = arith.constant 0 : index
    %c0_90 = arith.constant 0 : index
    %86 = vector.load %arg9[%c0_89, %c0_90] : memref<144x512xbf16, #tpu.memory_space<vmem>>, vector<16x256xbf16>
    tpu.vector_store %arg9[%c0_89, %c0_90], %85 {strides = array<i32>} : memref<144x512xbf16, #tpu.memory_space<vmem>>, vector<16x256xbf16>,
    %c0_91 = arith.constant 0 : index
    %c112_92 = arith.constant 112 : index
    %87 = vector.load %arg8[%c0_91, %c112_92] : memref<16x512xbf16, #tpu.memory_space<vmem>>, vector<16x256xbf16>
    %c16_93 = arith.constant 16 : index
    %c0_94 = arith.constant 0 : index
    %88 = vector.load %arg9[%c16_93, %c0_94] : memref<144x512xbf16, #tpu.memory_space<vmem>>, vector<16x256xbf16>
    tpu.vector_store %arg9[%c16_93, %c0_94], %87 {strides = array<i32>} : memref<144x512xbf16, #tpu.memory_space<vmem>>, vector<16x256xbf16>,
    %c0_95 = arith.constant 0 : index
    %c113_96 = arith.constant 113 : index
    %89 = vector.load %arg8[%c0_95, %c113_96] : memref<16x512xbf16, #tpu.memory_space<vmem>>, vector<16x256xbf16>
    %90 = vector.broadcast %1 : vector<1x256xbf16> to vector<16x256xbf16>
    %91 = arith.mulf %89, %90 : vector<16x256xbf16>
    %c32_97 = arith.constant 32 : index
    %c0_98 = arith.constant 0 : index
    %92 = vector.load %arg9[%c32_97, %c0_98] : memref<144x512xbf16, #tpu.memory_space<vmem>>, vector<16x256xbf16>
    tpu.vector_store %arg9[%c32_97, %c0_98], %91 {strides = array<i32>} : memref<144x512xbf16, #tpu.memory_space<vmem>>, vector<16x256xbf16>,
    %c0_99 = arith.constant 0 : index
    %c127_100 = arith.constant 127 : index
    %93 = vector.load %arg8[%c0_99, %c127_100] : memref<16x512xbf16, #tpu.memory_space<vmem>>, vector<16x256xbf16>
    %94 = vector.broadcast %0 : vector<1x256xbf16> to vector<16x256xbf16>
    %95 = arith.mulf %93, %94 : vector<16x256xbf16>
    %c48_101 = arith.constant 48 : index
    %c0_102 = arith.constant 0 : index
    %96 = vector.load %arg9[%c48_101, %c0_102] : memref<144x512xbf16, #tpu.memory_space<vmem>>, vector<16x256xbf16>
    tpu.vector_store %arg9[%c48_101, %c0_102], %95 {strides = array<i32>} : memref<144x512xbf16, #tpu.memory_space<vmem>>, vector<16x256xbf16>,
    %c0_103 = arith.constant 0 : index
    %c128_104 = arith.constant 128 : index
    %97 = vector.load %arg8[%c0_103, %c128_104] : memref<16x512xbf16, #tpu.memory_space<vmem>>, vector<16x256xbf16>
    %c64_105 = arith.constant 64 : index
    %c0_106 = arith.constant 0 : index
    %98 = vector.load %arg9[%c64_105, %c0_106] : memref<144x512xbf16, #tpu.memory_space<vmem>>, vector<16x256xbf16>
    tpu.vector_store %arg9[%c64_105, %c0_106], %97 {strides = array<i32>} : memref<144x512xbf16, #tpu.memory_space<vmem>>, vector<16x256xbf16>,
    %c0_107 = arith.constant 0 : index
    %c129_108 = arith.constant 129 : index
    %99 = vector.load %arg8[%c0_107, %c129_108] : memref<16x512xbf16, #tpu.memory_space<vmem>>, vector<16x256xbf16>
    %100 = vector.broadcast %1 : vector<1x256xbf16> to vector<16x256xbf16>
    %101 = arith.mulf %99, %100 : vector<16x256xbf16>
    %c80_109 = arith.constant 80 : index
    %c0_110 = arith.constant 0 : index
    %102 = vector.load %arg9[%c80_109, %c0_110] : memref<144x512xbf16, #tpu.memory_space<vmem>>, vector<16x256xbf16>
    tpu.vector_store %arg9[%c80_109, %c0_110], %101 {strides = array<i32>} : memref<144x512xbf16, #tpu.memory_space<vmem>>, vector<16x256xbf16>,
    %c0_111 = arith.constant 0 : index
    %c143_112 = arith.constant 143 : index
    %103 = vector.load %arg8[%c0_111, %c143_112] : memref<16x512xbf16, #tpu.memory_space<vmem>>, vector<16x256xbf16>
    %104 = vector.broadcast %0 : vector<1x256xbf16> to vector<16x256xbf16>
    %105 = arith.mulf %103, %104 : vector<16x256xbf16>
    %c96_113 = arith.constant 96 : index
    %c0_114 = arith.constant 0 : index
    %106 = vector.load %arg9[%c96_113, %c0_114] : memref<144x512xbf16, #tpu.memory_space<vmem>>, vector<16x256xbf16>
    tpu.vector_store %arg9[%c96_113, %c0_114], %105 {strides = array<i32>} : memref<144x512xbf16, #tpu.memory_space<vmem>>, vector<16x256xbf16>,
    %c0_115 = arith.constant 0 : index
    %c144_116 = arith.constant 144 : index
    %107 = vector.load %arg8[%c0_115, %c144_116] : memref<16x512xbf16, #tpu.memory_space<vmem>>, vector<16x256xbf16>
    %c112_117 = arith.constant 112 : index
    %c0_118 = arith.constant 0 : index
    %108 = vector.load %arg9[%c112_117, %c0_118] : memref<144x512xbf16, #tpu.memory_space<vmem>>, vector<16x256xbf16>
    tpu.vector_store %arg9[%c112_117, %c0_118], %107 {strides = array<i32>} : memref<144x512xbf16, #tpu.memory_space<vmem>>, vector<16x256xbf16>,
    %c0_119 = arith.constant 0 : index
    %c145_120 = arith.constant 145 : index
    %109 = vector.load %arg8[%c0_119, %c145_120] : memref<16x512xbf16, #tpu.memory_space<vmem>>, vector<16x256xbf16>
    %110 = vector.broadcast %1 : vector<1x256xbf16> to vector<16x256xbf16>
    %111 = arith.mulf %109, %110 : vector<16x256xbf16>
    %c128_121 = arith.constant 128 : index
    %c0_122 = arith.constant 0 : index
    %112 = vector.load %arg9[%c128_121, %c0_122] : memref<144x512xbf16, #tpu.memory_space<vmem>>, vector<16x256xbf16>
    tpu.vector_store %arg9[%c128_121, %c0_122], %111 {strides = array<i32>} : memref<144x512xbf16, #tpu.memory_space<vmem>>, vector<16x256xbf16>,
    %113 = vector.extract_strided_slice %77 {offsets = [0, 256], sizes = [16, 256], strides = [1, 1]} : vector<16x512xbf16> to vector<16x256xbf16>
    %c0_123 = arith.constant 0 : index
    %c128_124 = arith.constant 128 : index
    %114 = vector.load %arg8[%c0_123, %c128_124] : memref<16x512xbf16, #tpu.memory_space<vmem>>, vector<16x256xbf16>
    tpu.vector_store %arg8[%c0_123, %c128_124], %113 {strides = array<i32>} : memref<16x512xbf16, #tpu.memory_space<vmem>>, vector<16x256xbf16>,
    %c0_125 = arith.constant 0 : index
    %c111_126 = arith.constant 111 : index
    %115 = vector.load %arg8[%c0_125, %c111_126] : memref<16x512xbf16, #tpu.memory_space<vmem>>, vector<16x256xbf16>
    %116 = vector.broadcast %0 : vector<1x256xbf16> to vector<16x256xbf16>
    %117 = arith.mulf %115, %116 : vector<16x256xbf16>
    %c0_127 = arith.constant 0 : index
    %c256_128 = arith.constant 256 : index
    %118 = vector.load %arg9[%c0_127, %c256_128] : memref<144x512xbf16, #tpu.memory_space<vmem>>, vector<16x256xbf16>
    tpu.vector_store %arg9[%c0_127, %c256_128], %117 {strides = array<i32>} : memref<144x512xbf16, #tpu.memory_space<vmem>>, vector<16x256xbf16>,
    %c0_129 = arith.constant 0 : index
    %c112_130 = arith.constant 112 : index
    %119 = vector.load %arg8[%c0_129, %c112_130] : memref<16x512xbf16, #tpu.memory_space<vmem>>, vector<16x256xbf16>
    %c16_131 = arith.constant 16 : index
    %c256_132 = arith.constant 256 : index
    %120 = vector.load %arg9[%c16_131, %c256_132] : memref<144x512xbf16, #tpu.memory_space<vmem>>, vector<16x256xbf16>
    tpu.vector_store %arg9[%c16_131, %c256_132], %119 {strides = array<i32>} : memref<144x512xbf16, #tpu.memory_space<vmem>>, vector<16x256xbf16>,
    %c0_133 = arith.constant 0 : index
    %c113_134 = arith.constant 113 : index
    %121 = vector.load %arg8[%c0_133, %c113_134] : memref<16x512xbf16, #tpu.memory_space<vmem>>, vector<16x256xbf16>
    %122 = vector.broadcast %1 : vector<1x256xbf16> to vector<16x256xbf16>
    %123 = arith.mulf %121, %122 : vector<16x256xbf16>
    %c32_135 = arith.constant 32 : index
    %c256_136 = arith.constant 256 : index
    %124 = vector.load %arg9[%c32_135, %c256_136] : memref<144x512xbf16, #tpu.memory_space<vmem>>, vector<16x256xbf16>
    tpu.vector_store %arg9[%c32_135, %c256_136], %123 {strides = array<i32>} : memref<144x512xbf16, #tpu.memory_space<vmem>>, vector<16x256xbf16>,
    %c0_137 = arith.constant 0 : index
    %c127_138 = arith.constant 127 : index
    %125 = vector.load %arg8[%c0_137, %c127_138] : memref<16x512xbf16, #tpu.memory_space<vmem>>, vector<16x256xbf16>
    %126 = vector.broadcast %0 : vector<1x256xbf16> to vector<16x256xbf16>
    %127 = arith.mulf %125, %126 : vector<16x256xbf16>
    %c48_139 = arith.constant 48 : index
    %c256_140 = arith.constant 256 : index
    %128 = vector.load %arg9[%c48_139, %c256_140] : memref<144x512xbf16, #tpu.memory_space<vmem>>, vector<16x256xbf16>
    tpu.vector_store %arg9[%c48_139, %c256_140], %127 {strides = array<i32>} : memref<144x512xbf16, #tpu.memory_space<vmem>>, vector<16x256xbf16>,
    %c0_141 = arith.constant 0 : index
    %c128_142 = arith.constant 128 : index
    %129 = vector.load %arg8[%c0_141, %c128_142] : memref<16x512xbf16, #tpu.memory_space<vmem>>, vector<16x256xbf16>
    %c64_143 = arith.constant 64 : index
    %c256_144 = arith.constant 256 : index
    %130 = vector.load %arg9[%c64_143, %c256_144] : memref<144x512xbf16, #tpu.memory_space<vmem>>, vector<16x256xbf16>
    tpu.vector_store %arg9[%c64_143, %c256_144], %129 {strides = array<i32>} : memref<144x512xbf16, #tpu.memory_space<vmem>>, vector<16x256xbf16>,
    %c0_145 = arith.constant 0 : index
    %c129_146 = arith.constant 129 : index
    %131 = vector.load %arg8[%c0_145, %c129_146] : memref<16x512xbf16, #tpu.memory_space<vmem>>, vector<16x256xbf16>
    %132 = vector.broadcast %1 : vector<1x256xbf16> to vector<16x256xbf16>
    %133 = arith.mulf %131, %132 : vector<16x256xbf16>
    %c80_147 = arith.constant 80 : index
    %c256_148 = arith.constant 256 : index
    %134 = vector.load %arg9[%c80_147, %c256_148] : memref<144x512xbf16, #tpu.memory_space<vmem>>, vector<16x256xbf16>
    tpu.vector_store %arg9[%c80_147, %c256_148], %133 {strides = array<i32>} : memref<144x512xbf16, #tpu.memory_space<vmem>>, vector<16x256xbf16>,
    %c0_149 = arith.constant 0 : index
    %c143_150 = arith.constant 143 : index
    %135 = vector.load %arg8[%c0_149, %c143_150] : memref<16x512xbf16, #tpu.memory_space<vmem>>, vector<16x256xbf16>
    %136 = vector.broadcast %0 : vector<1x256xbf16> to vector<16x256xbf16>
    %137 = arith.mulf %135, %136 : vector<16x256xbf16>
    %c96_151 = arith.constant 96 : index
    %c256_152 = arith.constant 256 : index
    %138 = vector.load %arg9[%c96_151, %c256_152] : memref<144x512xbf16, #tpu.memory_space<vmem>>, vector<16x256xbf16>
    tpu.vector_store %arg9[%c96_151, %c256_152], %137 {strides = array<i32>} : memref<144x512xbf16, #tpu.memory_space<vmem>>, vector<16x256xbf16>,
    %c0_153 = arith.constant 0 : index
    %c144_154 = arith.constant 144 : index
    %139 = vector.load %arg8[%c0_153, %c144_154] : memref<16x512xbf16, #tpu.memory_space<vmem>>, vector<16x256xbf16>
    %c112_155 = arith.constant 112 : index
    %c256_156 = arith.constant 256 : index
    %140 = vector.load %arg9[%c112_155, %c256_156] : memref<144x512xbf16, #tpu.memory_space<vmem>>, vector<16x256xbf16>
    tpu.vector_store %arg9[%c112_155, %c256_156], %139 {strides = array<i32>} : memref<144x512xbf16, #tpu.memory_space<vmem>>, vector<16x256xbf16>,
    %c0_157 = arith.constant 0 : index
    %c145_158 = arith.constant 145 : index
    %141 = vector.load %arg8[%c0_157, %c145_158] : memref<16x512xbf16, #tpu.memory_space<vmem>>, vector<16x256xbf16>
    %142 = vector.broadcast %1 : vector<1x256xbf16> to vector<16x256xbf16>
    %143 = arith.mulf %141, %142 : vector<16x256xbf16>
    %c128_159 = arith.constant 128 : index
    %c256_160 = arith.constant 256 : index
    %144 = vector.load %arg9[%c128_159, %c256_160] : memref<144x512xbf16, #tpu.memory_space<vmem>>, vector<16x256xbf16>
    tpu.vector_store %arg9[%c128_159, %c256_160], %143 {strides = array<i32>} : memref<144x512xbf16, #tpu.memory_space<vmem>>, vector<16x256xbf16>,
    %c0_161 = arith.constant 0 : index
    %c0_162 = arith.constant 0 : index
    %c0_163 = arith.constant 0 : index
    %145 = vector.load %arg4[%c0_161, %c0_162, %c0_163] : memref<1x4x144xbf16, #tpu.memory_space<vmem>>, vector<1x4x144xbf16>
    %146 = vector.shape_cast %145 : vector<1x4x144xbf16> to vector<4x144xbf16>
    %c0_164 = arith.constant 0 : index
    %c0_165 = arith.constant 0 : index
    %147 = vector.load %arg9[%c0_164, %c0_165] : memref<144x512xbf16, #tpu.memory_space<vmem>>, vector<144x512xbf16>
    %cst_166 = arith.constant dense<0.000000e+00> : vector<4x512xf32>
    %148 = tpu.matmul %146, %147, %cst_166 {dimension_numbers = #tpu.dot_dimension_numbers<[1], [0], [0], [1], [0, 0, 1, 1], [], []>} : vector<4x144xbf16>, vector<144x512xbf16>, vector<4x512xf32> -> vector<4x512xf32>
    %149 = vector.extract_strided_slice %148 {offsets = [0, 0], sizes = [4, 256], strides = [1, 1]} : vector<4x512xf32> to vector<4x256xf32>
    %c0_167 = arith.constant 0 : index
    %c0_168 = arith.constant 0 : index
    %c0_169 = arith.constant 0 : index
    %c0_170 = arith.constant 0 : index
    %150 = vector.load %arg5[%c0_167, %c0_168, %c0_169, %c0_170] : memref<1x2x4x256xf32, #tpu.memory_space<vmem>>, vector<1x1x4x256xf32>
    %151 = vector.shape_cast %150 : vector<1x1x4x256xf32> to vector<4x256xf32>
    %152 = vector.shape_cast %149 : vector<4x256xf32> to vector<1x1x4x256xf32>
    tpu.vector_store %arg5[%c0_167, %c0_168, %c0_169, %c0_170], %152 {strides = array<i32>} : memref<1x2x4x256xf32, #tpu.memory_space<vmem>>, vector<1x1x4x256xf32>,
    %153 = vector.extract_strided_slice %148 {offsets = [0, 256], sizes = [4, 256], strides = [1, 1]} : vector<4x512xf32> to vector<4x256xf32>
    %c0_171 = arith.constant 0 : index
    %c1_172 = arith.constant 1 : index
    %c0_173 = arith.constant 0 : index
    %c0_174 = arith.constant 0 : index
    %154 = vector.load %arg5[%c0_171, %c1_172, %c0_173, %c0_174] : memref<1x2x4x256xf32, #tpu.memory_space<vmem>>, vector<1x1x4x256xf32>
    %155 = vector.shape_cast %154 : vector<1x1x4x256xf32> to vector<4x256xf32>
    %156 = vector.shape_cast %153 : vector<4x256xf32> to vector<1x1x4x256xf32>
    tpu.vector_store %arg5[%c0_171, %c1_172, %c0_173, %c0_174], %156 {strides = array<i32>} : memref<1x2x4x256xf32, #tpu.memory_space<vmem>>, vector<1x1x4x256xf32>,
    return
  }
  func.func @transform_0(%arg0: i32) -> (i32, i32) {
    %c0_i32 = arith.constant 0 : i32
    %c0_i32_0 = arith.constant 0 : i32
    %c0_i32_1 = arith.constant 0 : i32
    return %c0_i32, %c0_i32_0 : i32, i32
  }
  func.func @transform_1(%arg0: i32) -> (i32, i32, i32, i32) {
    %c0_i32 = arith.constant 0 : i32
    %c0_i32_0 = arith.constant 0 : i32
    %c0_i32_1 = arith.constant 0 : i32
    %c0_i32_2 = arith.constant 0 : i32
    return %arg0, %c0_i32, %c0_i32_0, %c0_i32_1 : i32, i32, i32, i32
  }
  func.func @transform_2(%arg0: i32) -> (i32, i32, i32) {
    %c0_i32 = arith.constant 0 : i32
    %c0_i32_0 = arith.constant 0 : i32
    %c0_i32_1 = arith.constant 0 : i32
    return %arg0, %c0_i32, %c0_i32_0 : i32, i32, i32
  }
  func.func @transform_3(%arg0: i32) -> (i32, i32, i32) {
    %c0_i32 = arith.constant 0 : i32
    %c0_i32_0 = arith.constant 0 : i32
    %c0_i32_1 = arith.constant 0 : i32
    return %arg0, %c0_i32, %c0_i32_0 : i32, i32, i32
  }
  func.func @transform_4(%arg0: i32) -> (i32, i32, i32, i32) {
    %c0_i32 = arith.constant 0 : i32
    %c0_i32_0 = arith.constant 0 : i32
    %c0_i32_1 = arith.constant 0 : i32
    %c0_i32_2 = arith.constant 0 : i32
    return %arg0, %c0_i32, %c0_i32_0, %c0_i32_1 : i32, i32, i32, i32
  }
}

</mosaic_0001>

<bundles_post_ra>
// kernel: squeeze.8
= control target key start
LH: loop header
LB: loop body
LE: loop exit
PB: predicated region body
PF: predicated region fallthrough
CT: control target
= control target key end

     0   :  { %s290_s0 = inlined_call_operand.vmem [shape: f32[1,2,4,256], index: 0, kind: input, shape index: {}]   ;;  %s291_s1 = inlined_call_operand.hbm [shape: f32[2,4,16,16], index: 1, kind: output, shape index: {}]  }
   0x1   :  { %v179_v0 = vld [vmem:[%s290_s0 + $0x4] sm:$0xf]  ;;  %v19_v1 = vld [vmem:[%s290_s0] sm:$0xf]  ;;  %v177_v2 = vld [vmem:[%s290_s0 + $0xc] sm:$0xf] }
   0x2   :  { %18 = vst [vmem:[#allocation2 + $0x8] sm:$0xf] %v179_v0  ;;  %20 = vst [vmem:[#allocation2] sm:$0xf] %v19_v1  ;;  %v178_v3 = vld [vmem:[%s290_s0 + $0x8] sm:$0xf] }
   0x3   :  { %9 = vst [vmem:[#allocation2 + $0x18] sm:$0xf] %v177_v2  ;;  %14 = vst [vmem:[#allocation2 + $0x10] sm:$0xf] %v178_v3 }
   0x4   :  { %2 = vsyncpa [#allocation1], 0  ;;  %vm22_vm0 = vcmask 130048   ;;  %s212_s0 = smov 96   ;;  %s213_s14 = smov 112  }
   0x5   :  { %s214_s15 = smov 80   ;;  %s215_s16 = smov 64  }
   0x6   :  { %s216_s17 = smov 48   ;;  %s217_s18 = smov 32  }
   0x7   :  { %s218_s19 = smov 16   ;;  %s219_s20 = smov [#allocation0]  }
   0x8   :  { %s169_s21 = sshll.u32 %s219_s20, 4  ;;  %s170_s21 = int_to_ptr.vmem [resolvable:$true] %s169_s21 }
   0x9   :  { %v63_v4 = vld.sshfl [vmem:[#allocation2] sm:$0xff pattern:$0xb3a29180]   ;;  %s188_s22 = scalar_lea.vmem %s170_s21, 2048  ;;  %p193_p1 = scmp.lt.s32.totalorder %s170_s21, %s170_s21 }
   0xa   :  { %v21_v5 = vld [vmem:[#allocation2] sm:$0xf]   ;;  %64 = vrot.lane.b32.xlu1 %v63_v4, %s212_s0  ;;  %47 = vrot.lane.b32.xlu0 %v63_v4, %s213_s14  ;;  %v26_v6 = vld [vmem:[#allocation2 + $0x8] sm:$0xf]   ;;  %v33_v8 = vld [vmem:[#allocation2 + $0x10] sm:$0xf]   ;;  %p189_p0 = scmp.ne.s32.totalorder %s170_s21, %s188_s22  ;;  %p194_p2 = scmp.lt.s32.totalorder %s188_s22, %s188_s22 }
   0xb   :  { %23 = vst.msk [vmem:[#allocation0] ss:$16 sm:$0x3] %vm22_vm0, %v21_v5   ;;  %24 = vst.msk [vmem:[#allocation0] ss:$16 sm:$0xc] %vm22_vm0, %v21_v5  }
   0xc   :  { %v72_v7 = vld.sshfl [vmem:[#allocation2 + $0x10] sm:$0xff pattern:$0xb3a29180]   ;;  %29 = vst.msk [vmem:[#allocation0 + $0x8] ss:$16 sm:$0x3] %vm22_vm0, %v26_v6   ;;  %p195_p3 = por %p194_p2, %p193_p1 }
   0xd   :  { %31 = vst.msk [vmem:[#allocation0 + $0x8] ss:$16 sm:$0xc] %vm22_vm0, %v26_v6   ;;  %v40_v9 = vld [vmem:[#allocation2 + $0x18] sm:$0xf]  }
   0xe   :  { %36 = vst.msk [vmem:[#allocation0 + $0x40] ss:$16 sm:$0x3] %vm22_vm0, %v33_v8   ;;  %38 = vst.msk [vmem:[#allocation0 + $0x40] ss:$16 sm:$0xc] %vm22_vm0, %v33_v8   ;;  %73 = vrot.lane.b32.xlu1 %v72_v7, %s212_s0  ;;  %56 = vrot.lane.b32.xlu0 %v72_v7, %s213_s14  ;;  %p196_p4 = pnand %p195_p3, %p189_p0 }
   0xf   :  { %43 = vst.msk [vmem:[#allocation0 + $0x48] ss:$16 sm:$0x3] %vm22_vm0, %v40_v9   ;;  %45 = vst.msk [vmem:[#allocation0 + $0x48] ss:$16 sm:$0xc] %vm22_vm0, %v40_v9  }
  0x12   :  { %90 = vrot.lane.b32.xlu1 %v72_v7, %s214_s15  ;;  %81 = vrot.lane.b32.xlu0 %v63_v4, %s214_s15 }
  0x16   :  { %107 = vrot.lane.b32.xlu1 %v72_v7, %s215_s16  ;;  %98 = vrot.lane.b32.xlu0 %v63_v4, %s215_s16 }
  0x1a   :  { %124 = vrot.lane.b32.xlu1 %v72_v7, %s216_s17  ;;  %115 = vrot.lane.b32.xlu0 %v63_v4, %s216_s17 }
  0x1e   :  { %141 = vrot.lane.b32.xlu1 %v72_v7, %s217_s18  ;;  %132 = vrot.lane.b32.xlu0 %v63_v4, %s217_s18 }
  0x22   :  { %158 = vrot.lane.b32.xlu1 %v72_v7, %s218_s19  ;;  %149 = vrot.lane.b32.xlu0 %v63_v4, %s218_s19 }
  0x7c   :  { %v65_v10 = vpop.permute.xlu1 %64   ;;  %v48_v11 = vpop.permute.xlu0 %47  }
  0x7d   :  { %68 = vst.msk [vmem:[#allocation0 + $0x2] ss:$8 sm:$0xf] %vm22_vm0, %v65_v10   ;;  %70 = vst.msk [vmem:[#allocation0 + $0x2] ss:$8 sm:$0xf0] %vm22_vm0, %v65_v10  }
  0x7e   :  { %51 = vst.msk [vmem:[#allocation0 + $0x1] ss:$8 sm:$0xf] %vm22_vm0, %v48_v11   ;;  %53 = vst.msk [vmem:[#allocation0 + $0x1] ss:$8 sm:$0xf0] %vm22_vm0, %v48_v11  }
  0x80   :  { %v74_v12 = vpop.permute.xlu1 %73   ;;  %v57_v13 = vpop.permute.xlu0 %56  }
  0x81   :  { %77 = vst.msk [vmem:[#allocation0 + $0x42] ss:$8 sm:$0xf] %vm22_vm0, %v74_v12   ;;  %79 = vst.msk [vmem:[#allocation0 + $0x42] ss:$8 sm:$0xf0] %vm22_vm0, %v74_v12  }
  0x82   :  { %60 = vst.msk [vmem:[#allocation0 + $0x41] ss:$8 sm:$0xf] %vm22_vm0, %v57_v13   ;;  %62 = vst.msk [vmem:[#allocation0 + $0x41] ss:$8 sm:$0xf0] %vm22_vm0, %v57_v13  }
  0x84   :  { %v91_v14 = vpop.permute.xlu1 %90   ;;  %v82_v15 = vpop.permute.xlu0 %81  }
  0x85   :  { %94 = vst.msk [vmem:[#allocation0 + $0x43] ss:$8 sm:$0xf] %vm22_vm0, %v91_v14   ;;  %96 = vst.msk [vmem:[#allocation0 + $0x43] ss:$8 sm:$0xf0] %vm22_vm0, %v91_v14  }
  0x86   :  { %85 = vst.msk [vmem:[#allocation0 + $0x3] ss:$8 sm:$0xf] %vm22_vm0, %v82_v15   ;;  %87 = vst.msk [vmem:[#allocation0 + $0x3] ss:$8 sm:$0xf0] %vm22_vm0, %v82_v15  }
  0x88   :  { %v108_v16 = vpop.permute.xlu1 %107   ;;  %v99_v17 = vpop.permute.xlu0 %98  }
  0x89   :  { %111 = vst.msk [vmem:[#allocation0 + $0x44] ss:$8 sm:$0xf] %vm22_vm0, %v108_v16   ;;  %113 = vst.msk [vmem:[#allocation0 + $0x44] ss:$8 sm:$0xf0] %vm22_vm0, %v108_v16  }
  0x8a   :  { %102 = vst.msk [vmem:[#allocation0 + $0x4] ss:$8 sm:$0xf] %vm22_vm0, %v99_v17   ;;  %104 = vst.msk [vmem:[#allocation0 + $0x4] ss:$8 sm:$0xf0] %vm22_vm0, %v99_v17  }
  0x8c   :  { %v125_v18 = vpop.permute.xlu1 %124   ;;  %v116_v19 = vpop.permute.xlu0 %115  }
  0x8d   :  { %128 = vst.msk [vmem:[#allocation0 + $0x45] ss:$8 sm:$0xf] %vm22_vm0, %v125_v18   ;;  %130 = vst.msk [vmem:[#allocation0 + $0x45] ss:$8 sm:$0xf0] %vm22_vm0, %v125_v18  }
  0x8e   :  { %119 = vst.msk [vmem:[#allocation0 + $0x5] ss:$8 sm:$0xf] %vm22_vm0, %v116_v19   ;;  %121 = vst.msk [vmem:[#allocation0 + $0x5] ss:$8 sm:$0xf0] %vm22_vm0, %v116_v19  }
  0x90   :  { %v142_v20 = vpop.permute.xlu1 %141   ;;  %v133_v21 = vpop.permute.xlu0 %132  }
  0x91   :  { %145 = vst.msk [vmem:[#allocation0 + $0x46] ss:$8 sm:$0xf] %vm22_vm0, %v142_v20   ;;  %147 = vst.msk [vmem:[#allocation0 + $0x46] ss:$8 sm:$0xf0] %vm22_vm0, %v142_v20  }
  0x92   :  { %136 = vst.msk [vmem:[#allocation0 + $0x6] ss:$8 sm:$0xf] %vm22_vm0, %v133_v21   ;;  %138 = vst.msk [vmem:[#allocation0 + $0x6] ss:$8 sm:$0xf0] %vm22_vm0, %v133_v21  }
  0x94   :  { %v159_v22 = vpop.permute.xlu1 %158   ;;  %v150_v23 = vpop.permute.xlu0 %149  }
  0x95   :  { %162 = vst.msk [vmem:[#allocation0 + $0x47] ss:$8 sm:$0xf] %vm22_vm0, %v159_v22   ;;  %164 = vst.msk [vmem:[#allocation0 + $0x47] ss:$8 sm:$0xf0] %vm22_vm0, %v159_v22  }
  0x96   :  { %153 = vst.msk [vmem:[#allocation0 + $0x7] ss:$8 sm:$0xf] %vm22_vm0, %v150_v23   ;;  %155 = vst.msk [vmem:[#allocation0 + $0x7] ss:$8 sm:$0xf0] %vm22_vm0, %v150_v23  }
  0x97   :  { %199 = shalt.err (!%p196_p4)
}
  0x98   :  { %s200_s25 = scalar_lea.hbm %s291_s1, 2048 }
  0x99   :  { %p201_p5 = scmp.ne.s32.totalorder %s291_s1, %s200_s25  ;;  %p204_p6 = scmp.lt.u32.totalorder %s200_s25, %s291_s1 }
  0x9b   :  { %p206_p7 = pnand %p204_p6, %p201_p5 }
  0x9d   :  { %209 = shalt.err (!%p206_p7)
}
  0x9e   :  { %172 = dma.vmem_to_hbm [thread:$0]  %s170_s21, 2048, %s291_s1, [#allocation1]  }
  0x9f   :  { %210 = dma.done.wait [#allocation1], 2048  }
  0xa0   :  { %211 = vsyncadd [#allocation1], 4294965248 }
  0xa1   :  { %174 = vsyncpa [#allocation1], 1 }

// kernel: squeeze.6
= control target key start
LH: loop header
LB: loop body
LE: loop exit
PB: predicated region body
PF: predicated region fallthrough
CT: control target
= control target key end

     0   :  { %s353_s8 = smov 112   ;;  %s479_s0 = inlined_call_operand.vmem [shape: f32[1,2,8,256], index: 0, kind: input, shape index: {}]   ;;  %s480_s1 = inlined_call_operand.hbm [shape: f32[2,8,16,16], index: 1, kind: output, shape index: {}]  }
   0x1   :  { %v301_v0 = vld.sshfl [vmem:[%s479_s0 + $0x10] sm:$0xff pattern:$0xb3a29180]   ;;  %v42_v1 = vld.sshfl [vmem:[%s479_s0] sm:$0xff pattern:$0xb3a29180]  }
   0x2   :  { %61 = vrot.lane.b32.xlu1 %v301_v0, %s353_s8  ;;  %43 = vrot.lane.b32.xlu0 %v42_v1, %s353_s8  ;;  %v302_v2 = vld.sshfl [vmem:[%s479_s0 + $0x14] sm:$0xff pattern:$0xb3a29180]   ;;  %v300_v3 = vld.sshfl [vmem:[%s479_s0 + $0x4] sm:$0xff pattern:$0xb3a29180]  }
   0x3   :  { %2 = vsyncpa [#allocation1], 0  ;;  %s354_s15 = smov 96   ;;  %s355_s16 = smov 80   ;;  %vm4_vm0 = vcmask 130048   ;;  %v3_v4 = vld [vmem:[%s479_s0] sm:$0xff]  }
   0x4   :  { %s356_s17 = smov 64   ;;  %s357_s18 = smov 48   ;;  %v297_v5 = vld [vmem:[%s479_s0 + $0x8] sm:$0xff]   ;;  %v298_v6 = vld [vmem:[%s479_s0 + $0x10] sm:$0xff]   ;;  %v299_v7 = vld [vmem:[%s479_s0 + $0x18] sm:$0xff]  }
   0x5   :  { %s358_s25 = smov 32   ;;  %5 = vst.msk [vmem:[#allocation0] ss:$16 sm:$0x3] %vm4_vm0, %v3_v4   ;;  %s359_s0 = smov 16  }
   0x6   :  { %70 = vrot.lane.b32.xlu1 %v302_v2, %s353_s8  ;;  %52 = vrot.lane.b32.xlu0 %v300_v3, %s353_s8  ;;  %6 = vst.msk [vmem:[#allocation0] ss:$16 sm:$0xc] %vm4_vm0, %v3_v4   ;;  %7 = vst.msk [vmem:[#allocation0] ss:$16 sm:$0x30] %vm4_vm0, %v3_v4  }
   0x7   :  { %8 = vst.msk [vmem:[#allocation0] ss:$16 sm:$0xc0] %vm4_vm0, %v3_v4   ;;  %13 = vst.msk [vmem:[#allocation0 + $0x8] ss:$16 sm:$0x3] %vm4_vm0, %v297_v5  }
   0x8   :  { %15 = vst.msk [vmem:[#allocation0 + $0x8] ss:$16 sm:$0xc] %vm4_vm0, %v297_v5   ;;  %17 = vst.msk [vmem:[#allocation0 + $0x8] ss:$16 sm:$0x30] %vm4_vm0, %v297_v5  }
   0x9   :  { %19 = vst.msk [vmem:[#allocation0 + $0x8] ss:$16 sm:$0xc0] %vm4_vm0, %v297_v5   ;;  %24 = vst.msk [vmem:[#allocation0 + $0x80] ss:$16 sm:$0x3] %vm4_vm0, %v298_v6  }
   0xa   :  { %87 = vrot.lane.b32.xlu1 %v300_v3, %s354_s15  ;;  %78 = vrot.lane.b32.xlu0 %v42_v1, %s354_s15  ;;  %26 = vst.msk [vmem:[#allocation0 + $0x80] ss:$16 sm:$0xc] %vm4_vm0, %v298_v6   ;;  %28 = vst.msk [vmem:[#allocation0 + $0x80] ss:$16 sm:$0x30] %vm4_vm0, %v298_v6  }
   0xb   :  { %30 = vst.msk [vmem:[#allocation0 + $0x80] ss:$16 sm:$0xc0] %vm4_vm0, %v298_v6   ;;  %35 = vst.msk [vmem:[#allocation0 + $0x88] ss:$16 sm:$0x3] %vm4_vm0, %v299_v7  }
   0xc   :  { %37 = vst.msk [vmem:[#allocation0 + $0x88] ss:$16 sm:$0xc] %vm4_vm0, %v299_v7   ;;  %39 = vst.msk [vmem:[#allocation0 + $0x88] ss:$16 sm:$0x30] %vm4_vm0, %v299_v7  }
   0xd   :  { %41 = vst.msk [vmem:[#allocation0 + $0x88] ss:$16 sm:$0xc0] %vm4_vm0, %v299_v7   ;;  %s360_s28 = smov [#allocation0]  }
   0xe   :  { %105 = vrot.lane.b32.xlu1 %v302_v2, %s354_s15  ;;  %96 = vrot.lane.b32.xlu0 %v301_v0, %s354_s15  ;;  %s291_s29 = sshll.u32 %s360_s28, 4  ;;  %s292_s29 = int_to_ptr.vmem [resolvable:$true] %s291_s29 }
   0xf   :  { %s329_s30 = scalar_lea.vmem %s292_s29, 4096  ;;  %p334_p1 = scmp.lt.s32.totalorder %s292_s29, %s292_s29 }
  0x10   :  { %p330_p0 = scmp.ne.s32.totalorder %s292_s29, %s329_s30  ;;  %p335_p2 = scmp.lt.s32.totalorder %s329_s30, %s329_s30 }
  0x12   :  { %122 = vrot.lane.b32.xlu1 %v300_v3, %s355_s16  ;;  %113 = vrot.lane.b32.xlu0 %v42_v1, %s355_s16  ;;  %p336_p3 = por %p335_p2, %p334_p1 }
  0x14   :  { %p337_p4 = pnand %p336_p3, %p330_p0 }
  0x16   :  { %140 = vrot.lane.b32.xlu1 %v302_v2, %s355_s16  ;;  %131 = vrot.lane.b32.xlu0 %v301_v0, %s355_s16 }
  0x1a   :  { %157 = vrot.lane.b32.xlu1 %v300_v3, %s356_s17  ;;  %148 = vrot.lane.b32.xlu0 %v42_v1, %s356_s17 }
  0x1e   :  { %175 = vrot.lane.b32.xlu1 %v302_v2, %s356_s17  ;;  %166 = vrot.lane.b32.xlu0 %v301_v0, %s356_s17 }
  0x22   :  { %192 = vrot.lane.b32.xlu1 %v300_v3, %s357_s18  ;;  %183 = vrot.lane.b32.xlu0 %v42_v1, %s357_s18 }
  0x26   :  { %210 = vrot.lane.b32.xlu1 %v302_v2, %s357_s18  ;;  %201 = vrot.lane.b32.xlu0 %v301_v0, %s357_s18 }
  0x2a   :  { %227 = vrot.lane.b32.xlu1 %v300_v3, %s358_s25  ;;  %218 = vrot.lane.b32.xlu0 %v42_v1, %s358_s25 }
  0x2e   :  { %245 = vrot.lane.b32.xlu1 %v302_v2, %s358_s25  ;;  %236 = vrot.lane.b32.xlu0 %v301_v0, %s358_s25 }
  0x32   :  { %262 = vrot.lane.b32.xlu1 %v300_v3, %s359_s0  ;;  %253 = vrot.lane.b32.xlu0 %v42_v1, %s359_s0 }
  0x36   :  { %280 = vrot.lane.b32.xlu1 %v302_v2, %s359_s0  ;;  %271 = vrot.lane.b32.xlu0 %v301_v0, %s359_s0 }
  0x74   :  { %v62_v8 = vpop.permute.xlu1 %61   ;;  %v44_v9 = vpop.permute.xlu0 %43  }
  0x75   :  { %65 = vst.msk [vmem:[#allocation0 + $0x81] ss:$8 sm:$0xf] %vm4_vm0, %v62_v8   ;;  %67 = vst.msk [vmem:[#allocation0 + $0x81] ss:$8 sm:$0xf0] %vm4_vm0, %v62_v8  }
  0x76   :  { %47 = vst.msk [vmem:[#allocation0 + $0x1] ss:$8 sm:$0xf] %vm4_vm0, %v44_v9   ;;  %49 = vst.msk [vmem:[#allocation0 + $0x1] ss:$8 sm:$0xf0] %vm4_vm0, %v44_v9  }
  0x78   :  { %v71_v10 = vpop.permute.xlu1 %70   ;;  %v53_v11 = vpop.permute.xlu0 %52  }
  0x79   :  { %74 = vst.msk [vmem:[#allocation0 + $0xc1] ss:$8 sm:$0xf] %vm4_vm0, %v71_v10   ;;  %76 = vst.msk [vmem:[#allocation0 + $0xc1] ss:$8 sm:$0xf0] %vm4_vm0, %v71_v10  }
  0x7a   :  { %56 = vst.msk [vmem:[#allocation0 + $0x41] ss:$8 sm:$0xf] %vm4_vm0, %v53_v11   ;;  %58 = vst.msk [vmem:[#allocation0 + $0x41] ss:$8 sm:$0xf0] %vm4_vm0, %v53_v11  }
  0x7c   :  { %v88_v12 = vpop.permute.xlu1 %87   ;;  %v79_v13 = vpop.permute.xlu0 %78  }
  0x7d   :  { %91 = vst.msk [vmem:[#allocation0 + $0x42] ss:$8 sm:$0xf] %vm4_vm0, %v88_v12   ;;  %93 = vst.msk [vmem:[#allocation0 + $0x42] ss:$8 sm:$0xf0] %vm4_vm0, %v88_v12  }
  0x7e   :  { %82 = vst.msk [vmem:[#allocation0 + $0x2] ss:$8 sm:$0xf] %vm4_vm0, %v79_v13   ;;  %84 = vst.msk [vmem:[#allocation0 + $0x2] ss:$8 sm:$0xf0] %vm4_vm0, %v79_v13  }
  0x80   :  { %v106_v14 = vpop.permute.xlu1 %105   ;;  %v97_v15 = vpop.permute.xlu0 %96  }
  0x81   :  { %109 = vst.msk [vmem:[#allocation0 + $0xc2] ss:$8 sm:$0xf] %vm4_vm0, %v106_v14   ;;  %111 = vst.msk [vmem:[#allocation0 + $0xc2] ss:$8 sm:$0xf0] %vm4_vm0, %v106_v14  }
  0x82   :  { %100 = vst.msk [vmem:[#allocation0 + $0x82] ss:$8 sm:$0xf] %vm4_vm0, %v97_v15   ;;  %102 = vst.msk [vmem:[#allocation0 + $0x82] ss:$8 sm:$0xf0] %vm4_vm0, %v97_v15  }
  0x84   :  { %v123_v16 = vpop.permute.xlu1 %122   ;;  %v114_v17 = vpop.permute.xlu0 %113  }
  0x85   :  { %126 = vst.msk [vmem:[#allocation0 + $0x43] ss:$8 sm:$0xf] %vm4_vm0, %v123_v16   ;;  %128 = vst.msk [vmem:[#allocation0 + $0x43] ss:$8 sm:$0xf0] %vm4_vm0, %v123_v16  }
  0x86   :  { %117 = vst.msk [vmem:[#allocation0 + $0x3] ss:$8 sm:$0xf] %vm4_vm0, %v114_v17   ;;  %119 = vst.msk [vmem:[#allocation0 + $0x3] ss:$8 sm:$0xf0] %vm4_vm0, %v114_v17  }
  0x88   :  { %v141_v18 = vpop.permute.xlu1 %140   ;;  %v132_v19 = vpop.permute.xlu0 %131  }
  0x89   :  { %144 = vst.msk [vmem:[#allocation0 + $0xc3] ss:$8 sm:$0xf] %vm4_vm0, %v141_v18   ;;  %146 = vst.msk [vmem:[#allocation0 + $0xc3] ss:$8 sm:$0xf0] %vm4_vm0, %v141_v18  }
  0x8a   :  { %135 = vst.msk [vmem:[#allocation0 + $0x83] ss:$8 sm:$0xf] %vm4_vm0, %v132_v19   ;;  %137 = vst.msk [vmem:[#allocation0 + $0x83] ss:$8 sm:$0xf0] %vm4_vm0, %v132_v19  }
  0x8c   :  { %v158_v20 = vpop.permute.xlu1 %157   ;;  %v149_v21 = vpop.permute.xlu0 %148  }
  0x8d   :  { %161 = vst.msk [vmem:[#allocation0 + $0x44] ss:$8 sm:$0xf] %vm4_vm0, %v158_v20   ;;  %163 = vst.msk [vmem:[#allocation0 + $0x44] ss:$8 sm:$0xf0] %vm4_vm0, %v158_v20  }
  0x8e   :  { %152 = vst.msk [vmem:[#allocation0 + $0x4] ss:$8 sm:$0xf] %vm4_vm0, %v149_v21   ;;  %154 = vst.msk [vmem:[#allocation0 + $0x4] ss:$8 sm:$0xf0] %vm4_vm0, %v149_v21  }
  0x90   :  { %v176_v22 = vpop.permute.xlu1 %175   ;;  %v167_v23 = vpop.permute.xlu0 %166  }
  0x91   :  { %179 = vst.msk [vmem:[#allocation0 + $0xc4] ss:$8 sm:$0xf] %vm4_vm0, %v176_v22   ;;  %181 = vst.msk [vmem:[#allocation0 + $0xc4] ss:$8 sm:$0xf0] %vm4_vm0, %v176_v22  }
  0x92   :  { %170 = vst.msk [vmem:[#allocation0 + $0x84] ss:$8 sm:$0xf] %vm4_vm0, %v167_v23   ;;  %172 = vst.msk [vmem:[#allocation0 + $0x84] ss:$8 sm:$0xf0] %vm4_vm0, %v167_v23  }
  0x94   :  { %v193_v24 = vpop.permute.xlu1 %192   ;;  %v184_v25 = vpop.permute.xlu0 %183  }
  0x95   :  { %196 = vst.msk [vmem:[#allocation0 + $0x45] ss:$8 sm:$0xf] %vm4_vm0, %v193_v24   ;;  %198 = vst.msk [vmem:[#allocation0 + $0x45] ss:$8 sm:$0xf0] %vm4_vm0, %v193_v24  }
  0x96   :  { %187 = vst.msk [vmem:[#allocation0 + $0x5] ss:$8 sm:$0xf] %vm4_vm0, %v184_v25   ;;  %189 = vst.msk [vmem:[#allocation0 + $0x5] ss:$8 sm:$0xf0] %vm4_vm0, %v184_v25  }
  0x98   :  { %v211_v26 = vpop.permute.xlu1 %210   ;;  %v202_v27 = vpop.permute.xlu0 %201  }
  0x99   :  { %214 = vst.msk [vmem:[#allocation0 + $0xc5] ss:$8 sm:$0xf] %vm4_vm0, %v211_v26   ;;  %216 = vst.msk [vmem:[#allocation0 + $0xc5] ss:$8 sm:$0xf0] %vm4_vm0, %v211_v26  }
  0x9a   :  { %205 = vst.msk [vmem:[#allocation0 + $0x85] ss:$8 sm:$0xf] %vm4_vm0, %v202_v27   ;;  %207 = vst.msk [vmem:[#allocation0 + $0x85] ss:$8 sm:$0xf0] %vm4_vm0, %v202_v27  }
  0x9c   :  { %v228_v28 = vpop.permute.xlu1 %227   ;;  %v219_v29 = vpop.permute.xlu0 %218  }
  0x9d   :  { %231 = vst.msk [vmem:[#allocation0 + $0x46] ss:$8 sm:$0xf] %vm4_vm0, %v228_v28   ;;  %233 = vst.msk [vmem:[#allocation0 + $0x46] ss:$8 sm:$0xf0] %vm4_vm0, %v228_v28  }
  0x9e   :  { %222 = vst.msk [vmem:[#allocation0 + $0x6] ss:$8 sm:$0xf] %vm4_vm0, %v219_v29   ;;  %224 = vst.msk [vmem:[#allocation0 + $0x6] ss:$8 sm:$0xf0] %vm4_vm0, %v219_v29  }
  0xa0   :  { %v246_v30 = vpop.permute.xlu1 %245   ;;  %v237_v31 = vpop.permute.xlu0 %236  }
  0xa1   :  { %249 = vst.msk [vmem:[#allocation0 + $0xc6] ss:$8 sm:$0xf] %vm4_vm0, %v246_v30   ;;  %251 = vst.msk [vmem:[#allocation0 + $0xc6] ss:$8 sm:$0xf0] %vm4_vm0, %v246_v30  }
  0xa2   :  { %240 = vst.msk [vmem:[#allocation0 + $0x86] ss:$8 sm:$0xf] %vm4_vm0, %v237_v31   ;;  %242 = vst.msk [vmem:[#allocation0 + $0x86] ss:$8 sm:$0xf0] %vm4_vm0, %v237_v31  }
  0xa4   :  { %v263_v32 = vpop.permute.xlu1 %262   ;;  %v254_v33 = vpop.permute.xlu0 %253  }
  0xa5   :  { %266 = vst.msk [vmem:[#allocation0 + $0x47] ss:$8 sm:$0xf] %vm4_vm0, %v263_v32   ;;  %268 = vst.msk [vmem:[#allocation0 + $0x47] ss:$8 sm:$0xf0] %vm4_vm0, %v263_v32  }
  0xa6   :  { %257 = vst.msk [vmem:[#allocation0 + $0x7] ss:$8 sm:$0xf] %vm4_vm0, %v254_v33   ;;  %259 = vst.msk [vmem:[#allocation0 + $0x7] ss:$8 sm:$0xf0] %vm4_vm0, %v254_v33  }
  0xa8   :  { %v281_v34 = vpop.permute.xlu1 %280   ;;  %v272_v35 = vpop.permute.xlu0 %271  }
  0xa9   :  { %284 = vst.msk [vmem:[#allocation0 + $0xc7] ss:$8 sm:$0xf] %vm4_vm0, %v281_v34   ;;  %286 = vst.msk [vmem:[#allocation0 + $0xc7] ss:$8 sm:$0xf0] %vm4_vm0, %v281_v34  }
  0xaa   :  { %275 = vst.msk [vmem:[#allocation0 + $0x87] ss:$8 sm:$0xf] %vm4_vm0, %v272_v35   ;;  %277 = vst.msk [vmem:[#allocation0 + $0x87] ss:$8 sm:$0xf0] %vm4_vm0, %v272_v35  }
  0xab   :  { %340 = shalt.err (!%p337_p4)
}
  0xac   :  { %s341_s4 = scalar_lea.hbm %s480_s1, 4096 }
  0xad   :  { %p342_p5 = scmp.ne.s32.totalorder %s480_s1, %s341_s4  ;;  %p345_p6 = scmp.lt.u32.totalorder %s341_s4, %s480_s1 }
  0xaf   :  { %p347_p7 = pnand %p345_p6, %p342_p5 }
  0xb1   :  { %350 = shalt.err (!%p347_p7)
}
  0xb2   :  { %294 = dma.vmem_to_hbm [thread:$0]  %s292_s29, 4096, %s480_s1, [#allocation1]  }
  0xb3   :  { %351 = dma.done.wait [#allocation1], 4096  }
  0xb4   :  { %352 = vsyncadd [#allocation1], 4294963200 }
  0xb5   :  { %296 = vsyncpa [#allocation1], 1 }

// kernel: fka_forward.3
= control target key start
LH: loop header
LB: loop body
LE: loop exit
PB: predicated region body
PF: predicated region fallthrough
CT: control target
= control target key end

     0   :  { %s1541_s15 = smov 0   ;;  %s2005_s0 = inlined_call_operand.vmem [shape: bf16[2,256], index: 0, kind: input, shape index: {}]   ;;  %s2006_s1 = inlined_call_operand.vmem [shape: bf16[2,2,16,256], index: 1, kind: input, shape index: {}]   ;;  %s2007_s2 = inlined_call_operand.vmem [shape: bf16[2,16,144], index: 2, kind: input, shape index: {}]   ;;  %s2008_s3 = inlined_call_operand.vmem [shape: bf16[2,8,144], index: 3, kind: input, shape index: {}]   ;;  %s2009_s4 = inlined_call_operand.vmem [shape: f32[2,2,8,256], index: 4, kind: output, shape index: {}]  }
   0x1 LB: > { %s1413_s16 = sadd.s32 4294967295, %s1504_s15   ;;  %p1417_p0 = scmp.ge.s32.totalorder %s1504_s15, 1  ;;  %s1504_s15 = sphi %s1541_s15, %s14_s15  }
   0x2   : > { %p182_p1 = scmp.lt.s32.totalorder %s1504_s15, 3 }
   0x4   : > { %p183_p2 = pnand %p1417_p0, %p182_p1 }
   0x5   : > { %v1428_v0 = vld.sshfl [vmem:[%s2005_s0] sm:$0x11 pattern:$0x75316420] (!%p183_p2)  ;;  %v271_v1 = vlaneseq (!%p183_p2)  ;;  %v1506_v2 = vmov (!%p183_p2), 1966171168  }
   0x6   : > { %186 = sbr.rel (%p183_p2) target bundleno = 959 (0x3bf), region = 36  ;;  %v269_v3 = vunpack.c.l.s4 (!%p183_p2), %v1506_v2  ;;  %v267_v6 = vcombine.high (!%p183_p2), %v1428_v0, %v1428_v0  ;;  %p218_p3 = scmp.lt.s32.totalorder (!%p183_p2), %s1413_s16, 1  ;;  %v1514_v25 = vmov (!%p183_p2), 0   ;;  %vm399_vm0 = vcmask (!%p183_p2), 1039360  }
   0x7   : > { %v272_v4 = vshrl.u32 (!%p183_p2), %v271_v1, 7  ;;  %s1507_s23 = smov (!%p183_p2), 111   ;;  %s1508_s24 = smov (!%p183_p2), 127   ;;  %vm302_vm1 = vcmask (!%p183_p2), 908288   ;;  %vm385_vm2 = vcmask (!%p183_p2), 121856   ;;  %vm368_vm3 = vcmask (!%p183_p2), 924672  }
   0x8   : > { %v270_v5 = vunpack.c.0.s8 (!%p183_p2), %v269_v3  ;;  %s1509_s25 = smov (!%p183_p2), 113   ;;  %s1510_s26 = smov (!%p183_p2), 1   ;;  %vm416_vm4 = vcmask (!%p183_p2), 7168   ;;  %vm319_vm5 = vcmask (!%p183_p2), 138240   ;;  %vm338_vm6 = vcmask (!%p183_p2), 130048  }
   0x9   : > { %v287_v9 = vsub.s32 (!%p183_p2), 0, %v272_v4  ;;  %s1511_s27 = smov (!%p183_p2), 15   ;;  %s1512_s28 = smov (!%p183_p2), 17   ;;  %vm497_vm7 = vcmask (!%p183_p2), 916480  }
   0xa   : > { %v273_v7 = vsub.s32 (!%p183_p2), %v270_v5, %v272_v4  ;;  %s1513_s29 = smov (!%p183_p2), 16   ;;  %s1515_s30 = smov (!%p183_p2), 112  }
   0xc   : > { %v274_v8 = vrot.slane (!%p183_p2), %v1428_v0, %v273_v7  ;;  %v281_v10 = vrot.slane (!%p183_p2), %v267_v6, %v273_v7 }
   0xd   : > { %s2011_s16 = smov (!%p218_p3, %s1413_s16), 1 }
   0xe   : > { %s1445_s19 = sshll.u32 %s2011_s16, 5  ;;  %v283_v11 = vpack.i.b16 %v274_v8, %v274_v8  ;;  %v290_v12 = vpack.i.b16 %v281_v10, %v281_v10  ;;  %v348_v13 = vshrl.u32 %v274_v8, 16  ;;  %v355_v14 = vshrl.u32 %v281_v10, 16  ;;  %s1446_s5 = sshll.u32 %s2011_s16, 4 }
   0xf   : > { %s1560_s22 = scalar_lea.vmem %s2006_s1, %s1445_s19  ;;  %s1725_s8 = scalar_lea.vmem %s2007_s2, %s1446_s5 }
  0x10   : > { %v288_v15 = vrot.slane %v283_v11, %v287_v9  ;;  %v295_v16 = vrot.slane %v290_v12, %v287_v9  ;;  %v349_v17 = vpack.i.b16 %v348_v13, %v348_v13  ;;  %v356_v19 = vpack.i.b16 %v355_v14, %v355_v14  ;;  %v1575_v21 = vld [vmem:[%s1560_s22] ss:$8 sps:$4 sm:$0xff]   ;;  %v1578_v22 = vld [vmem:[%s1560_s22 + $0x4] ss:$8 sps:$4 sm:$0xff]   ;;  %v1583_v23 = vld [vmem:[%s1560_s22 + $0x10] ss:$8 sps:$4 sm:$0xff]   ;;  %s237_s17 = scalar_lea.vmem %s2009_s4, %s1445_s19 }
  0x11   : > { %v1588_v24 = vld [vmem:[%s1560_s22 + $0x14] ss:$8 sps:$4 sm:$0xff]   ;;  %v1495_v6 = vld [vmem:[%s1725_s8 + $0x4] ss:$8 sps:$4 sm:$0xff]   ;;  %s1447_s9 = sshll.u32 %s2011_s16, 3 }
  0x12   : > { %298 = vrot.lane.b32.xlu0 %v288_v15, %s1507_s23  ;;  %397 = vrot.lane.b32.xlu1 %v295_v16, %s1508_s24  ;;  %v354_v18 = vrot.slane %v349_v17, %v287_v9  ;;  %v361_v20 = vrot.slane %v356_v19, %v287_v9  ;;  %s232_s12 = scalar_lea.vmem %s2008_s3, %s1447_s9 }
  0x13   : > { %1435 = vmatprep.mubr.msk.bf16.mxu0 %vm338_vm6, %v1495_v6  ;;  %1436 = vmatprep.mubr.msk.bf16.mxu1 %vm338_vm6, %v1495_v6 }
  0x16   : > { %364 = vrot.lane.b32.xlu1 %v354_v18, %s1509_s25  ;;  %300 = vrot.lane.b32.xlu0 %v295_v16, %s1507_s23 }
  0x1a   : > { %366 = vrot.lane.b32.xlu1 %v361_v20, %s1509_s25  ;;  %395 = vrot.lane.b32.xlu0 %v288_v15, %s1508_s24 }
  0x1e   : > { %432 = vrot.lane.b32.xlu1 %v361_v20, %s1510_s26  ;;  %430 = vrot.lane.b32.xlu0 %v354_v18, %s1510_s26 }
  0x22   : > { %461 = vrot.lane.b32.xlu1 %v295_v16, %s1511_s27  ;;  %459 = vrot.lane.b32.xlu0 %v288_v15, %s1511_s27 }
  0x26   : > { %509 = vrot.lane.b32.xlu1 %v361_v20, %s1512_s28  ;;  %507 = vrot.lane.b32.xlu0 %v354_v18, %s1512_s28 }
  0x2a   : > { %334 = vrot.lane.b32.xlu0 %v1575_v21, %s1513_s29  ;;  %336 = vrot.lane.b32.xlu1 %v1578_v22, %s1513_s29 }
  0x2e   : > { %577 = vrot.lane.b32.xlu0 %v1583_v23, %s1513_s29  ;;  %579 = vrot.lane.b32.xlu1 %v1588_v24, %s1513_s29 }
  0x32   : > { %1468 = vrot.lane.b32.xlu0 %v1514_v25, %s1513_s29  ;;  %493 = vrot.lane.b32.xlu1 %v1578_v22, %s1515_s30 }
  0x36   : > { %1473 = vrot.lane.b32.xlu0 %v1514_v25, %s1515_s30 }
  0x84   : > { %v299_v26 = vpop.permute.xlu0 %298  ;;  %v1600_v27 = vpop.permute.xlu1 %397 }
  0x85   : > { %v1602_v28 = vmul.bf16 0, %v299_v26  ;;  %v406_v29 = vmul.bf16 %v1578_v22, %v1600_v27  ;;  %v613_v36 = vmul.bf16 %v1588_v24, %v1600_v27 }
  0x87   : > { %313 = vrot.lane.b32.xlu0 %v1602_v28, %s1512_s28 }
  0x88   : > { %v365_v30 = vpop.permute.xlu1 %364  ;;  %v1608_v31 = vpop.permute.xlu0 %300 }
  0x89   : > { %v309_v32 = vmul.bf16 %v1578_v22, %v1608_v31  ;;  %v553_v35 = vmul.bf16 %v1588_v24, %v1608_v31  ;;  %v1653_v47 = vsel %vm302_vm1, %v299_v26, %v1608_v31  ;;  %v373_v55 = vmul.bf16 0, %v365_v30 }
  0x8a   : > { %v308_v49 = vmul.bf16 %v1575_v21, %v1653_v47  ;;  %v552_v52 = vmul.bf16 %v1583_v23, %v1653_v47 }
  0x8b   : > { %317 = vrot.lane.b32.xlu1 %v309_v32, %s1512_s28  ;;  %414 = vrot.lane.b32.xlu0 %v406_v29, %s1510_s26 }
  0x8c   : > { %v1614_v33 = vpop.permute.xlu1 %366  ;;  %v396_v34 = vpop.permute.xlu0 %395 }
  0x8d   : > { %v1620_v37 = vmul.bf16 0, %v396_v34  ;;  %v1642_v44 = vsel %vm399_vm0, %v396_v34, %v1600_v27  ;;  %v375_v54 = vmul.bf16 %v1578_v22, %v1614_v33  ;;  %v592_v56 = vmul.bf16 %v1588_v24, %v1614_v33 }
  0x8e   : > { %v405_v46 = vmul.bf16 %v1575_v21, %v1642_v44  ;;  %v612_v48 = vmul.bf16 %v1583_v23, %v1642_v44  ;;  %v1687_v58 = vsel %vm368_vm3, %v365_v30, %v1614_v33 }
  0x8f   : > { %561 = vrot.lane.b32.xlu1 %v553_v35, %s1512_s28  ;;  %621 = vrot.lane.b32.xlu0 %v613_v36, %s1510_s26  ;;  %v374_v60 = vmul.bf16 %v1575_v21, %v1687_v58  ;;  %v591_v61 = vmul.bf16 %v1583_v23, %v1687_v58 }
  0x90   : > { %v433_v38 = vpop.permute.xlu1 %432  ;;  %v1624_v39 = vpop.permute.xlu0 %430 }
  0x91   : > { %v438_v57 = vmul.bf16 %v1575_v21, %v1624_v39  ;;  %v440_v59 = vmul.bf16 0, %v433_v38  ;;  %v636_v62 = vmul.bf16 %v1583_v23, %v1624_v39  ;;  %v1705_v1 = vsel %vm416_vm4, %v1624_v39, %v433_v38 }
  0x92   : > { %v439_v3 = vmul.bf16 %v1578_v22, %v1705_v1  ;;  %v637_v5 = vmul.bf16 %v1588_v24, %v1705_v1 }
  0x93   : > { %557 = vrot.lane.b32.xlu1 %v1602_v28, %s1512_s28  ;;  %617 = vrot.lane.b32.xlu0 %v1620_v37, %s1510_s26 }
  0x94   : > { %v462_v40 = vpop.permute.xlu1 %461  ;;  %v1630_v41 = vpop.permute.xlu0 %459 }
  0x95   : > { %v1632_v42 = vmul.bf16 0, %v462_v40  ;;  %v467_v43 = vmul.bf16 %v1575_v21, %v1630_v41  ;;  %v657_v45 = vmul.bf16 %v1583_v23, %v1630_v41  ;;  %v1663_v50 = vsel %vm385_vm2, %v1630_v41, %v462_v40 }
  0x96   : > { %v468_v51 = vmul.bf16 %v1578_v22, %v1663_v50  ;;  %v658_v53 = vmul.bf16 %v1588_v24, %v1663_v50 }
  0x97   : > { %410 = vrot.lane.b32.xlu1 %v1620_v37, %s1510_s26  ;;  %477 = vrot.lane.b32.xlu0 %v1632_v42, %s1509_s25 }
  0x98   : > { %v510_v63 = vpop.permute.xlu1 %509  ;;  %v1701_v0 = vpop.permute.xlu0 %507 }
  0x99   : > { %v1712_v2 = vsel %vm319_vm5, %v1701_v0, %v510_v63  ;;  %v1739_v8 = vmul.bf16 0, %v510_v63  ;;  %v515_v9 = vmul.bf16 %v1575_v21, %v1701_v0  ;;  %v696_v10 = vmul.bf16 %v1583_v23, %v1701_v0 }
  0x9a   : > { %v516_v4 = vmul.bf16 %v1578_v22, %v1712_v2  ;;  %v697_v7 = vmul.bf16 %v1588_v24, %v1712_v2 }
  0x9b   : > { %667 = vrot.lane.b32.xlu0 %v1632_v42, %s1509_s25  ;;  %473 = vrot.lane.b32.xlu1 %v467_v43, %s1509_s25 }
  0x9c   : > { %v335_v11 = vpop.permute.xlu0 %334  ;;  %v337_v13 = vpop.permute.xlu1 %336 }
  0x9f   : > { %663 = vrot.lane.b32.xlu0 %v657_v45, %s1509_s25  ;;  %412 = vrot.lane.b32.xlu1 %v405_v46, %s1510_s26 }
  0xa0   : > { %v578_v12 = vpop.permute.xlu0 %577  ;;  %v580_v15 = vpop.permute.xlu1 %579 }
  0xa3   : > { %619 = vrot.lane.b32.xlu1 %v612_v48, %s1510_s26  ;;  %315 = vrot.lane.b32.xlu0 %v308_v49, %s1512_s28  ;;  %v340_v48 = vsel %vm338_vm6, %v335_v11, %v337_v13 }
  0xa4   : > { %v1469_v14 = vpop.permute.xlu0 %1468  ;;  %v1771_v17 = vpop.permute.xlu1 %493 }
  0xa5   : > { %v1470_v46 = vunpack.i.l.bf16 %v1469_v14 }
  0xa7   : > { %475 = vrot.lane.b32.xlu1 %v468_v51, %s1509_s25  ;;  %559 = vrot.lane.b32.xlu0 %v552_v52, %s1512_s28 }
  0xa8   : > { %v1769_v16 = vpop.permute.xlu0 %1473 }
  0xab   : > { %665 = vrot.lane.b32.xlu1 %v658_v53, %s1509_s25  ;;  %383 = vrot.lane.b32.xlu0 %v375_v54, %s1511_s27  ;;  %v1471_v54 = vunpack.i.h.bf16 %v1469_v14 }
  0xaf   : > { %379 = vrot.lane.b32.xlu1 %v373_v55, %s1511_s27  ;;  %600 = vrot.lane.b32.xlu0 %v592_v56, %s1511_s27  ;;  %v582_v56 = vsel %vm338_vm6, %v578_v12, %v580_v15 }
  0xb3   : > { %444 = vrot.lane.b32.xlu1 %v438_v57, %s1508_s24  ;;  %596 = vrot.lane.b32.xlu0 %v373_v55, %s1511_s27 }
  0xb7   : > { %381 = vrot.lane.b32.xlu1 %v374_v60, %s1511_s27  ;;  %448 = vrot.lane.b32.xlu0 %v440_v59, %s1508_s24  ;;  %v581_v60 = vsel %vm338_vm6, %v1471_v54, %v578_v12  ;;  %v1493_v54 = vld [vmem:[%s1725_s8] ss:$8 sps:$4 sm:$0xff]  }
  0xbb   : > { %598 = vrot.lane.b32.xlu1 %v591_v61, %s1511_s27  ;;  %646 = vrot.lane.b32.xlu0 %v440_v59, %s1508_s24 }
  0xbf   : > { %683 = vrot.lane.b32.xlu1 %v1588_v24, %s1515_s30  ;;  %642 = vrot.lane.b32.xlu0 %v636_v62, %s1508_s24 }
  0xc3   : > { %446 = vrot.lane.b32.xlu1 %v439_v3, %s1508_s24  ;;  %491 = vrot.lane.b32.xlu0 %v1575_v21, %s1515_s30 }
  0xc7   : > { %644 = vrot.lane.b32.xlu1 %v637_v5, %s1508_s24  ;;  %523 = vrot.lane.b32.xlu0 %v516_v4, %s1507_s23 }
  0xcb   : > { %681 = vrot.lane.b32.xlu1 %v1583_v23, %s1515_s30  ;;  %704 = vrot.lane.b32.xlu0 %v697_v7, %s1507_s23 }
  0xcf   : > { %525 = vrot.lane.b32.xlu1 %v1739_v8, %s1507_s23  ;;  %521 = vrot.lane.b32.xlu0 %v515_v9, %s1507_s23 }
  0xd3   : > { %706 = vrot.lane.b32.xlu1 %v1739_v8, %s1507_s23  ;;  %876 = vrot.lane.b32.xlu0 %v1602_v28, %s1512_s28 }
  0xd7   : > { %702 = vrot.lane.b32.xlu1 %v696_v10, %s1507_s23  ;;  %1478 = vrot.lane.b32.xlu0 %v1514_v25, %s1513_s29 }
  0xdb   : > { %1044 = vrot.lane.b32.xlu1 %v1602_v28, %s1512_s28  ;;  %1083 = vrot.lane.b32.xlu0 %v373_v55, %s1511_s27 }
  0xdf   : > { %915 = vrot.lane.b32.xlu1 %v373_v55, %s1511_s27  ;;  %1104 = vrot.lane.b32.xlu0 %v1620_v37, %s1510_s26  ;;  %v339_v55 = vsel %vm338_vm6, %v1470_v46, %v335_v11  ;;  %v1476_v46 = vunpack.i.h.bf16 %v1769_v16 }
  0xe3   : > { %936 = vrot.lane.b32.xlu1 %v1620_v37, %s1510_s26  ;;  %965 = vrot.lane.b32.xlu0 %v440_v59, %s1508_s24 }
  0xe7   : > { %1133 = vrot.lane.b32.xlu0 %v440_v59, %s1508_s24 }
  0xeb   : > { %986 = vrot.lane.b32.xlu0 %v1632_v42, %s1509_s25 }
  0xef   : > { %1154 = vrot.lane.b32.xlu0 %v1632_v42, %s1509_s25 }
  0xf9   : > { %v314_v18 = vpop.permute.xlu0 %313 }
  0xfd   : > { %v318_v19 = vpop.permute.xlu1 %317  ;;  %v415_v20 = vpop.permute.xlu0 %414 }
 0x101   : > { %v562_v26 = vpop.permute.xlu1 %561  ;;  %v622_v28 = vpop.permute.xlu0 %621 }
 0x105   : > { %v558_v29 = vpop.permute.xlu1 %557  ;;  %v618_v30 = vpop.permute.xlu0 %617 }
 0x109   : > { %v411_v32 = vpop.permute.xlu1 %410  ;;  %v1773_v34 = vpop.permute.xlu0 %477 }
 0x10d   : > { %v1775_v35 = vpop.permute.xlu0 %667  ;;  %v1777_v36 = vpop.permute.xlu1 %473 }
 0x111   : > { %v1779_v37 = vpop.permute.xlu0 %663  ;;  %v413_v38 = vpop.permute.xlu1 %412 }
 0x112   : > { %v418_v9 = vsel %vm416_vm4, %v413_v38, %v415_v20  ;;  %v417_v14 = vsel %vm416_vm4, %v411_v32, %v413_v38 }
 0x115   : > { %v620_v40 = vpop.permute.xlu1 %619  ;;  %v316_v42 = vpop.permute.xlu0 %315 }
 0x116   : > { %v321_v43 = vsel %vm319_vm5, %v316_v42, %v318_v19  ;;  %v320_v45 = vsel %vm319_vm5, %v314_v18, %v316_v42  ;;  %v624_v15 = vsel %vm416_vm4, %v620_v40, %v622_v28  ;;  %v623_v20 = vsel %vm416_vm4, %v618_v30, %v620_v40 }
 0x117   : > { %765 = vmatprep.subr.bf16.mxu0 %v321_v43  ;;  %v1475_v28 = vunpack.i.l.bf16 %v1769_v16 }
 0x118   : > { %766 = vmatpush1.bf16.msra.mxu0 %v320_v45 }
 0x119   : > { %v476_v49 = vpop.permute.xlu1 %475  ;;  %767 = vmatprep.subr.bf16.mxu0 %v340_v48  ;;  %v560_v51 = vpop.permute.xlu0 %559 }
 0x11a   : > { %v564_v52 = vsel %vm319_vm5, %v560_v51, %v562_v26  ;;  %v563_v53 = vsel %vm319_vm5, %v558_v29, %v560_v51  ;;  %v479_v42 = vsel %vm368_vm3, %v1777_v36, %v476_v49 }
 0x11b   : > { %808 = vmatprep.subr.bf16.mxu1 %v564_v52 }
 0x11c   : > { %768 = vmatpush1.bf16.msra.mxu0 %v339_v55  ;;  %809 = vmatpush1.bf16.msra.mxu1 %v563_v53 }
 0x11d   : > { %v666_v57 = vpop.permute.xlu1 %665  ;;  %810 = vmatprep.subr.bf16.mxu1 %v582_v56  ;;  %v384_v59 = vpop.permute.xlu0 %383 }
 0x11e   : > { %v669_v36 = vsel %vm368_vm3, %v1779_v37, %v666_v57 }
 0x120   : > { %811 = vmatpush1.bf16.msra.mxu1 %v581_v60 }
 0x121   : > { %v380_v61 = vpop.permute.xlu1 %379  ;;  %v601_v62 = vpop.permute.xlu0 %600 }
 0x125   : > { %v445_v63 = vpop.permute.xlu1 %444  ;;  %v597_v3 = vpop.permute.xlu0 %596 }
 0x129   : > { %v382_v4 = vpop.permute.xlu1 %381  ;;  %v449_v5 = vpop.permute.xlu0 %448 }
 0x12a   : > { %v387_v6 = vsel %vm385_vm2, %v382_v4, %v384_v59  ;;  %v386_v7 = vsel %vm385_vm2, %v380_v61, %v382_v4 }
 0x12b   : > { %769 = vmatprep.subr.bf16.mxu0 %v387_v6 }
 0x12c   : > { %770 = vmatpush1.bf16.msra.mxu0 %v386_v7 }
 0x12d   : > { %v599_v10 = vpop.permute.xlu1 %598  ;;  %771 = vmatprep.subr.bf16.mxu0 %v418_v9  ;;  %v647_v11 = vpop.permute.xlu0 %646 }
 0x12e   : > { %v603_v12 = vsel %vm385_vm2, %v599_v10, %v601_v62  ;;  %v602_v13 = vsel %vm385_vm2, %v597_v3, %v599_v10 }
 0x12f   : > { %812 = vmatprep.subr.bf16.mxu1 %v603_v12 }
 0x130   : > { %772 = vmatpush1.bf16.msra.mxu0 %v417_v14  ;;  %813 = vmatpush1.bf16.msra.mxu1 %v602_v13 }
 0x131   : > { %v684_v18 = vpop.permute.xlu1 %683  ;;  %814 = vmatprep.subr.bf16.mxu1 %v624_v15  ;;  %v643_v19 = vpop.permute.xlu0 %642  ;;  %773 = vmatprep.subr.bf16.mxu0 %v1578_v22  ;;  %v480_v22 = vsel %vm368_vm3, %v476_v49, %v1773_v34  ;;  %v670_v34 = vsel %vm368_vm3, %v666_v57, %v1775_v35 }
 0x132   : > { %v688_v49 = vsel %vm497_vm7, %v684_v18, %v1476_v46 }
 0x134   : > { %774 = vmatpush1.bf16.msra.mxu0 %v1575_v21  ;;  %815 = vmatpush1.bf16.msra.mxu1 %v623_v20 }
 0x135   : > { %v447_v26 = vpop.permute.xlu1 %446  ;;  %v492_v29 = vpop.permute.xlu0 %491  ;;  %816 = vmatprep.subr.bf16.mxu1 %v1588_v24 }
 0x136   : > { %v451_v32 = vsel %vm399_vm0, %v447_v26, %v449_v5  ;;  %v450_v38 = vsel %vm399_vm0, %v445_v63, %v447_v26  ;;  %v498_v48 = vsel %vm497_vm7, %v492_v29, %v1771_v17 }
 0x137   : > { %775 = vmatprep.subr.bf16.mxu0 %v451_v32 }
 0x138   : > { %776 = vmatpush1.bf16.msra.mxu0 %v450_v38  ;;  %817 = vmatpush1.bf16.msra.mxu1 %v1583_v23  ;;  %v499_v23 = vsel %vm497_vm7, %v1771_v17, %v1475_v28 }
 0x139   : > { %v645_v30 = vpop.permute.xlu1 %644  ;;  %777 = vmatprep.subr.bf16.mxu0 %v480_v22  ;;  %v524_v21 = vpop.permute.xlu0 %523 }
 0x13a   : > { %v649_v40 = vsel %vm399_vm0, %v645_v30, %v647_v11  ;;  %v648_v24 = vsel %vm399_vm0, %v643_v19, %v645_v30 }
 0x13b   : > { %818 = vmatprep.subr.bf16.mxu1 %v649_v40 }
 0x13c   : > { %778 = vmatpush1.bf16.msra.mxu0 %v479_v42  ;;  %819 = vmatpush1.bf16.msra.mxu1 %v648_v24 }
 0x13d   : > { %v682_v43 = vpop.permute.xlu1 %681  ;;  %779 = vmatprep.subr.bf16.mxu0 %v499_v23  ;;  %820 = vmatprep.subr.bf16.mxu1 %v670_v34  ;;  %v705_v45 = vpop.permute.xlu0 %704  ;;  %v1924_v34 = vld [vmem:[%s232_s12] sm:$0xff] }
 0x13e   : > { %v687_v16 = vsel %vm497_vm7, %v682_v43, %v684_v18 }
 0x140   : > { %780 = vmatpush1.bf16.msra.mxu0 %v498_v48  ;;  %821 = vmatpush1.bf16.msra.mxu1 %v669_v36 }
 0x141   : > { %v526_v51 = vpop.permute.xlu1 %525  ;;  %822 = vmatprep.subr.bf16.mxu1 %v688_v49  ;;  %v522_v35 = vpop.permute.xlu0 %521 }
 0x142   : > { %v528_v52 = vsel %vm302_vm1, %v524_v21, %v526_v51  ;;  %v527_v53 = vsel %vm302_vm1, %v522_v35, %v524_v21 }
 0x143   : > { %781 = vmatprep.subr.bf16.mxu0 %v528_v52 }
 0x144   : > { %782 = vmatpush1.bf16.msra.mxu0 %v527_v53  ;;  %823 = vmatpush1.bf16.msra.mxu1 %v687_v16 }
 0x145   : > { %v707_v17 = vpop.permute.xlu1 %706  ;;  %v877_v43 = vpop.permute.xlu0 %876 }
 0x146   : > { %v709_v37 = vsel %vm302_vm1, %v705_v45, %v707_v17 }
 0x147   : > { %798 = vmatmul.mubr.bf16.vlgmr.msra.gmra.mrb[0].mxu0 %v1493_v54  ;;  %824 = vmatprep.subr.bf16.mxu1 %v709_v37 }
 0x149   : > { %v703_v55 = vpop.permute.xlu1 %702 }
 0x14a   : > { %v708_v56 = vsel %vm302_vm1, %v703_v55, %v705_v45 }
 0x14b   : > { %825 = vmatpush1.bf16.msra.mxu1 %v708_v56 }
 0x14d   : > { %v1045_v51 = vpop.permute.xlu1 %1044 }
 0x14e   : > { %841 = vmatmul.mubr.bf16.vlgmr.msra.gmra.mrb[0].mxu1 %v1493_v54 }
 0x151   : > { %v916_v52 = vpop.permute.xlu1 %915 }
 0x21a   : > { %v799_v57 = vpop.f32.mrb[0].mxu0 }
 0x21b   : > { %v851_v59 = vmax.f32 %v799_v57, 0.0  ;;  %v801_v60 = vpop.f32.mrb[1].mxu0 }
 0x21c   : > { %v852_v61 = vmax.f32 %v801_v60, 0.0  ;;  %v803_v62 = vpop.f32.mrb[2].mxu0 }
 0x21d   : > { %v855_v63 = vmax.f32 %v803_v62, 0.0  ;;  %v805_v3 = vpop.f32.mrb[3].mxu0 }
 0x21e   : > { %v856_v4 = vmax.f32 %v805_v3, 0.0 }
 0x21f   : > { %v1826_v5 = vpack.c.bf16 %v855_v63, %v851_v59 }
 0x220   : > { %v1828_v6 = vpack.c.bf16 %v856_v4, %v852_v61 }
 0x221   : > { %v842_v7 = vpop.f32.mrb[0].mxu1  ;;  %896 = vrot.lane.b32.xlu0 %v1826_v5, %s1513_s29  ;;  %v871_v20 = vmul.bf16 %v1826_v5, %v1653_v47  ;;  %v910_v26 = vmul.bf16 %v1826_v5, %v1687_v58  ;;  %v931_v28 = vmul.bf16 %v1826_v5, %v1642_v44  ;;  %v955_v30 = vmul.bf16 %v1826_v5, %v1624_v39 }
 0x222   : > { %v844_v9 = vpop.f32.mrb[1].mxu1  ;;  %898 = vrot.lane.b32.xlu1 %v1828_v6, %s1513_s29  ;;  %v853_v11 = vmax.f32 %v842_v7, 0.0  ;;  %v932_v21 = vmul.bf16 %v1828_v6, %v1600_v27 }
 0x223   : > { %v846_v10 = vpop.f32.mrb[2].mxu1  ;;  %v854_v14 = vmax.f32 %v844_v9, 0.0 }
 0x224   : > { %v857_v12 = vmax.f32 %v846_v10, 0.0  ;;  %v848_v13 = vpop.f32.mrb[3].mxu1 }
 0x225   : > { %v858_v15 = vmax.f32 %v848_v13, 0.0 }
 0x226   : > { %v1834_v18 = vpack.c.bf16 %v857_v12, %v853_v11 }
 0x227   : > { %v1836_v19 = vpack.c.bf16 %v858_v15, %v854_v14 }
 0x228   : > { %1064 = vrot.lane.b32.xlu0 %v1834_v18, %s1513_s29  ;;  %v1039_v29 = vmul.bf16 %v1834_v18, %v1653_v47  ;;  %v1078_v32 = vmul.bf16 %v1834_v18, %v1687_v58  ;;  %v1123_v38 = vmul.bf16 %v1834_v18, %v1624_v39  ;;  %v911_v47 = vmul.bf16 %v1828_v6, %v1614_v33 }
 0x229   : > { %1066 = vrot.lane.b32.xlu1 %v1836_v19, %s1513_s29  ;;  %v1099_v58 = vmul.bf16 %v1834_v18, %v1642_v44  ;;  %v1079_v22 = vmul.bf16 %v1836_v19, %v1614_v33  ;;  %v976_v44 = vmul.bf16 %v1826_v5, %v1630_v41  ;;  %v1100_v33 = vmul.bf16 %v1836_v19, %v1600_v27 }
 0x22a   : > { %v872_v39 = vmul.bf16 %v1828_v6, %v1608_v31  ;;  %v1144_v40 = vmul.bf16 %v1834_v18, %v1630_v41  ;;  %v1040_v24 = vmul.bf16 %v1836_v19, %v1608_v31  ;;  %v1016_v27 = vmul.bf16 %v1828_v6, %v1712_v2 }
 0x22b   : > { %v956_v31 = vmul.bf16 %v1828_v6, %v1705_v1  ;;  %v1015_v41 = vmul.bf16 %v1826_v5, %v1701_v0  ;;  %v1124_v42 = vmul.bf16 %v1836_v19, %v1705_v1  ;;  %v1145_v23 = vmul.bf16 %v1836_v19, %v1663_v50 }
 0x22c   : > { %878 = vrot.lane.b32.xlu0 %v871_v20, %s1512_s28  ;;  %v1438_v1 = vcombine.high %v1924_v34, %v1924_v34  ;;  %v1183_v45 = vmul.bf16 %v1834_v18, %v1701_v0 }
 0x22d   : > { %917 = vrot.lane.b32.xlu1 %v910_v26, %s1511_s27 }
 0x22e   : > { %1439 = vmatprep.mubr.msk.bf16.mxu0 %vm338_vm6, %v1438_v1  ;;  %1440 = vmatprep.mubr.msk.bf16.mxu1 %vm338_vm6, %v1438_v1 }
 0x230   : > { %1046 = vrot.lane.b32.xlu0 %v1039_v29, %s1512_s28 }
 0x231   : > { %1085 = vrot.lane.b32.xlu1 %v1078_v32, %s1511_s27 }
 0x234   : > { %1129 = vrot.lane.b32.xlu0 %v1123_v38, %s1508_s24 }
 0x235   : > { %938 = vrot.lane.b32.xlu1 %v931_v28, %s1510_s26 }
 0x238   : > { %919 = vrot.lane.b32.xlu0 %v911_v47, %s1511_s27 }
 0x239   : > { %1106 = vrot.lane.b32.xlu1 %v1099_v58, %s1510_s26 }
 0x23c   : > { %1087 = vrot.lane.b32.xlu0 %v1079_v22, %s1511_s27 }
 0x23d   : > { %961 = vrot.lane.b32.xlu1 %v955_v30, %s1508_s24 }
 0x240   : > { %940 = vrot.lane.b32.xlu0 %v932_v21, %s1510_s26 }
 0x241   : > { %982 = vrot.lane.b32.xlu1 %v976_v44, %s1509_s25 }
 0x244   : > { %1108 = vrot.lane.b32.xlu0 %v1100_v33, %s1510_s26 }
 0x245   : > { %880 = vrot.lane.b32.xlu1 %v872_v39, %s1512_s28 }
 0x248   : > { %1150 = vrot.lane.b32.xlu0 %v1144_v40, %s1509_s25 }
 0x249   : > { %1048 = vrot.lane.b32.xlu1 %v1040_v24, %s1512_s28 }
 0x24c   : > { %1483 = vrot.lane.b32.xlu0 %v1514_v25, %s1515_s30  ;;  %v1184_v25 = vmul.bf16 %v1836_v19, %v1712_v2  ;;  %v977_v2 = vmul.bf16 %v1828_v6, %v1663_v50  ;;  %v1479_v50 = vpop.permute.xlu0 %1478 }
 0x24d   : > { %1002 = vrot.lane.b32.xlu1 %v1828_v6, %s1515_s30  ;;  %v1480_v14 = vunpack.i.l.bf16 %v1479_v50  ;;  %v1481_v47 = vunpack.i.h.bf16 %v1479_v50 }
 0x250   : > { %1000 = vrot.lane.b32.xlu0 %v1826_v5, %s1515_s30  ;;  %v1084_v46 = vpop.permute.xlu0 %1083 }
 0x251   : > { %1170 = vrot.lane.b32.xlu1 %v1836_v19, %s1515_s30 }
 0x254   : > { %1023 = vrot.lane.b32.xlu0 %v1016_v27, %s1507_s23  ;;  %v1938_v48 = vpop.permute.xlu0 %1104 }
 0x255   : > { %1168 = vrot.lane.b32.xlu1 %v1834_v18, %s1515_s30 }
 0x258   : > { %1191 = vrot.lane.b32.xlu0 %v1184_v25, %s1507_s23  ;;  %v1940_v36 = vpop.permute.xlu0 %965 }
 0x259   : > { %963 = vrot.lane.b32.xlu1 %v956_v31, %s1508_s24 }
 0x25c   : > { %1021 = vrot.lane.b32.xlu0 %v1015_v41, %s1507_s23  ;;  %v1942_v49 = vpop.permute.xlu0 %1133 }
 0x25d   : > { %1131 = vrot.lane.b32.xlu1 %v1124_v42, %s1508_s24 }
 0x260   : > { %v1944_v35 = vpop.permute.xlu0 %986 }
 0x261   : > { %984 = vrot.lane.b32.xlu1 %v977_v2, %s1509_s25 }
 0x264   : > { %v1946_v53 = vpop.permute.xlu0 %1154 }
 0x265   : > { %1152 = vrot.lane.b32.xlu1 %v1145_v23, %s1509_s25 }
 0x269   : > { %1025 = vrot.lane.b32.xlu1 %v1739_v8, %s1507_s23 }
 0x26d   : > { %1193 = vrot.lane.b32.xlu1 %v1739_v8, %s1507_s23  ;;  %v937_v8 = vpop.permute.xlu1 %936 }
 0x271   : > { %1189 = vrot.lane.b32.xlu1 %v1183_v45, %s1507_s23 }
 0x293   : > { %v897_v16 = vpop.permute.xlu0 %896 }
 0x294   : > { %v899_v54 = vpop.permute.xlu1 %898  ;;  %v900_v29 = vsel %vm338_vm6, %v1480_v14, %v897_v16 }
 0x295   : > { %v901_v13 = vsel %vm338_vm6, %v897_v16, %v899_v54 }
 0x29a   : > { %v1065_v17 = vpop.permute.xlu0 %1064 }
 0x29b   : > { %v1067_v0 = vpop.permute.xlu1 %1066  ;;  %v1068_v22 = vsel %vm338_vm6, %v1481_v47, %v1065_v17 }
 0x29c   : > { %v1069_v28 = vsel %vm338_vm6, %v1065_v17, %v1067_v0 }
 0x29e   : > { %v879_v37 = vpop.permute.xlu0 %878 }
 0x29f   : > { %v918_v55 = vpop.permute.xlu1 %917  ;;  %v882_v12 = vsel %vm319_vm5, %v877_v43, %v879_v37 }
 0x2a0   : > { %v921_v30 = vsel %vm385_vm2, %v916_v52, %v918_v55 }
 0x2a2   : > { %v1047_v56 = vpop.permute.xlu0 %1046 }
 0x2a3   : > { %v1086_v57 = vpop.permute.xlu1 %1085  ;;  %v1050_v32 = vsel %vm319_vm5, %v1045_v51, %v1047_v56 }
 0x2a4   : > { %v1089_v40 = vsel %vm385_vm2, %v1084_v46, %v1086_v57 }
 0x2a6   : > { %v1948_v59 = vpop.permute.xlu0 %1129 }
 0x2a7   : > { %v939_v60 = vpop.permute.xlu1 %938 }
 0x2a8   : > { %v942_v24 = vsel %vm416_vm4, %v937_v8, %v939_v60 }
 0x2aa   : > { %v920_v61 = vpop.permute.xlu0 %919 }
 0x2ab   : > { %v1107_v62 = vpop.permute.xlu1 %1106  ;;  %v922_v38 = vsel %vm385_vm2, %v918_v55, %v920_v61 }
 0x2ac   : > { %v1110_v41 = vsel %vm416_vm4, %v1938_v48, %v1107_v62 }
 0x2ae   : > { %v1088_v63 = vpop.permute.xlu0 %1087 }
 0x2af   : > { %v962_v3 = vpop.permute.xlu1 %961  ;;  %v1090_v33 = vsel %vm385_vm2, %v1086_v57, %v1088_v63 }
 0x2b2   : > { %v941_v4 = vpop.permute.xlu0 %940 }
 0x2b3   : > { %v1950_v7 = vpop.permute.xlu1 %982  ;;  %v943_v44 = vsel %vm416_vm4, %v939_v60, %v941_v4 }
 0x2b6   : > { %v1109_v9 = vpop.permute.xlu0 %1108 }
 0x2b7   : > { %v881_v10 = vpop.permute.xlu1 %880  ;;  %v1111_v27 = vsel %vm416_vm4, %v1107_v62, %v1109_v9 }
 0x2b8   : > { %v883_v11 = vsel %vm319_vm5, %v879_v37, %v881_v10 }
 0x2b9   : > { %1247 = vmatprep.subr.bf16.mxu0 %v883_v11 }
 0x2ba   : > { %1248 = vmatpush1.bf16.msra.mxu0 %v882_v12  ;;  %v1151_v20 = vpop.permute.xlu0 %1150 }
 0x2bb   : > { %v1049_v15 = vpop.permute.xlu1 %1048  ;;  %1249 = vmatprep.subr.bf16.mxu0 %v901_v13 }
 0x2bc   : > { %v1051_v26 = vsel %vm319_vm5, %v1047_v56, %v1049_v15 }
 0x2bd   : > { %1288 = vmatprep.subr.bf16.mxu1 %v1051_v26 }
 0x2be   : > { %1289 = vmatpush1.bf16.msra.mxu1 %v1050_v32  ;;  %1250 = vmatpush1.bf16.msra.mxu0 %v900_v29  ;;  %v1484_v21 = vpop.permute.xlu0 %1483 }
 0x2bf   : > { %v1003_v58 = vpop.permute.xlu1 %1002  ;;  %1251 = vmatprep.subr.bf16.mxu0 %v922_v38  ;;  %1290 = vmatprep.subr.bf16.mxu1 %v1069_v28  ;;  %v1485_v50 = vunpack.i.l.bf16 %v1484_v21 }
 0x2c2   : > { %1252 = vmatpush1.bf16.msra.mxu0 %v921_v30  ;;  %1291 = vmatpush1.bf16.msra.mxu1 %v1068_v22  ;;  %v1001_v31 = vpop.permute.xlu0 %1000 }
 0x2c3   : > { %v1171_v39 = vpop.permute.xlu1 %1170  ;;  %1253 = vmatprep.subr.bf16.mxu0 %v943_v44  ;;  %1292 = vmatprep.subr.bf16.mxu1 %v1090_v33  ;;  %v1006_v8 = vsel %vm497_vm7, %v1001_v31, %v1003_v58 }
 0x2c6   : > { %1254 = vmatpush1.bf16.msra.mxu0 %v942_v24  ;;  %1293 = vmatpush1.bf16.msra.mxu1 %v1089_v40  ;;  %v1024_v1 = vpop.permute.xlu0 %1023 }
 0x2c7   : > { %v1169_v25 = vpop.permute.xlu1 %1168  ;;  %1255 = vmatprep.subr.bf16.mxu0 %v1828_v6  ;;  %1294 = vmatprep.subr.bf16.mxu1 %v1111_v27 }
 0x2c8   : > { %v1174_v0 = vsel %vm497_vm7, %v1169_v25, %v1171_v39 }
 0x2ca   : > { %1256 = vmatpush1.bf16.msra.mxu0 %v1826_v5  ;;  %1295 = vmatpush1.bf16.msra.mxu1 %v1110_v41  ;;  %v1192_v45 = vpop.permute.xlu0 %1191 }
 0x2cb   : > { %v964_v42 = vpop.permute.xlu1 %963  ;;  %1296 = vmatprep.subr.bf16.mxu1 %v1836_v19 }
 0x2cc   : > { %v967_v2 = vsel %vm399_vm0, %v962_v3, %v964_v42  ;;  %v968_v23 = vsel %vm399_vm0, %v964_v42, %v1940_v36  ;;  %v1007_v36 = vsel %vm497_vm7, %v1003_v58, %v1485_v50 }
 0x2cd   : > { %1257 = vmatprep.subr.bf16.mxu0 %v968_v23 }
 0x2ce   : > { %1258 = vmatpush1.bf16.msra.mxu0 %v967_v2  ;;  %1297 = vmatpush1.bf16.msra.mxu1 %v1834_v18  ;;  %v1486_v18 = vunpack.i.h.bf16 %v1484_v21  ;;  %v1022_v16 = vpop.permute.xlu0 %1021 }
 0x2cf   : > { %v1132_v6 = vpop.permute.xlu1 %1131  ;;  %v1027_v37 = vsel %vm302_vm1, %v1022_v16, %v1024_v1 }
 0x2d0   : > { %v1135_v43 = vsel %vm399_vm0, %v1948_v59, %v1132_v6  ;;  %v1136_v5 = vsel %vm399_vm0, %v1132_v6, %v1942_v49 }
 0x2d1   : > { %1298 = vmatprep.subr.bf16.mxu1 %v1136_v5 }
 0x2d2   : > { %1299 = vmatpush1.bf16.msra.mxu1 %v1135_v43 }
 0x2d3   : > { %v985_v19 = vpop.permute.xlu1 %984 }
 0x2d4   : > { %v988_v46 = vsel %vm368_vm3, %v1950_v7, %v985_v19  ;;  %v989_v48 = vsel %vm368_vm3, %v985_v19, %v1944_v35  ;;  %v1175_v35 = vsel %vm497_vm7, %v1171_v39, %v1486_v18 }
 0x2d5   : > { %1259 = vmatprep.subr.bf16.mxu0 %v989_v48 }
 0x2d6   : > { %1260 = vmatpush1.bf16.msra.mxu0 %v988_v46 }
 0x2d7   : > { %v1153_v51 = vpop.permute.xlu1 %1152  ;;  %1261 = vmatprep.subr.bf16.mxu0 %v1007_v36 }
 0x2d8   : > { %v1156_v49 = vsel %vm368_vm3, %v1151_v20, %v1153_v51  ;;  %v1157_v52 = vsel %vm368_vm3, %v1153_v51, %v1946_v53  ;;  %v1437_v53 = vcombine.low %v1924_v34, %v1924_v34 }
 0x2d9   : > { %1300 = vmatprep.subr.bf16.mxu1 %v1157_v52 }
 0x2da   : > { %1262 = vmatpush1.bf16.msra.mxu0 %v1006_v8  ;;  %1301 = vmatpush1.bf16.msra.mxu1 %v1156_v49 }
 0x2db   : > { %v1026_v54 = vpop.permute.xlu1 %1025  ;;  %1302 = vmatprep.subr.bf16.mxu1 %v1175_v35 }
 0x2dc   : > { %v1028_v17 = vsel %vm302_vm1, %v1024_v1, %v1026_v54 }
 0x2dd   : > { %1263 = vmatprep.subr.bf16.mxu0 %v1028_v17 }
 0x2de   : > { %1264 = vmatpush1.bf16.msra.mxu0 %v1027_v37  ;;  %1303 = vmatpush1.bf16.msra.mxu1 %v1174_v0 }
 0x2df   : > { %v1194_v55 = vpop.permute.xlu1 %1193 }
 0x2e0   : > { %v1196_v56 = vsel %vm302_vm1, %v1192_v45, %v1194_v55 }
 0x2e1   : > { %1304 = vmatprep.subr.bf16.mxu1 %v1196_v56  ;;  %1280 = vmatmul.mubr.bf16.vlgmr.msra.gmra.mrb[4].mxu0 %v1437_v53 }
 0x2e3   : > { %v1190_v57 = vpop.permute.xlu1 %1189 }
 0x2e4   : > { %v1195_v59 = vsel %vm302_vm1, %v1190_v57, %v1192_v45 }
 0x2e5   : > { %1305 = vmatpush1.bf16.msra.mxu1 %v1195_v59 }
 0x2e8   : > { %1321 = vmatmul.mubr.bf16.vlgmr.msra.gmra.mrb[4].mxu1 %v1437_v53 }
 0x3b4   : > { %v1281_v60 = vpop.f32.mrb[4].mxu0 }
 0x3b5   : > { %1329 = vst [vmem:[%s237_s17] sm:$0xff] %v1281_v60  ;;  %v1283_v34 = vpop.f32.mrb[5].mxu0 }
 0x3b6   : > { %1330 = vst [vmem:[%s237_s17 + $0x8] sm:$0xff] %v1283_v34  ;;  %v1285_v61 = vpop.f32.mrb[6].mxu0 }
 0x3b7   : > { %v1286_v62 = vpop.f32.mrb[7].mxu0 }
 0x3bb   : > { %v1322_v63 = vpop.f32.mrb[4].mxu1 }
 0x3bc   : > { %1441 = vst [vmem:[%s237_s17 + $0x10] sm:$0xff] %v1322_v63  ;;  %v1324_v3 = vpop.f32.mrb[5].mxu1 }
 0x3bd   : > { %1442 = vst [vmem:[%s237_s17 + $0x18] sm:$0xff] %v1324_v3  ;;  %v1326_v4 = vpop.f32.mrb[6].mxu1 }
 0x3be   : > { %v1327_v7 = vpop.f32.mrb[7].mxu1 }
 0x3bf PF: > { %s14_s15 = sadd.s32 1, %s1504_s15  }
 0x3c0   : > { %p11_p4 = scmp.ge.s32.totalorder %s14_s15, 4  }
 0x3c2   :  { %13 = sbr.rel (!%p11_p4) target bundleno = 1 (0x1), region = 74 }

// kernel: fka_forward.5
= control target key start
LH: loop header
LB: loop body
LE: loop exit
PB: predicated region body
PF: predicated region fallthrough
CT: control target
= control target key end

     0   :  { %v50_v0 = vlaneseq  ;;  %v1175_v2 = vmov 1966171168   ;;  %s1176_s17 = smov 111   ;;  %s1178_s18 = smov 113   ;;  %v1183_v25 = vmov 0   ;;  %vm178_vm0 = vcmask 1039360   ;;  %s1665_s0 = inlined_call_operand.vmem [shape: bf16[2,256], index: 0, kind: input, shape index: {}]   ;;  %s1666_s1 = inlined_call_operand.vmem [shape: bf16[1,2,16,256], index: 1, kind: input, shape index: {}]   ;;  %s1667_s2 = inlined_call_operand.vmem [shape: bf16[1,16,144], index: 2, kind: input, shape index: {}]   ;;  %s1668_s3 = inlined_call_operand.vmem [shape: bf16[1,8,144], index: 3, kind: input, shape index: {}]   ;;  %s1669_s4 = inlined_call_operand.vmem [shape: f32[1,2,8,256], index: 4, kind: output, shape index: {}]  }
   0x1   :  { %v1119_v1 = vld.sshfl [vmem:[%s1665_s0] sm:$0x11 pattern:$0x75316420]  ;;  %v48_v3 = vunpack.c.l.s4 %v1175_v2  ;;  %s1177_s0 = smov 127   ;;  %s1179_s19 = smov 1  }
   0x2   :  { %v51_v4 = vshrl.u32 %v50_v0, 7  ;;  %v46_v6 = vcombine.high %v1119_v1, %v1119_v1  ;;  %s1180_s20 = smov 15   ;;  %s1181_s21 = smov 17   ;;  %v1228_v21 = vld [vmem:[%s1666_s1] ss:$8 sps:$4 sm:$0xff]   ;;  %vm81_vm1 = vcmask 908288  }
   0x3   :  { %v49_v5 = vunpack.c.0.s8 %v48_v3  ;;  %v1233_v22 = vld [vmem:[%s1666_s1 + $0x4] ss:$8 sps:$4 sm:$0xff]   ;;  %s1182_s26 = smov 16   ;;  %v1240_v23 = vld [vmem:[%s1666_s1 + $0x10] ss:$8 sps:$4 sm:$0xff]   ;;  %s1184_s5 = smov 112  }
   0x4   :  { %v66_v9 = vsub.s32 0, %v51_v4  ;;  %v1247_v24 = vld [vmem:[%s1666_s1 + $0x14] ss:$8 sps:$4 sm:$0xff]   ;;  %vm164_vm2 = vcmask 121856   ;;  %vm147_vm3 = vcmask 924672   ;;  %vm195_vm4 = vcmask 7168  }
   0x5   :  { %v52_v7 = vsub.s32 %v49_v5, %v51_v4  ;;  %vm98_vm5 = vcmask 138240   ;;  %vm117_vm6 = vcmask 130048   ;;  %vm276_vm7 = vcmask 916480  }
   0x7   :  { %v53_v8 = vrot.slane %v1119_v1, %v52_v7  ;;  %v60_v10 = vrot.slane %v46_v6, %v52_v7  ;;  %v1172_v6 = vld [vmem:[%s1667_s2 + $0x4] ss:$8 sps:$4 sm:$0xff]  }
   0x8   :  { %1126 = vmatprep.mubr.msk.bf16.mxu0 %vm117_vm6, %v1172_v6  ;;  %1127 = vmatprep.mubr.msk.bf16.mxu1 %vm117_vm6, %v1172_v6 }
   0x9   :  { %v62_v11 = vpack.i.b16 %v53_v8, %v53_v8  ;;  %v69_v12 = vpack.i.b16 %v60_v10, %v60_v10  ;;  %v127_v13 = vshrl.u32 %v53_v8, 16  ;;  %v134_v14 = vshrl.u32 %v60_v10, 16 }
   0xb   :  { %v67_v15 = vrot.slane %v62_v11, %v66_v9  ;;  %v74_v16 = vrot.slane %v69_v12, %v66_v9  ;;  %v128_v17 = vpack.i.b16 %v127_v13, %v127_v13  ;;  %v135_v19 = vpack.i.b16 %v134_v14, %v134_v14 }
   0xd   :  { %77 = vrot.lane.b32.xlu0 %v67_v15, %s1176_s17  ;;  %176 = vrot.lane.b32.xlu1 %v74_v16, %s1177_s0  ;;  %v133_v18 = vrot.slane %v128_v17, %v66_v9  ;;  %v140_v20 = vrot.slane %v135_v19, %v66_v9 }
  0x11   :  { %143 = vrot.lane.b32.xlu1 %v133_v18, %s1178_s18  ;;  %79 = vrot.lane.b32.xlu0 %v74_v16, %s1176_s17 }
  0x15   :  { %145 = vrot.lane.b32.xlu1 %v140_v20, %s1178_s18  ;;  %174 = vrot.lane.b32.xlu0 %v67_v15, %s1177_s0 }
  0x19   :  { %211 = vrot.lane.b32.xlu1 %v140_v20, %s1179_s19  ;;  %209 = vrot.lane.b32.xlu0 %v133_v18, %s1179_s19 }
  0x1d   :  { %240 = vrot.lane.b32.xlu1 %v74_v16, %s1180_s20  ;;  %238 = vrot.lane.b32.xlu0 %v67_v15, %s1180_s20 }
  0x21   :  { %288 = vrot.lane.b32.xlu1 %v140_v20, %s1181_s21  ;;  %286 = vrot.lane.b32.xlu0 %v133_v18, %s1181_s21 }
  0x25   :  { %113 = vrot.lane.b32.xlu0 %v1228_v21, %s1182_s26  ;;  %115 = vrot.lane.b32.xlu1 %v1233_v22, %s1182_s26 }
  0x29   :  { %356 = vrot.lane.b32.xlu0 %v1240_v23, %s1182_s26  ;;  %358 = vrot.lane.b32.xlu1 %v1247_v24, %s1182_s26 }
  0x2d   :  { %1145 = vrot.lane.b32.xlu0 %v1183_v25, %s1182_s26  ;;  %272 = vrot.lane.b32.xlu1 %v1233_v22, %s1184_s5 }
  0x31   :  { %1150 = vrot.lane.b32.xlu0 %v1183_v25, %s1184_s5 }
  0x7f   :  { %v78_v26 = vpop.permute.xlu0 %77  ;;  %v1259_v27 = vpop.permute.xlu1 %176 }
  0x80   :  { %v1261_v28 = vmul.bf16 0, %v78_v26  ;;  %v185_v29 = vmul.bf16 %v1233_v22, %v1259_v27  ;;  %v392_v35 = vmul.bf16 %v1247_v24, %v1259_v27 }
  0x82   :  { %92 = vrot.lane.b32.xlu0 %v1261_v28, %s1181_s21 }
  0x83   :  { %v144_v30 = vpop.permute.xlu1 %143  ;;  %v1267_v31 = vpop.permute.xlu0 %79 }
  0x84   :  { %v88_v32 = vmul.bf16 %v1233_v22, %v1267_v31  ;;  %v332_v36 = vmul.bf16 %v1247_v24, %v1267_v31  ;;  %v1312_v47 = vsel %vm81_vm1, %v78_v26, %v1267_v31  ;;  %v152_v55 = vmul.bf16 0, %v144_v30 }
  0x85   :  { %v87_v48 = vmul.bf16 %v1228_v21, %v1312_v47  ;;  %v331_v51 = vmul.bf16 %v1240_v23, %v1312_v47 }
  0x86   :  { %193 = vrot.lane.b32.xlu0 %v185_v29, %s1179_s19  ;;  %96 = vrot.lane.b32.xlu1 %v88_v32, %s1181_s21 }
  0x87   :  { %v1273_v33 = vpop.permute.xlu1 %145  ;;  %v175_v34 = vpop.permute.xlu0 %174 }
  0x88   :  { %v1279_v37 = vmul.bf16 0, %v175_v34  ;;  %v1301_v44 = vsel %vm178_vm0, %v175_v34, %v1259_v27  ;;  %v154_v53 = vmul.bf16 %v1233_v22, %v1273_v33  ;;  %v371_v56 = vmul.bf16 %v1247_v24, %v1273_v33 }
  0x89   :  { %v184_v46 = vmul.bf16 %v1228_v21, %v1301_v44  ;;  %v391_v49 = vmul.bf16 %v1240_v23, %v1301_v44  ;;  %v1346_v58 = vsel %vm147_vm3, %v144_v30, %v1273_v33 }
  0x8a   :  { %400 = vrot.lane.b32.xlu0 %v392_v35, %s1179_s19  ;;  %340 = vrot.lane.b32.xlu1 %v332_v36, %s1181_s21  ;;  %v153_v60 = vmul.bf16 %v1228_v21, %v1346_v58  ;;  %v370_v61 = vmul.bf16 %v1240_v23, %v1346_v58 }
  0x8b   :  { %v212_v38 = vpop.permute.xlu1 %211  ;;  %v1283_v39 = vpop.permute.xlu0 %209 }
  0x8c   :  { %v217_v57 = vmul.bf16 %v1228_v21, %v1283_v39  ;;  %v219_v59 = vmul.bf16 0, %v212_v38  ;;  %v415_v62 = vmul.bf16 %v1240_v23, %v1283_v39  ;;  %v1364_v1 = vsel %vm195_vm4, %v1283_v39, %v212_v38 }
  0x8d   :  { %v218_v3 = vmul.bf16 %v1233_v22, %v1364_v1  ;;  %v416_v5 = vmul.bf16 %v1247_v24, %v1364_v1 }
  0x8e   :  { %336 = vrot.lane.b32.xlu1 %v1261_v28, %s1181_s21  ;;  %396 = vrot.lane.b32.xlu0 %v1279_v37, %s1179_s19 }
  0x8f   :  { %v241_v40 = vpop.permute.xlu1 %240  ;;  %v1289_v41 = vpop.permute.xlu0 %238 }
  0x90   :  { %v1291_v42 = vmul.bf16 0, %v241_v40  ;;  %v246_v43 = vmul.bf16 %v1228_v21, %v1289_v41  ;;  %v436_v45 = vmul.bf16 %v1240_v23, %v1289_v41  ;;  %v1322_v50 = vsel %vm164_vm2, %v1289_v41, %v241_v40 }
  0x91   :  { %v247_v52 = vmul.bf16 %v1233_v22, %v1322_v50  ;;  %v437_v54 = vmul.bf16 %v1247_v24, %v1322_v50 }
  0x92   :  { %256 = vrot.lane.b32.xlu0 %v1291_v42, %s1178_s18  ;;  %189 = vrot.lane.b32.xlu1 %v1279_v37, %s1179_s19 }
  0x93   :  { %v289_v63 = vpop.permute.xlu1 %288  ;;  %v1360_v0 = vpop.permute.xlu0 %286 }
  0x94   :  { %v1371_v2 = vsel %vm98_vm5, %v1360_v0, %v289_v63  ;;  %v1394_v8 = vmul.bf16 0, %v289_v63  ;;  %v294_v9 = vmul.bf16 %v1228_v21, %v1360_v0  ;;  %v475_v10 = vmul.bf16 %v1240_v23, %v1360_v0 }
  0x95   :  { %v295_v4 = vmul.bf16 %v1233_v22, %v1371_v2  ;;  %v476_v7 = vmul.bf16 %v1247_v24, %v1371_v2 }
  0x96   :  { %446 = vrot.lane.b32.xlu0 %v1291_v42, %s1178_s18  ;;  %252 = vrot.lane.b32.xlu1 %v246_v43, %s1178_s18 }
  0x97   :  { %v114_v11 = vpop.permute.xlu0 %113  ;;  %v116_v13 = vpop.permute.xlu1 %115 }
  0x9a   :  { %442 = vrot.lane.b32.xlu0 %v436_v45, %s1178_s18  ;;  %191 = vrot.lane.b32.xlu1 %v184_v46, %s1179_s19 }
  0x9b   :  { %v357_v12 = vpop.permute.xlu0 %356  ;;  %v359_v15 = vpop.permute.xlu1 %358 }
  0x9e   :  { %94 = vrot.lane.b32.xlu0 %v87_v48, %s1181_s21  ;;  %398 = vrot.lane.b32.xlu1 %v391_v49, %s1179_s19  ;;  %v119_v48 = vsel %vm117_vm6, %v114_v11, %v116_v13 }
  0x9f   :  { %v1146_v14 = vpop.permute.xlu0 %1145  ;;  %v1426_v17 = vpop.permute.xlu1 %272 }
  0xa0   :  { %v1147_v46 = vunpack.i.l.bf16 %v1146_v14 }
  0xa2   :  { %338 = vrot.lane.b32.xlu0 %v331_v51, %s1181_s21  ;;  %254 = vrot.lane.b32.xlu1 %v247_v52, %s1178_s18 }
  0xa3   :  { %v1424_v16 = vpop.permute.xlu0 %1150 }
  0xa6   :  { %162 = vrot.lane.b32.xlu0 %v154_v53, %s1180_s20  ;;  %444 = vrot.lane.b32.xlu1 %v437_v54, %s1178_s18  ;;  %v1148_v54 = vunpack.i.h.bf16 %v1146_v14 }
  0xaa   :  { %379 = vrot.lane.b32.xlu0 %v371_v56, %s1180_s20  ;;  %158 = vrot.lane.b32.xlu1 %v152_v55, %s1180_s20  ;;  %v361_v56 = vsel %vm117_vm6, %v357_v12, %v359_v15 }
  0xae   :  { %375 = vrot.lane.b32.xlu0 %v152_v55, %s1180_s20  ;;  %223 = vrot.lane.b32.xlu1 %v217_v57, %s1177_s0 }
  0xb2   :  { %227 = vrot.lane.b32.xlu0 %v219_v59, %s1177_s0  ;;  %160 = vrot.lane.b32.xlu1 %v153_v60, %s1180_s20  ;;  %v360_v60 = vsel %vm117_vm6, %v1148_v54, %v357_v12 }
  0xb6   :  { %425 = vrot.lane.b32.xlu0 %v219_v59, %s1177_s0  ;;  %377 = vrot.lane.b32.xlu1 %v370_v61, %s1180_s20 }
  0xba   :  { %421 = vrot.lane.b32.xlu0 %v415_v62, %s1177_s0  ;;  %462 = vrot.lane.b32.xlu1 %v1247_v24, %s1184_s5 }
  0xbe   :  { %270 = vrot.lane.b32.xlu0 %v1228_v21, %s1184_s5  ;;  %225 = vrot.lane.b32.xlu1 %v218_v3, %s1177_s0 }
  0xc2   :  { %423 = vrot.lane.b32.xlu1 %v416_v5, %s1177_s0  ;;  %302 = vrot.lane.b32.xlu0 %v295_v4, %s1176_s17 }
  0xc6   :  { %460 = vrot.lane.b32.xlu1 %v1240_v23, %s1184_s5  ;;  %483 = vrot.lane.b32.xlu0 %v476_v7, %s1176_s17 }
  0xca   :  { %304 = vrot.lane.b32.xlu1 %v1394_v8, %s1176_s17  ;;  %300 = vrot.lane.b32.xlu0 %v294_v9, %s1176_s17 }
  0xce   :  { %485 = vrot.lane.b32.xlu1 %v1394_v8, %s1176_s17  ;;  %655 = vrot.lane.b32.xlu0 %v1261_v28, %s1181_s21 }
  0xd2   :  { %481 = vrot.lane.b32.xlu1 %v475_v10, %s1176_s17  ;;  %1155 = vrot.lane.b32.xlu0 %v1183_v25, %s1182_s26 }
  0xd6   :  { %823 = vrot.lane.b32.xlu1 %v1261_v28, %s1181_s21  ;;  %862 = vrot.lane.b32.xlu0 %v152_v55, %s1180_s20 }
  0xda   :  { %694 = vrot.lane.b32.xlu1 %v152_v55, %s1180_s20  ;;  %883 = vrot.lane.b32.xlu0 %v1279_v37, %s1179_s19  ;;  %v118_v55 = vsel %vm117_vm6, %v1147_v46, %v114_v11  ;;  %v1153_v46 = vunpack.i.h.bf16 %v1424_v16 }
  0xde   :  { %715 = vrot.lane.b32.xlu1 %v1279_v37, %s1179_s19  ;;  %744 = vrot.lane.b32.xlu0 %v219_v59, %s1177_s0 }
  0xe2   :  { %912 = vrot.lane.b32.xlu0 %v219_v59, %s1177_s0 }
  0xe6   :  { %765 = vrot.lane.b32.xlu0 %v1291_v42, %s1178_s18 }
  0xea   :  { %933 = vrot.lane.b32.xlu0 %v1291_v42, %s1178_s18 }
  0xf4   :  { %v93_v18 = vpop.permute.xlu0 %92 }
  0xf8   :  { %v97_v19 = vpop.permute.xlu1 %96  ;;  %v194_v20 = vpop.permute.xlu0 %193 }
  0xfc   :  { %v341_v26 = vpop.permute.xlu1 %340  ;;  %v401_v28 = vpop.permute.xlu0 %400 }
 0x100   :  { %v337_v29 = vpop.permute.xlu1 %336  ;;  %v397_v30 = vpop.permute.xlu0 %396 }
 0x104   :  { %v190_v32 = vpop.permute.xlu1 %189  ;;  %v1428_v34 = vpop.permute.xlu0 %256 }
 0x108   :  { %v1430_v35 = vpop.permute.xlu1 %252  ;;  %v1432_v36 = vpop.permute.xlu0 %446 }
 0x10c   :  { %v192_v37 = vpop.permute.xlu1 %191  ;;  %v1434_v38 = vpop.permute.xlu0 %442 }
 0x10d   :  { %v197_v9 = vsel %vm195_vm4, %v192_v37, %v194_v20  ;;  %v196_v14 = vsel %vm195_vm4, %v190_v32, %v192_v37 }
 0x110   :  { %v399_v40 = vpop.permute.xlu1 %398  ;;  %v95_v42 = vpop.permute.xlu0 %94 }
 0x111   :  { %v100_v43 = vsel %vm98_vm5, %v95_v42, %v97_v19  ;;  %v99_v45 = vsel %vm98_vm5, %v93_v18, %v95_v42  ;;  %v403_v15 = vsel %vm195_vm4, %v399_v40, %v401_v28  ;;  %v402_v20 = vsel %vm195_vm4, %v397_v30, %v399_v40 }
 0x112   :  { %544 = vmatprep.subr.bf16.mxu0 %v100_v43  ;;  %v1152_v28 = vunpack.i.l.bf16 %v1424_v16 }
 0x113   :  { %545 = vmatpush1.bf16.msra.mxu0 %v99_v45 }
 0x114   :  { %v255_v49 = vpop.permute.xlu1 %254  ;;  %546 = vmatprep.subr.bf16.mxu0 %v119_v48  ;;  %v339_v51 = vpop.permute.xlu0 %338 }
 0x115   :  { %v343_v52 = vsel %vm98_vm5, %v339_v51, %v341_v26  ;;  %v342_v53 = vsel %vm98_vm5, %v337_v29, %v339_v51  ;;  %v258_v42 = vsel %vm147_vm3, %v1430_v35, %v255_v49 }
 0x116   :  { %587 = vmatprep.subr.bf16.mxu1 %v343_v52 }
 0x117   :  { %547 = vmatpush1.bf16.msra.mxu0 %v118_v55  ;;  %588 = vmatpush1.bf16.msra.mxu1 %v342_v53 }
 0x118   :  { %v445_v57 = vpop.permute.xlu1 %444  ;;  %589 = vmatprep.subr.bf16.mxu1 %v361_v56  ;;  %v163_v59 = vpop.permute.xlu0 %162 }
 0x119   :  { %v448_v35 = vsel %vm147_vm3, %v1434_v38, %v445_v57 }
 0x11b   :  { %590 = vmatpush1.bf16.msra.mxu1 %v360_v60 }
 0x11c   :  { %v159_v61 = vpop.permute.xlu1 %158  ;;  %v380_v62 = vpop.permute.xlu0 %379 }
 0x120   :  { %v224_v63 = vpop.permute.xlu1 %223  ;;  %v376_v3 = vpop.permute.xlu0 %375 }
 0x124   :  { %v161_v4 = vpop.permute.xlu1 %160  ;;  %v228_v5 = vpop.permute.xlu0 %227 }
 0x125   :  { %v166_v6 = vsel %vm164_vm2, %v161_v4, %v163_v59  ;;  %v165_v7 = vsel %vm164_vm2, %v159_v61, %v161_v4 }
 0x126   :  { %548 = vmatprep.subr.bf16.mxu0 %v166_v6 }
 0x127   :  { %549 = vmatpush1.bf16.msra.mxu0 %v165_v7 }
 0x128   :  { %v378_v10 = vpop.permute.xlu1 %377  ;;  %v426_v11 = vpop.permute.xlu0 %425  ;;  %550 = vmatprep.subr.bf16.mxu0 %v197_v9 }
 0x129   :  { %v382_v12 = vsel %vm164_vm2, %v378_v10, %v380_v62  ;;  %v381_v13 = vsel %vm164_vm2, %v376_v3, %v378_v10 }
 0x12a   :  { %591 = vmatprep.subr.bf16.mxu1 %v382_v12 }
 0x12b   :  { %551 = vmatpush1.bf16.msra.mxu0 %v196_v14  ;;  %592 = vmatpush1.bf16.msra.mxu1 %v381_v13 }
 0x12c   :  { %v463_v18 = vpop.permute.xlu1 %462  ;;  %v422_v19 = vpop.permute.xlu0 %421  ;;  %593 = vmatprep.subr.bf16.mxu1 %v403_v15  ;;  %552 = vmatprep.subr.bf16.mxu0 %v1233_v22  ;;  %v259_v22 = vsel %vm147_vm3, %v255_v49, %v1428_v34  ;;  %v449_v34 = vsel %vm147_vm3, %v445_v57, %v1432_v36 }
 0x12d   :  { %v467_v49 = vsel %vm276_vm7, %v463_v18, %v1153_v46 }
 0x12f   :  { %553 = vmatpush1.bf16.msra.mxu0 %v1228_v21  ;;  %594 = vmatpush1.bf16.msra.mxu1 %v402_v20 }
 0x130   :  { %v226_v26 = vpop.permute.xlu1 %225  ;;  %v271_v29 = vpop.permute.xlu0 %270  ;;  %595 = vmatprep.subr.bf16.mxu1 %v1247_v24 }
 0x131   :  { %v230_v32 = vsel %vm178_vm0, %v226_v26, %v228_v5  ;;  %v229_v37 = vsel %vm178_vm0, %v224_v63, %v226_v26  ;;  %v277_v48 = vsel %vm276_vm7, %v271_v29, %v1426_v17 }
 0x132   :  { %554 = vmatprep.subr.bf16.mxu0 %v230_v32 }
 0x133   :  { %555 = vmatpush1.bf16.msra.mxu0 %v229_v37  ;;  %596 = vmatpush1.bf16.msra.mxu1 %v1240_v23  ;;  %v278_v23 = vsel %vm276_vm7, %v1426_v17, %v1152_v28  ;;  %v1170_v17 = vld [vmem:[%s1667_s2] ss:$8 sps:$4 sm:$0xff]  }
 0x134   :  { %v424_v30 = vpop.permute.xlu1 %423  ;;  %v303_v21 = vpop.permute.xlu0 %302  ;;  %556 = vmatprep.subr.bf16.mxu0 %v259_v22 }
 0x135   :  { %v428_v40 = vsel %vm178_vm0, %v424_v30, %v426_v11  ;;  %v427_v24 = vsel %vm178_vm0, %v422_v19, %v424_v30 }
 0x136   :  { %597 = vmatprep.subr.bf16.mxu1 %v428_v40 }
 0x137   :  { %557 = vmatpush1.bf16.msra.mxu0 %v258_v42  ;;  %598 = vmatpush1.bf16.msra.mxu1 %v427_v24 }
 0x138   :  { %v461_v43 = vpop.permute.xlu1 %460  ;;  %v484_v45 = vpop.permute.xlu0 %483  ;;  %558 = vmatprep.subr.bf16.mxu0 %v278_v23  ;;  %599 = vmatprep.subr.bf16.mxu1 %v449_v34  ;;  %v1580_v34 = vld [vmem:[%s1668_s3] sm:$0xff] }
 0x139   :  { %v466_v16 = vsel %vm276_vm7, %v461_v43, %v463_v18 }
 0x13b   :  { %559 = vmatpush1.bf16.msra.mxu0 %v277_v48  ;;  %600 = vmatpush1.bf16.msra.mxu1 %v448_v35 }
 0x13c   :  { %v305_v51 = vpop.permute.xlu1 %304  ;;  %v301_v52 = vpop.permute.xlu0 %300  ;;  %601 = vmatprep.subr.bf16.mxu1 %v467_v49 }
 0x13d   :  { %v307_v36 = vsel %vm81_vm1, %v303_v21, %v305_v51  ;;  %v306_v53 = vsel %vm81_vm1, %v301_v52, %v303_v21 }
 0x13e   :  { %560 = vmatprep.subr.bf16.mxu0 %v307_v36 }
 0x13f   :  { %561 = vmatpush1.bf16.msra.mxu0 %v306_v53  ;;  %602 = vmatpush1.bf16.msra.mxu1 %v466_v16 }
 0x140   :  { %v486_v38 = vpop.permute.xlu1 %485  ;;  %v656_v43 = vpop.permute.xlu0 %655 }
 0x141   :  { %v488_v54 = vsel %vm81_vm1, %v484_v45, %v486_v38 }
 0x142   :  { %577 = vmatmul.mubr.bf16.vlgmr.msra.gmra.mrb[0].mxu0 %v1170_v17  ;;  %603 = vmatprep.subr.bf16.mxu1 %v488_v54 }
 0x144   :  { %v482_v55 = vpop.permute.xlu1 %481 }
 0x145   :  { %v487_v56 = vsel %vm81_vm1, %v482_v55, %v484_v45 }
 0x146   :  { %604 = vmatpush1.bf16.msra.mxu1 %v487_v56 }
 0x148   :  { %v824_v51 = vpop.permute.xlu1 %823 }
 0x149   :  { %620 = vmatmul.mubr.bf16.vlgmr.msra.gmra.mrb[0].mxu1 %v1170_v17 }
 0x14c   :  { %v695_v36 = vpop.permute.xlu1 %694 }
 0x215   :  { %v578_v57 = vpop.f32.mrb[0].mxu0 }
 0x216   :  { %v630_v59 = vmax.f32 %v578_v57, 0.0  ;;  %v580_v60 = vpop.f32.mrb[1].mxu0 }
 0x217   :  { %v631_v61 = vmax.f32 %v580_v60, 0.0  ;;  %v582_v62 = vpop.f32.mrb[2].mxu0 }
 0x218   :  { %v634_v63 = vmax.f32 %v582_v62, 0.0  ;;  %v584_v3 = vpop.f32.mrb[3].mxu0 }
 0x219   :  { %v635_v4 = vmax.f32 %v584_v3, 0.0 }
 0x21a   :  { %v1483_v5 = vpack.c.bf16 %v634_v63, %v630_v59 }
 0x21b   :  { %v1485_v6 = vpack.c.bf16 %v635_v4, %v631_v61 }
 0x21c   :  { %v621_v7 = vpop.f32.mrb[0].mxu1  ;;  %675 = vrot.lane.b32.xlu0 %v1483_v5, %s1182_s26  ;;  %v650_v20 = vmul.bf16 %v1483_v5, %v1312_v47  ;;  %v689_v26 = vmul.bf16 %v1483_v5, %v1346_v58  ;;  %v710_v28 = vmul.bf16 %v1483_v5, %v1301_v44  ;;  %v734_v30 = vmul.bf16 %v1483_v5, %v1283_v39 }
 0x21d   :  { %v623_v9 = vpop.f32.mrb[1].mxu1  ;;  %677 = vrot.lane.b32.xlu1 %v1485_v6, %s1182_s26  ;;  %v632_v11 = vmax.f32 %v621_v7, 0.0  ;;  %v711_v21 = vmul.bf16 %v1485_v6, %v1259_v27 }
 0x21e   :  { %v625_v10 = vpop.f32.mrb[2].mxu1  ;;  %v633_v14 = vmax.f32 %v623_v9, 0.0 }
 0x21f   :  { %v636_v12 = vmax.f32 %v625_v10, 0.0  ;;  %v627_v13 = vpop.f32.mrb[3].mxu1 }
 0x220   :  { %v637_v15 = vmax.f32 %v627_v13, 0.0 }
 0x221   :  { %v1491_v18 = vpack.c.bf16 %v636_v12, %v632_v11 }
 0x222   :  { %v1493_v19 = vpack.c.bf16 %v637_v15, %v633_v14 }
 0x223   :  { %843 = vrot.lane.b32.xlu0 %v1491_v18, %s1182_s26  ;;  %v818_v29 = vmul.bf16 %v1491_v18, %v1312_v47  ;;  %v857_v32 = vmul.bf16 %v1491_v18, %v1346_v58  ;;  %v902_v37 = vmul.bf16 %v1491_v18, %v1283_v39  ;;  %v690_v47 = vmul.bf16 %v1485_v6, %v1273_v33 }
 0x224   :  { %845 = vrot.lane.b32.xlu1 %v1493_v19, %s1182_s26  ;;  %v878_v58 = vmul.bf16 %v1491_v18, %v1301_v44  ;;  %v858_v22 = vmul.bf16 %v1493_v19, %v1273_v33  ;;  %v755_v44 = vmul.bf16 %v1483_v5, %v1289_v41  ;;  %v879_v33 = vmul.bf16 %v1493_v19, %v1259_v27 }
 0x225   :  { %v651_v39 = vmul.bf16 %v1485_v6, %v1267_v31  ;;  %v923_v40 = vmul.bf16 %v1491_v18, %v1289_v41  ;;  %v819_v24 = vmul.bf16 %v1493_v19, %v1267_v31  ;;  %v795_v27 = vmul.bf16 %v1485_v6, %v1371_v2 }
 0x226   :  { %v735_v31 = vmul.bf16 %v1485_v6, %v1364_v1  ;;  %v794_v41 = vmul.bf16 %v1483_v5, %v1360_v0  ;;  %v903_v42 = vmul.bf16 %v1493_v19, %v1364_v1  ;;  %v924_v23 = vmul.bf16 %v1493_v19, %v1322_v50 }
 0x227   :  { %657 = vrot.lane.b32.xlu0 %v650_v20, %s1181_s21  ;;  %v1129_v1 = vcombine.high %v1580_v34, %v1580_v34  ;;  %v962_v45 = vmul.bf16 %v1491_v18, %v1360_v0 }
 0x228   :  { %696 = vrot.lane.b32.xlu1 %v689_v26, %s1180_s20 }
 0x229   :  { %1130 = vmatprep.mubr.msk.bf16.mxu0 %vm117_vm6, %v1129_v1  ;;  %1131 = vmatprep.mubr.msk.bf16.mxu1 %vm117_vm6, %v1129_v1 }
 0x22b   :  { %825 = vrot.lane.b32.xlu0 %v818_v29, %s1181_s21 }
 0x22c   :  { %864 = vrot.lane.b32.xlu1 %v857_v32, %s1180_s20 }
 0x22f   :  { %908 = vrot.lane.b32.xlu0 %v902_v37, %s1177_s0 }
 0x230   :  { %717 = vrot.lane.b32.xlu1 %v710_v28, %s1179_s19 }
 0x233   :  { %698 = vrot.lane.b32.xlu0 %v690_v47, %s1180_s20 }
 0x234   :  { %885 = vrot.lane.b32.xlu1 %v878_v58, %s1179_s19 }
 0x237   :  { %866 = vrot.lane.b32.xlu0 %v858_v22, %s1180_s20 }
 0x238   :  { %740 = vrot.lane.b32.xlu1 %v734_v30, %s1177_s0 }
 0x23b   :  { %719 = vrot.lane.b32.xlu0 %v711_v21, %s1179_s19 }
 0x23c   :  { %761 = vrot.lane.b32.xlu1 %v755_v44, %s1178_s18 }
 0x23f   :  { %887 = vrot.lane.b32.xlu0 %v879_v33, %s1179_s19 }
 0x240   :  { %659 = vrot.lane.b32.xlu1 %v651_v39, %s1181_s21 }
 0x243   :  { %929 = vrot.lane.b32.xlu0 %v923_v40, %s1178_s18 }
 0x244   :  { %827 = vrot.lane.b32.xlu1 %v819_v24, %s1181_s21 }
 0x247   :  { %1160 = vrot.lane.b32.xlu0 %v1183_v25, %s1184_s5  ;;  %v963_v25 = vmul.bf16 %v1493_v19, %v1371_v2  ;;  %v756_v2 = vmul.bf16 %v1485_v6, %v1322_v50  ;;  %v1156_v50 = vpop.permute.xlu0 %1155 }
 0x248   :  { %781 = vrot.lane.b32.xlu1 %v1485_v6, %s1184_s5  ;;  %v1157_v14 = vunpack.i.l.bf16 %v1156_v50  ;;  %v1158_v47 = vunpack.i.h.bf16 %v1156_v50 }
 0x24b   :  { %779 = vrot.lane.b32.xlu0 %v1483_v5, %s1184_s5  ;;  %v863_v46 = vpop.permute.xlu0 %862 }
 0x24c   :  { %949 = vrot.lane.b32.xlu1 %v1493_v19, %s1184_s5 }
 0x24f   :  { %802 = vrot.lane.b32.xlu0 %v795_v27, %s1176_s17  ;;  %v1594_v48 = vpop.permute.xlu0 %883 }
 0x250   :  { %947 = vrot.lane.b32.xlu1 %v1491_v18, %s1184_s5 }
 0x253   :  { %970 = vrot.lane.b32.xlu0 %v963_v25, %s1176_s17  ;;  %v1596_v35 = vpop.permute.xlu0 %744 }
 0x254   :  { %742 = vrot.lane.b32.xlu1 %v735_v31, %s1177_s0 }
 0x257   :  { %800 = vrot.lane.b32.xlu0 %v794_v41, %s1176_s17  ;;  %v1598_v49 = vpop.permute.xlu0 %912 }
 0x258   :  { %910 = vrot.lane.b32.xlu1 %v903_v42, %s1177_s0 }
 0x25b   :  { %v1600_v52 = vpop.permute.xlu0 %765 }
 0x25c   :  { %763 = vrot.lane.b32.xlu1 %v756_v2, %s1178_s18 }
 0x25f   :  { %v1602_v53 = vpop.permute.xlu0 %933 }
 0x260   :  { %931 = vrot.lane.b32.xlu1 %v924_v23, %s1178_s18 }
 0x264   :  { %804 = vrot.lane.b32.xlu1 %v1394_v8, %s1176_s17 }
 0x268   :  { %972 = vrot.lane.b32.xlu1 %v1394_v8, %s1176_s17  ;;  %v716_v8 = vpop.permute.xlu1 %715 }
 0x26c   :  { %968 = vrot.lane.b32.xlu1 %v962_v45, %s1176_s17 }
 0x28e   :  { %v676_v16 = vpop.permute.xlu0 %675 }
 0x28f   :  { %v678_v17 = vpop.permute.xlu1 %677  ;;  %v679_v29 = vsel %vm117_vm6, %v1157_v14, %v676_v16 }
 0x290   :  { %v680_v13 = vsel %vm117_vm6, %v676_v16, %v678_v17 }
 0x295   :  { %v844_v38 = vpop.permute.xlu0 %843 }
 0x296   :  { %v846_v0 = vpop.permute.xlu1 %845  ;;  %v847_v22 = vsel %vm117_vm6, %v1158_v47, %v844_v38 }
 0x297   :  { %v848_v28 = vsel %vm117_vm6, %v844_v38, %v846_v0 }
 0x299   :  { %v658_v54 = vpop.permute.xlu0 %657 }
 0x29a   :  { %v697_v55 = vpop.permute.xlu1 %696  ;;  %v661_v12 = vsel %vm98_vm5, %v656_v43, %v658_v54 }
 0x29b   :  { %v700_v30 = vsel %vm164_vm2, %v695_v36, %v697_v55 }
 0x29d   :  { %v826_v56 = vpop.permute.xlu0 %825 }
 0x29e   :  { %v865_v57 = vpop.permute.xlu1 %864  ;;  %v829_v32 = vsel %vm98_vm5, %v824_v51, %v826_v56 }
 0x29f   :  { %v868_v40 = vsel %vm164_vm2, %v863_v46, %v865_v57 }
 0x2a1   :  { %v1604_v59 = vpop.permute.xlu0 %908 }
 0x2a2   :  { %v718_v60 = vpop.permute.xlu1 %717 }
 0x2a3   :  { %v721_v24 = vsel %vm195_vm4, %v716_v8, %v718_v60 }
 0x2a5   :  { %v699_v61 = vpop.permute.xlu0 %698 }
 0x2a6   :  { %v886_v62 = vpop.permute.xlu1 %885  ;;  %v701_v37 = vsel %vm164_vm2, %v697_v55, %v699_v61 }
 0x2a7   :  { %v889_v41 = vsel %vm195_vm4, %v1594_v48, %v886_v62 }
 0x2a9   :  { %v867_v63 = vpop.permute.xlu0 %866 }
 0x2aa   :  { %v741_v3 = vpop.permute.xlu1 %740  ;;  %v869_v33 = vsel %vm164_vm2, %v865_v57, %v867_v63 }
 0x2ad   :  { %v720_v4 = vpop.permute.xlu0 %719 }
 0x2ae   :  { %v1606_v7 = vpop.permute.xlu1 %761  ;;  %v722_v44 = vsel %vm195_vm4, %v718_v60, %v720_v4 }
 0x2b1   :  { %v888_v9 = vpop.permute.xlu0 %887 }
 0x2b2   :  { %v660_v10 = vpop.permute.xlu1 %659  ;;  %v890_v27 = vsel %vm195_vm4, %v886_v62, %v888_v9 }
 0x2b3   :  { %v662_v11 = vsel %vm98_vm5, %v658_v54, %v660_v10 }
 0x2b4   :  { %1026 = vmatprep.subr.bf16.mxu0 %v662_v11 }
 0x2b5   :  { %1027 = vmatpush1.bf16.msra.mxu0 %v661_v12  ;;  %v930_v20 = vpop.permute.xlu0 %929 }
 0x2b6   :  { %1028 = vmatprep.subr.bf16.mxu0 %v680_v13  ;;  %v828_v15 = vpop.permute.xlu1 %827 }
 0x2b7   :  { %v830_v26 = vsel %vm98_vm5, %v826_v56, %v828_v15 }
 0x2b8   :  { %1067 = vmatprep.subr.bf16.mxu1 %v830_v26 }
 0x2b9   :  { %1029 = vmatpush1.bf16.msra.mxu0 %v679_v29  ;;  %1068 = vmatpush1.bf16.msra.mxu1 %v829_v32  ;;  %v1161_v21 = vpop.permute.xlu0 %1160 }
 0x2ba   :  { %1030 = vmatprep.subr.bf16.mxu0 %v701_v37  ;;  %1069 = vmatprep.subr.bf16.mxu1 %v848_v28  ;;  %v782_v58 = vpop.permute.xlu1 %781 }
 0x2bd   :  { %1031 = vmatpush1.bf16.msra.mxu0 %v700_v30  ;;  %1070 = vmatpush1.bf16.msra.mxu1 %v847_v22  ;;  %v780_v31 = vpop.permute.xlu0 %779 }
 0x2be   :  { %1032 = vmatprep.subr.bf16.mxu0 %v722_v44  ;;  %1071 = vmatprep.subr.bf16.mxu1 %v869_v33  ;;  %v950_v39 = vpop.permute.xlu1 %949  ;;  %v785_v8 = vsel %vm276_vm7, %v780_v31, %v782_v58 }
 0x2c1   :  { %1033 = vmatpush1.bf16.msra.mxu0 %v721_v24  ;;  %1072 = vmatpush1.bf16.msra.mxu1 %v868_v40  ;;  %v803_v1 = vpop.permute.xlu0 %802 }
 0x2c2   :  { %1034 = vmatprep.subr.bf16.mxu0 %v1485_v6  ;;  %1073 = vmatprep.subr.bf16.mxu1 %v890_v27  ;;  %v948_v25 = vpop.permute.xlu1 %947 }
 0x2c3   :  { %v953_v0 = vsel %vm276_vm7, %v948_v25, %v950_v39 }
 0x2c5   :  { %1035 = vmatpush1.bf16.msra.mxu0 %v1483_v5  ;;  %1074 = vmatpush1.bf16.msra.mxu1 %v889_v41  ;;  %v971_v45 = vpop.permute.xlu0 %970 }
 0x2c6   :  { %1075 = vmatprep.subr.bf16.mxu1 %v1493_v19  ;;  %v743_v42 = vpop.permute.xlu1 %742  ;;  %v1162_v19 = vunpack.i.l.bf16 %v1161_v21 }
 0x2c7   :  { %v746_v2 = vsel %vm178_vm0, %v741_v3, %v743_v42  ;;  %v747_v23 = vsel %vm178_vm0, %v743_v42, %v1596_v35 }
 0x2c8   :  { %1036 = vmatprep.subr.bf16.mxu0 %v747_v23  ;;  %v786_v35 = vsel %vm276_vm7, %v782_v58, %v1162_v19 }
 0x2c9   :  { %1037 = vmatpush1.bf16.msra.mxu0 %v746_v2  ;;  %1076 = vmatpush1.bf16.msra.mxu1 %v1491_v18  ;;  %v1163_v18 = vunpack.i.h.bf16 %v1161_v21  ;;  %v801_v16 = vpop.permute.xlu0 %800 }
 0x2ca   :  { %v911_v6 = vpop.permute.xlu1 %910  ;;  %v806_v54 = vsel %vm81_vm1, %v801_v16, %v803_v1 }
 0x2cb   :  { %v914_v43 = vsel %vm178_vm0, %v1604_v59, %v911_v6  ;;  %v915_v5 = vsel %vm178_vm0, %v911_v6, %v1598_v49 }
 0x2cc   :  { %1077 = vmatprep.subr.bf16.mxu1 %v915_v5 }
 0x2cd   :  { %1078 = vmatpush1.bf16.msra.mxu1 %v914_v43 }
 0x2ce   :  { %v764_v50 = vpop.permute.xlu1 %763 }
 0x2cf   :  { %v767_v46 = vsel %vm147_vm3, %v1606_v7, %v764_v50  ;;  %v768_v48 = vsel %vm147_vm3, %v764_v50, %v1600_v52  ;;  %v954_v52 = vsel %vm276_vm7, %v950_v39, %v1163_v18 }
 0x2d0   :  { %1038 = vmatprep.subr.bf16.mxu0 %v768_v48 }
 0x2d1   :  { %1039 = vmatpush1.bf16.msra.mxu0 %v767_v46 }
 0x2d2   :  { %1040 = vmatprep.subr.bf16.mxu0 %v786_v35  ;;  %v932_v51 = vpop.permute.xlu1 %931 }
 0x2d3   :  { %v935_v49 = vsel %vm147_vm3, %v930_v20, %v932_v51  ;;  %v936_v36 = vsel %vm147_vm3, %v932_v51, %v1602_v53  ;;  %v1128_v53 = vcombine.low %v1580_v34, %v1580_v34 }
 0x2d4   :  { %1079 = vmatprep.subr.bf16.mxu1 %v936_v36 }
 0x2d5   :  { %1041 = vmatpush1.bf16.msra.mxu0 %v785_v8  ;;  %1080 = vmatpush1.bf16.msra.mxu1 %v935_v49 }
 0x2d6   :  { %1081 = vmatprep.subr.bf16.mxu1 %v954_v52  ;;  %v805_v17 = vpop.permute.xlu1 %804 }
 0x2d7   :  { %v807_v38 = vsel %vm81_vm1, %v803_v1, %v805_v17 }
 0x2d8   :  { %1042 = vmatprep.subr.bf16.mxu0 %v807_v38 }
 0x2d9   :  { %1043 = vmatpush1.bf16.msra.mxu0 %v806_v54  ;;  %1082 = vmatpush1.bf16.msra.mxu1 %v953_v0 }
 0x2da   :  { %v973_v55 = vpop.permute.xlu1 %972 }
 0x2db   :  { %v975_v56 = vsel %vm81_vm1, %v971_v45, %v973_v55 }
 0x2dc   :  { %1083 = vmatprep.subr.bf16.mxu1 %v975_v56  ;;  %1059 = vmatmul.mubr.bf16.vlgmr.msra.gmra.mrb[4].mxu0 %v1128_v53 }
 0x2de   :  { %v969_v57 = vpop.permute.xlu1 %968 }
 0x2df   :  { %v974_v59 = vsel %vm81_vm1, %v969_v57, %v971_v45 }
 0x2e0   :  { %1084 = vmatpush1.bf16.msra.mxu1 %v974_v59 }
 0x2e3   :  { %1100 = vmatmul.mubr.bf16.vlgmr.msra.gmra.mrb[4].mxu1 %v1128_v53 }
 0x3af   :  { %v1060_v60 = vpop.f32.mrb[4].mxu0 }
 0x3b0   :  { %1108 = vst [vmem:[%s1669_s4] sm:$0xff] %v1060_v60  ;;  %v1062_v61 = vpop.f32.mrb[5].mxu0 }
 0x3b1   :  { %1109 = vst [vmem:[%s1669_s4 + $0x8] sm:$0xff] %v1062_v61  ;;  %v1064_v34 = vpop.f32.mrb[6].mxu0 }
 0x3b2   :  { %v1065_v62 = vpop.f32.mrb[7].mxu0 }
 0x3b6   :  { %v1101_v63 = vpop.f32.mrb[4].mxu1 }
 0x3b7   :  { %1132 = vst [vmem:[%s1669_s4 + $0x10] sm:$0xff] %v1101_v63  ;;  %v1103_v3 = vpop.f32.mrb[5].mxu1 }
 0x3b8   :  { %1133 = vst [vmem:[%s1669_s4 + $0x18] sm:$0xff] %v1103_v3  ;;  %v1105_v4 = vpop.f32.mrb[6].mxu1 }
 0x3b9   :  { %v1106_v7 = vpop.f32.mrb[7].mxu1 }

// kernel: fka_forward.4
= control target key start
LH: loop header
LB: loop body
LE: loop exit
PB: predicated region body
PF: predicated region fallthrough
CT: control target
= control target key end

     0   :  { %s1547_s15 = smov 0   ;;  %s2011_s0 = inlined_call_operand.vmem [shape: bf16[2,256], index: 0, kind: input, shape index: {}]   ;;  %s2012_s1 = inlined_call_operand.vmem [shape: bf16[2,2,16,256], index: 1, kind: input, shape index: {}]   ;;  %s2013_s2 = inlined_call_operand.vmem [shape: bf16[2,16,144], index: 2, kind: input, shape index: {}]   ;;  %s2014_s3 = inlined_call_operand.vmem [shape: bf16[2,4,144], index: 3, kind: input, shape index: {}]   ;;  %s2015_s4 = inlined_call_operand.vmem [shape: f32[2,2,4,256], index: 4, kind: output, shape index: {}]  }
   0x1 LB: > { %s1423_s16 = sadd.s32 4294967295, %s1510_s15   ;;  %p1427_p0 = scmp.ge.s32.totalorder %s1510_s15, 1  ;;  %s1510_s15 = sphi %s1547_s15, %s14_s15  }
   0x2   : > { %p182_p1 = scmp.lt.s32.totalorder %s1510_s15, 3 }
   0x4   : > { %p183_p2 = pnand %p1427_p0, %p182_p1 }
   0x5   : > { %v1438_v0 = vld.sshfl [vmem:[%s2011_s0] sm:$0x11 pattern:$0x75316420] (!%p183_p2)  ;;  %v271_v1 = vlaneseq (!%p183_p2)  ;;  %v1512_v2 = vmov (!%p183_p2), 1966171168  }
   0x6   : > { %186 = sbr.rel (%p183_p2) target bundleno = 960 (0x3c0), region = 36  ;;  %v269_v3 = vunpack.c.l.s4 (!%p183_p2), %v1512_v2  ;;  %v267_v6 = vcombine.high (!%p183_p2), %v1438_v0, %v1438_v0  ;;  %p218_p3 = scmp.lt.s32.totalorder (!%p183_p2), %s1423_s16, 1  ;;  %v1520_v25 = vmov (!%p183_p2), 0   ;;  %vm399_vm0 = vcmask (!%p183_p2), 1039360  }
   0x7   : > { %v272_v4 = vshrl.u32 (!%p183_p2), %v271_v1, 7  ;;  %s1513_s23 = smov (!%p183_p2), 111   ;;  %s1514_s24 = smov (!%p183_p2), 127   ;;  %vm302_vm1 = vcmask (!%p183_p2), 908288   ;;  %vm385_vm2 = vcmask (!%p183_p2), 121856   ;;  %vm368_vm3 = vcmask (!%p183_p2), 924672  }
   0x8   : > { %v270_v5 = vunpack.c.0.s8 (!%p183_p2), %v269_v3  ;;  %s1515_s25 = smov (!%p183_p2), 113   ;;  %s1516_s26 = smov (!%p183_p2), 1   ;;  %vm416_vm4 = vcmask (!%p183_p2), 7168   ;;  %vm319_vm5 = vcmask (!%p183_p2), 138240   ;;  %vm338_vm6 = vcmask (!%p183_p2), 130048  }
   0x9   : > { %v287_v9 = vsub.s32 (!%p183_p2), 0, %v272_v4  ;;  %s1517_s27 = smov (!%p183_p2), 15   ;;  %s1518_s28 = smov (!%p183_p2), 17   ;;  %vm497_vm7 = vcmask (!%p183_p2), 916480  }
   0xa   : > { %v273_v7 = vsub.s32 (!%p183_p2), %v270_v5, %v272_v4  ;;  %s1519_s29 = smov (!%p183_p2), 16   ;;  %s1521_s30 = smov (!%p183_p2), 112  }
   0xc   : > { %v274_v8 = vrot.slane (!%p183_p2), %v1438_v0, %v273_v7  ;;  %v281_v10 = vrot.slane (!%p183_p2), %v267_v6, %v273_v7 }
   0xd   : > { %s2017_s16 = smov (!%p218_p3, %s1423_s16), 1 }
   0xe   : > { %s1453_s19 = sshll.u32 %s2017_s16, 5  ;;  %v283_v11 = vpack.i.b16 %v274_v8, %v274_v8  ;;  %v290_v12 = vpack.i.b16 %v281_v10, %v281_v10  ;;  %v348_v13 = vshrl.u32 %v274_v8, 16  ;;  %v355_v14 = vshrl.u32 %v281_v10, 16  ;;  %s1454_s5 = sshll.u32 %s2017_s16, 4 }
   0xf   : > { %s1564_s22 = scalar_lea.vmem %s2012_s1, %s1453_s19  ;;  %s1731_s8 = scalar_lea.vmem %s2013_s2, %s1454_s5 }
  0x10   : > { %v288_v15 = vrot.slane %v283_v11, %v287_v9  ;;  %v295_v16 = vrot.slane %v290_v12, %v287_v9  ;;  %v349_v17 = vpack.i.b16 %v348_v13, %v348_v13  ;;  %v356_v19 = vpack.i.b16 %v355_v14, %v355_v14  ;;  %v1579_v21 = vld [vmem:[%s1564_s22] ss:$8 sps:$4 sm:$0xff]   ;;  %v1582_v22 = vld [vmem:[%s1564_s22 + $0x4] ss:$8 sps:$4 sm:$0xff]   ;;  %v1587_v23 = vld [vmem:[%s1564_s22 + $0x10] ss:$8 sps:$4 sm:$0xff]   ;;  %s237_s17 = scalar_lea.vmem %s2015_s4, %s1454_s5 }
  0x11   : > { %v1592_v24 = vld [vmem:[%s1564_s22 + $0x14] ss:$8 sps:$4 sm:$0xff]   ;;  %v1503_v6 = vld [vmem:[%s1731_s8 + $0x4] ss:$8 sps:$4 sm:$0xff]   ;;  %s1455_s9 = sshll.u32 %s2017_s16, 2 }
  0x12   : > { %298 = vrot.lane.b32.xlu0 %v288_v15, %s1513_s23  ;;  %397 = vrot.lane.b32.xlu1 %v295_v16, %s1514_s24  ;;  %v354_v18 = vrot.slane %v349_v17, %v287_v9  ;;  %v361_v20 = vrot.slane %v356_v19, %v287_v9  ;;  %s232_s12 = scalar_lea.vmem %s2014_s3, %s1455_s9 }
  0x13   : > { %1445 = vmatprep.mubr.msk.bf16.mxu0 %vm338_vm6, %v1503_v6  ;;  %1446 = vmatprep.mubr.msk.bf16.mxu1 %vm338_vm6, %v1503_v6 }
  0x16   : > { %364 = vrot.lane.b32.xlu1 %v354_v18, %s1515_s25  ;;  %300 = vrot.lane.b32.xlu0 %v295_v16, %s1513_s23 }
  0x1a   : > { %366 = vrot.lane.b32.xlu1 %v361_v20, %s1515_s25  ;;  %395 = vrot.lane.b32.xlu0 %v288_v15, %s1514_s24 }
  0x1e   : > { %432 = vrot.lane.b32.xlu1 %v361_v20, %s1516_s26  ;;  %430 = vrot.lane.b32.xlu0 %v354_v18, %s1516_s26 }
  0x22   : > { %461 = vrot.lane.b32.xlu1 %v295_v16, %s1517_s27  ;;  %459 = vrot.lane.b32.xlu0 %v288_v15, %s1517_s27 }
  0x26   : > { %509 = vrot.lane.b32.xlu1 %v361_v20, %s1518_s28  ;;  %507 = vrot.lane.b32.xlu0 %v354_v18, %s1518_s28 }
  0x2a   : > { %334 = vrot.lane.b32.xlu0 %v1579_v21, %s1519_s29  ;;  %336 = vrot.lane.b32.xlu1 %v1582_v22, %s1519_s29 }
  0x2e   : > { %577 = vrot.lane.b32.xlu0 %v1587_v23, %s1519_s29  ;;  %579 = vrot.lane.b32.xlu1 %v1592_v24, %s1519_s29 }
  0x32   : > { %1476 = vrot.lane.b32.xlu0 %v1520_v25, %s1519_s29  ;;  %493 = vrot.lane.b32.xlu1 %v1582_v22, %s1521_s30 }
  0x36   : > { %1481 = vrot.lane.b32.xlu0 %v1520_v25, %s1521_s30 }
  0x84   : > { %v299_v26 = vpop.permute.xlu0 %298  ;;  %v1604_v27 = vpop.permute.xlu1 %397 }
  0x85   : > { %v1606_v28 = vmul.bf16 0, %v299_v26  ;;  %v406_v29 = vmul.bf16 %v1582_v22, %v1604_v27  ;;  %v613_v36 = vmul.bf16 %v1592_v24, %v1604_v27 }
  0x87   : > { %313 = vrot.lane.b32.xlu0 %v1606_v28, %s1518_s28 }
  0x88   : > { %v365_v30 = vpop.permute.xlu1 %364  ;;  %v1612_v31 = vpop.permute.xlu0 %300 }
  0x89   : > { %v309_v32 = vmul.bf16 %v1582_v22, %v1612_v31  ;;  %v553_v35 = vmul.bf16 %v1592_v24, %v1612_v31  ;;  %v1657_v47 = vsel %vm302_vm1, %v299_v26, %v1612_v31  ;;  %v373_v55 = vmul.bf16 0, %v365_v30 }
  0x8a   : > { %v308_v49 = vmul.bf16 %v1579_v21, %v1657_v47  ;;  %v552_v52 = vmul.bf16 %v1587_v23, %v1657_v47 }
  0x8b   : > { %317 = vrot.lane.b32.xlu1 %v309_v32, %s1518_s28  ;;  %414 = vrot.lane.b32.xlu0 %v406_v29, %s1516_s26 }
  0x8c   : > { %v1618_v33 = vpop.permute.xlu1 %366  ;;  %v396_v34 = vpop.permute.xlu0 %395 }
  0x8d   : > { %v1624_v37 = vmul.bf16 0, %v396_v34  ;;  %v1646_v44 = vsel %vm399_vm0, %v396_v34, %v1604_v27  ;;  %v375_v54 = vmul.bf16 %v1582_v22, %v1618_v33  ;;  %v592_v56 = vmul.bf16 %v1592_v24, %v1618_v33 }
  0x8e   : > { %v405_v46 = vmul.bf16 %v1579_v21, %v1646_v44  ;;  %v612_v48 = vmul.bf16 %v1587_v23, %v1646_v44  ;;  %v1691_v58 = vsel %vm368_vm3, %v365_v30, %v1618_v33 }
  0x8f   : > { %561 = vrot.lane.b32.xlu1 %v553_v35, %s1518_s28  ;;  %621 = vrot.lane.b32.xlu0 %v613_v36, %s1516_s26  ;;  %v374_v60 = vmul.bf16 %v1579_v21, %v1691_v58  ;;  %v591_v61 = vmul.bf16 %v1587_v23, %v1691_v58 }
  0x90   : > { %v433_v38 = vpop.permute.xlu1 %432  ;;  %v1628_v39 = vpop.permute.xlu0 %430 }
  0x91   : > { %v438_v57 = vmul.bf16 %v1579_v21, %v1628_v39  ;;  %v440_v59 = vmul.bf16 0, %v433_v38  ;;  %v636_v62 = vmul.bf16 %v1587_v23, %v1628_v39  ;;  %v1709_v1 = vsel %vm416_vm4, %v1628_v39, %v433_v38 }
  0x92   : > { %v439_v3 = vmul.bf16 %v1582_v22, %v1709_v1  ;;  %v637_v5 = vmul.bf16 %v1592_v24, %v1709_v1 }
  0x93   : > { %557 = vrot.lane.b32.xlu1 %v1606_v28, %s1518_s28  ;;  %617 = vrot.lane.b32.xlu0 %v1624_v37, %s1516_s26 }
  0x94   : > { %v462_v40 = vpop.permute.xlu1 %461  ;;  %v1634_v41 = vpop.permute.xlu0 %459 }
  0x95   : > { %v1636_v42 = vmul.bf16 0, %v462_v40  ;;  %v467_v43 = vmul.bf16 %v1579_v21, %v1634_v41  ;;  %v657_v45 = vmul.bf16 %v1587_v23, %v1634_v41  ;;  %v1667_v50 = vsel %vm385_vm2, %v1634_v41, %v462_v40 }
  0x96   : > { %v468_v51 = vmul.bf16 %v1582_v22, %v1667_v50  ;;  %v658_v53 = vmul.bf16 %v1592_v24, %v1667_v50 }
  0x97   : > { %410 = vrot.lane.b32.xlu1 %v1624_v37, %s1516_s26  ;;  %477 = vrot.lane.b32.xlu0 %v1636_v42, %s1515_s25 }
  0x98   : > { %v510_v63 = vpop.permute.xlu1 %509  ;;  %v1705_v0 = vpop.permute.xlu0 %507 }
  0x99   : > { %v1716_v2 = vsel %vm319_vm5, %v1705_v0, %v510_v63  ;;  %v1745_v8 = vmul.bf16 0, %v510_v63  ;;  %v515_v9 = vmul.bf16 %v1579_v21, %v1705_v0  ;;  %v696_v10 = vmul.bf16 %v1587_v23, %v1705_v0 }
  0x9a   : > { %v516_v4 = vmul.bf16 %v1582_v22, %v1716_v2  ;;  %v697_v7 = vmul.bf16 %v1592_v24, %v1716_v2 }
  0x9b   : > { %667 = vrot.lane.b32.xlu0 %v1636_v42, %s1515_s25  ;;  %473 = vrot.lane.b32.xlu1 %v467_v43, %s1515_s25 }
  0x9c   : > { %v335_v11 = vpop.permute.xlu0 %334  ;;  %v337_v13 = vpop.permute.xlu1 %336 }
  0x9f   : > { %663 = vrot.lane.b32.xlu0 %v657_v45, %s1515_s25  ;;  %412 = vrot.lane.b32.xlu1 %v405_v46, %s1516_s26 }
  0xa0   : > { %v578_v12 = vpop.permute.xlu0 %577  ;;  %v580_v15 = vpop.permute.xlu1 %579 }
  0xa3   : > { %619 = vrot.lane.b32.xlu1 %v612_v48, %s1516_s26  ;;  %315 = vrot.lane.b32.xlu0 %v308_v49, %s1518_s28  ;;  %v340_v48 = vsel %vm338_vm6, %v335_v11, %v337_v13 }
  0xa4   : > { %v1477_v14 = vpop.permute.xlu0 %1476  ;;  %v1777_v17 = vpop.permute.xlu1 %493 }
  0xa5   : > { %v1478_v46 = vunpack.i.l.bf16 %v1477_v14 }
  0xa7   : > { %475 = vrot.lane.b32.xlu1 %v468_v51, %s1515_s25  ;;  %559 = vrot.lane.b32.xlu0 %v552_v52, %s1518_s28 }
  0xa8   : > { %v1775_v16 = vpop.permute.xlu0 %1481 }
  0xab   : > { %665 = vrot.lane.b32.xlu1 %v658_v53, %s1515_s25  ;;  %383 = vrot.lane.b32.xlu0 %v375_v54, %s1517_s27  ;;  %v1479_v54 = vunpack.i.h.bf16 %v1477_v14 }
  0xaf   : > { %379 = vrot.lane.b32.xlu1 %v373_v55, %s1517_s27  ;;  %600 = vrot.lane.b32.xlu0 %v592_v56, %s1517_s27  ;;  %v582_v56 = vsel %vm338_vm6, %v578_v12, %v580_v15 }
  0xb3   : > { %444 = vrot.lane.b32.xlu1 %v438_v57, %s1514_s24  ;;  %596 = vrot.lane.b32.xlu0 %v373_v55, %s1517_s27 }
  0xb7   : > { %381 = vrot.lane.b32.xlu1 %v374_v60, %s1517_s27  ;;  %448 = vrot.lane.b32.xlu0 %v440_v59, %s1514_s24  ;;  %v581_v60 = vsel %vm338_vm6, %v1479_v54, %v578_v12  ;;  %v1501_v54 = vld [vmem:[%s1731_s8] ss:$8 sps:$4 sm:$0xff]  }
  0xbb   : > { %598 = vrot.lane.b32.xlu1 %v591_v61, %s1517_s27  ;;  %646 = vrot.lane.b32.xlu0 %v440_v59, %s1514_s24 }
  0xbf   : > { %683 = vrot.lane.b32.xlu1 %v1592_v24, %s1521_s30  ;;  %642 = vrot.lane.b32.xlu0 %v636_v62, %s1514_s24 }
  0xc3   : > { %446 = vrot.lane.b32.xlu1 %v439_v3, %s1514_s24  ;;  %491 = vrot.lane.b32.xlu0 %v1579_v21, %s1521_s30 }
  0xc7   : > { %644 = vrot.lane.b32.xlu1 %v637_v5, %s1514_s24  ;;  %523 = vrot.lane.b32.xlu0 %v516_v4, %s1513_s23 }
  0xcb   : > { %681 = vrot.lane.b32.xlu1 %v1587_v23, %s1521_s30  ;;  %704 = vrot.lane.b32.xlu0 %v697_v7, %s1513_s23 }
  0xcf   : > { %525 = vrot.lane.b32.xlu1 %v1745_v8, %s1513_s23  ;;  %521 = vrot.lane.b32.xlu0 %v515_v9, %s1513_s23 }
  0xd3   : > { %706 = vrot.lane.b32.xlu1 %v1745_v8, %s1513_s23  ;;  %876 = vrot.lane.b32.xlu0 %v1606_v28, %s1518_s28 }
  0xd7   : > { %702 = vrot.lane.b32.xlu1 %v696_v10, %s1513_s23  ;;  %1486 = vrot.lane.b32.xlu0 %v1520_v25, %s1519_s29 }
  0xdb   : > { %1044 = vrot.lane.b32.xlu1 %v1606_v28, %s1518_s28  ;;  %1083 = vrot.lane.b32.xlu0 %v373_v55, %s1517_s27 }
  0xdf   : > { %915 = vrot.lane.b32.xlu1 %v373_v55, %s1517_s27  ;;  %1104 = vrot.lane.b32.xlu0 %v1624_v37, %s1516_s26  ;;  %v339_v55 = vsel %vm338_vm6, %v1478_v46, %v335_v11  ;;  %v1484_v46 = vunpack.i.h.bf16 %v1775_v16 }
  0xe3   : > { %936 = vrot.lane.b32.xlu1 %v1624_v37, %s1516_s26  ;;  %965 = vrot.lane.b32.xlu0 %v440_v59, %s1514_s24 }
  0xe7   : > { %1133 = vrot.lane.b32.xlu0 %v440_v59, %s1514_s24 }
  0xeb   : > { %986 = vrot.lane.b32.xlu0 %v1636_v42, %s1515_s25 }
  0xef   : > { %1154 = vrot.lane.b32.xlu0 %v1636_v42, %s1515_s25 }
  0xf9   : > { %v314_v18 = vpop.permute.xlu0 %313 }
  0xfd   : > { %v318_v19 = vpop.permute.xlu1 %317  ;;  %v415_v20 = vpop.permute.xlu0 %414 }
 0x101   : > { %v562_v26 = vpop.permute.xlu1 %561  ;;  %v622_v28 = vpop.permute.xlu0 %621 }
 0x105   : > { %v558_v29 = vpop.permute.xlu1 %557  ;;  %v618_v30 = vpop.permute.xlu0 %617 }
 0x109   : > { %v411_v32 = vpop.permute.xlu1 %410  ;;  %v1779_v34 = vpop.permute.xlu0 %477 }
 0x10d   : > { %v1781_v35 = vpop.permute.xlu0 %667  ;;  %v1783_v36 = vpop.permute.xlu1 %473 }
 0x111   : > { %v1785_v37 = vpop.permute.xlu0 %663  ;;  %v413_v38 = vpop.permute.xlu1 %412 }
 0x112   : > { %v418_v9 = vsel %vm416_vm4, %v413_v38, %v415_v20  ;;  %v417_v14 = vsel %vm416_vm4, %v411_v32, %v413_v38 }
 0x115   : > { %v620_v40 = vpop.permute.xlu1 %619  ;;  %v316_v42 = vpop.permute.xlu0 %315 }
 0x116   : > { %v321_v43 = vsel %vm319_vm5, %v316_v42, %v318_v19  ;;  %v320_v45 = vsel %vm319_vm5, %v314_v18, %v316_v42  ;;  %v624_v15 = vsel %vm416_vm4, %v620_v40, %v622_v28  ;;  %v623_v20 = vsel %vm416_vm4, %v618_v30, %v620_v40 }
 0x117   : > { %765 = vmatprep.subr.bf16.mxu0 %v321_v43  ;;  %v1483_v28 = vunpack.i.l.bf16 %v1775_v16 }
 0x118   : > { %766 = vmatpush1.bf16.msra.mxu0 %v320_v45 }
 0x119   : > { %v476_v49 = vpop.permute.xlu1 %475  ;;  %767 = vmatprep.subr.bf16.mxu0 %v340_v48  ;;  %v560_v51 = vpop.permute.xlu0 %559 }
 0x11a   : > { %v564_v52 = vsel %vm319_vm5, %v560_v51, %v562_v26  ;;  %v563_v53 = vsel %vm319_vm5, %v558_v29, %v560_v51  ;;  %v479_v42 = vsel %vm368_vm3, %v1783_v36, %v476_v49 }
 0x11b   : > { %808 = vmatprep.subr.bf16.mxu1 %v564_v52 }
 0x11c   : > { %768 = vmatpush1.bf16.msra.mxu0 %v339_v55  ;;  %809 = vmatpush1.bf16.msra.mxu1 %v563_v53 }
 0x11d   : > { %v666_v57 = vpop.permute.xlu1 %665  ;;  %810 = vmatprep.subr.bf16.mxu1 %v582_v56  ;;  %v384_v59 = vpop.permute.xlu0 %383 }
 0x11e   : > { %v669_v36 = vsel %vm368_vm3, %v1785_v37, %v666_v57 }
 0x120   : > { %811 = vmatpush1.bf16.msra.mxu1 %v581_v60 }
 0x121   : > { %v380_v61 = vpop.permute.xlu1 %379  ;;  %v601_v62 = vpop.permute.xlu0 %600 }
 0x125   : > { %v445_v63 = vpop.permute.xlu1 %444  ;;  %v597_v3 = vpop.permute.xlu0 %596 }
 0x129   : > { %v382_v4 = vpop.permute.xlu1 %381  ;;  %v449_v5 = vpop.permute.xlu0 %448 }
 0x12a   : > { %v387_v6 = vsel %vm385_vm2, %v382_v4, %v384_v59  ;;  %v386_v7 = vsel %vm385_vm2, %v380_v61, %v382_v4 }
 0x12b   : > { %769 = vmatprep.subr.bf16.mxu0 %v387_v6 }
 0x12c   : > { %770 = vmatpush1.bf16.msra.mxu0 %v386_v7 }
 0x12d   : > { %v599_v10 = vpop.permute.xlu1 %598  ;;  %771 = vmatprep.subr.bf16.mxu0 %v418_v9  ;;  %v647_v11 = vpop.permute.xlu0 %646 }
 0x12e   : > { %v603_v12 = vsel %vm385_vm2, %v599_v10, %v601_v62  ;;  %v602_v13 = vsel %vm385_vm2, %v597_v3, %v599_v10 }
 0x12f   : > { %812 = vmatprep.subr.bf16.mxu1 %v603_v12 }
 0x130   : > { %772 = vmatpush1.bf16.msra.mxu0 %v417_v14  ;;  %813 = vmatpush1.bf16.msra.mxu1 %v602_v13 }
 0x131   : > { %v684_v18 = vpop.permute.xlu1 %683  ;;  %814 = vmatprep.subr.bf16.mxu1 %v624_v15  ;;  %v643_v19 = vpop.permute.xlu0 %642  ;;  %773 = vmatprep.subr.bf16.mxu0 %v1582_v22  ;;  %v480_v22 = vsel %vm368_vm3, %v476_v49, %v1779_v34  ;;  %v670_v34 = vsel %vm368_vm3, %v666_v57, %v1781_v35 }
 0x132   : > { %v688_v49 = vsel %vm497_vm7, %v684_v18, %v1484_v46 }
 0x134   : > { %774 = vmatpush1.bf16.msra.mxu0 %v1579_v21  ;;  %815 = vmatpush1.bf16.msra.mxu1 %v623_v20 }
 0x135   : > { %v447_v26 = vpop.permute.xlu1 %446  ;;  %v492_v29 = vpop.permute.xlu0 %491  ;;  %816 = vmatprep.subr.bf16.mxu1 %v1592_v24 }
 0x136   : > { %v451_v32 = vsel %vm399_vm0, %v447_v26, %v449_v5  ;;  %v450_v38 = vsel %vm399_vm0, %v445_v63, %v447_v26  ;;  %v498_v48 = vsel %vm497_vm7, %v492_v29, %v1777_v17 }
 0x137   : > { %775 = vmatprep.subr.bf16.mxu0 %v451_v32 }
 0x138   : > { %776 = vmatpush1.bf16.msra.mxu0 %v450_v38  ;;  %817 = vmatpush1.bf16.msra.mxu1 %v1587_v23  ;;  %v499_v23 = vsel %vm497_vm7, %v1777_v17, %v1483_v28 }
 0x139   : > { %v645_v30 = vpop.permute.xlu1 %644  ;;  %777 = vmatprep.subr.bf16.mxu0 %v480_v22  ;;  %v524_v21 = vpop.permute.xlu0 %523 }
 0x13a   : > { %v649_v40 = vsel %vm399_vm0, %v645_v30, %v647_v11  ;;  %v648_v24 = vsel %vm399_vm0, %v643_v19, %v645_v30 }
 0x13b   : > { %818 = vmatprep.subr.bf16.mxu1 %v649_v40 }
 0x13c   : > { %778 = vmatpush1.bf16.msra.mxu0 %v479_v42  ;;  %819 = vmatpush1.bf16.msra.mxu1 %v648_v24 }
 0x13d   : > { %v682_v43 = vpop.permute.xlu1 %681  ;;  %779 = vmatprep.subr.bf16.mxu0 %v499_v23  ;;  %820 = vmatprep.subr.bf16.mxu1 %v670_v34  ;;  %v705_v45 = vpop.permute.xlu0 %704  ;;  %v1930_v34 = vld.sshfl [vmem:[%s232_s12] sm:$0x33 pattern:$0x76325410] }
 0x13e   : > { %v687_v16 = vsel %vm497_vm7, %v682_v43, %v684_v18 }
 0x140   : > { %780 = vmatpush1.bf16.msra.mxu0 %v498_v48  ;;  %821 = vmatpush1.bf16.msra.mxu1 %v669_v36 }
 0x141   : > { %v526_v51 = vpop.permute.xlu1 %525  ;;  %822 = vmatprep.subr.bf16.mxu1 %v688_v49  ;;  %v522_v35 = vpop.permute.xlu0 %521 }
 0x142   : > { %v528_v52 = vsel %vm302_vm1, %v524_v21, %v526_v51  ;;  %v527_v53 = vsel %vm302_vm1, %v522_v35, %v524_v21 }
 0x143   : > { %781 = vmatprep.subr.bf16.mxu0 %v528_v52 }
 0x144   : > { %782 = vmatpush1.bf16.msra.mxu0 %v527_v53  ;;  %823 = vmatpush1.bf16.msra.mxu1 %v687_v16 }
 0x145   : > { %v707_v17 = vpop.permute.xlu1 %706  ;;  %v877_v43 = vpop.permute.xlu0 %876 }
 0x146   : > { %v709_v37 = vsel %vm302_vm1, %v705_v45, %v707_v17 }
 0x147   : > { %798 = vmatmul.mubr.bf16.vlgmr.msra.gmra.mrb[0].mxu0 %v1501_v54  ;;  %824 = vmatprep.subr.bf16.mxu1 %v709_v37 }
 0x149   : > { %v703_v55 = vpop.permute.xlu1 %702 }
 0x14a   : > { %v708_v56 = vsel %vm302_vm1, %v703_v55, %v705_v45 }
 0x14b   : > { %825 = vmatpush1.bf16.msra.mxu1 %v708_v56 }
 0x14d   : > { %v1045_v51 = vpop.permute.xlu1 %1044 }
 0x14e   : > { %841 = vmatmul.mubr.bf16.vlgmr.msra.gmra.mrb[0].mxu1 %v1501_v54 }
 0x151   : > { %v916_v52 = vpop.permute.xlu1 %915 }
 0x21a   : > { %v799_v57 = vpop.f32.mrb[0].mxu0 }
 0x21b   : > { %v851_v59 = vmax.f32 %v799_v57, 0.0  ;;  %v801_v60 = vpop.f32.mrb[1].mxu0 }
 0x21c   : > { %v852_v61 = vmax.f32 %v801_v60, 0.0  ;;  %v803_v62 = vpop.f32.mrb[2].mxu0 }
 0x21d   : > { %v855_v63 = vmax.f32 %v803_v62, 0.0  ;;  %v805_v3 = vpop.f32.mrb[3].mxu0 }
 0x21e   : > { %v856_v4 = vmax.f32 %v805_v3, 0.0 }
 0x21f   : > { %v1832_v5 = vpack.c.bf16 %v855_v63, %v851_v59 }
 0x220   : > { %v1834_v6 = vpack.c.bf16 %v856_v4, %v852_v61 }
 0x221   : > { %v842_v7 = vpop.f32.mrb[0].mxu1  ;;  %896 = vrot.lane.b32.xlu0 %v1832_v5, %s1519_s29  ;;  %v871_v20 = vmul.bf16 %v1832_v5, %v1657_v47  ;;  %v910_v26 = vmul.bf16 %v1832_v5, %v1691_v58  ;;  %v931_v28 = vmul.bf16 %v1832_v5, %v1646_v44  ;;  %v955_v30 = vmul.bf16 %v1832_v5, %v1628_v39 }
 0x222   : > { %v844_v9 = vpop.f32.mrb[1].mxu1  ;;  %898 = vrot.lane.b32.xlu1 %v1834_v6, %s1519_s29  ;;  %v853_v11 = vmax.f32 %v842_v7, 0.0  ;;  %v932_v21 = vmul.bf16 %v1834_v6, %v1604_v27 }
 0x223   : > { %v846_v10 = vpop.f32.mrb[2].mxu1  ;;  %v854_v14 = vmax.f32 %v844_v9, 0.0 }
 0x224   : > { %v857_v12 = vmax.f32 %v846_v10, 0.0  ;;  %v848_v13 = vpop.f32.mrb[3].mxu1 }
 0x225   : > { %v858_v15 = vmax.f32 %v848_v13, 0.0 }
 0x226   : > { %v1840_v18 = vpack.c.bf16 %v857_v12, %v853_v11 }
 0x227   : > { %v1842_v19 = vpack.c.bf16 %v858_v15, %v854_v14 }
 0x228   : > { %1064 = vrot.lane.b32.xlu0 %v1840_v18, %s1519_s29  ;;  %v1039_v29 = vmul.bf16 %v1840_v18, %v1657_v47  ;;  %v1078_v32 = vmul.bf16 %v1840_v18, %v1691_v58  ;;  %v1123_v38 = vmul.bf16 %v1840_v18, %v1628_v39  ;;  %v911_v47 = vmul.bf16 %v1834_v6, %v1618_v33 }
 0x229   : > { %1066 = vrot.lane.b32.xlu1 %v1842_v19, %s1519_s29  ;;  %v1099_v58 = vmul.bf16 %v1840_v18, %v1646_v44  ;;  %v1079_v22 = vmul.bf16 %v1842_v19, %v1618_v33  ;;  %v976_v44 = vmul.bf16 %v1832_v5, %v1634_v41  ;;  %v1100_v33 = vmul.bf16 %v1842_v19, %v1604_v27 }
 0x22a   : > { %v872_v39 = vmul.bf16 %v1834_v6, %v1612_v31  ;;  %v1144_v40 = vmul.bf16 %v1840_v18, %v1634_v41  ;;  %v1040_v24 = vmul.bf16 %v1842_v19, %v1612_v31  ;;  %v1016_v27 = vmul.bf16 %v1834_v6, %v1716_v2 }
 0x22b   : > { %v956_v31 = vmul.bf16 %v1834_v6, %v1709_v1  ;;  %v1015_v41 = vmul.bf16 %v1832_v5, %v1705_v0  ;;  %v1124_v42 = vmul.bf16 %v1842_v19, %v1709_v1  ;;  %v1145_v23 = vmul.bf16 %v1842_v19, %v1667_v50 }
 0x22c   : > { %878 = vrot.lane.b32.xlu0 %v871_v20, %s1518_s28  ;;  %v1246_v1 = vcombine.high %v1930_v34, %v1930_v34  ;;  %v1183_v45 = vmul.bf16 %v1840_v18, %v1705_v0 }
 0x22d   : > { %917 = vrot.lane.b32.xlu1 %v910_v26, %s1517_s27 }
 0x22e   : > { %1448 = vmatprep.mubr.msk.bf16.mxu0 %vm338_vm6, %v1246_v1  ;;  %1449 = vmatprep.mubr.msk.bf16.mxu1 %vm338_vm6, %v1246_v1 }
 0x230   : > { %1046 = vrot.lane.b32.xlu0 %v1039_v29, %s1518_s28 }
 0x231   : > { %1085 = vrot.lane.b32.xlu1 %v1078_v32, %s1517_s27 }
 0x234   : > { %1129 = vrot.lane.b32.xlu0 %v1123_v38, %s1514_s24 }
 0x235   : > { %938 = vrot.lane.b32.xlu1 %v931_v28, %s1516_s26 }
 0x238   : > { %919 = vrot.lane.b32.xlu0 %v911_v47, %s1517_s27 }
 0x239   : > { %1106 = vrot.lane.b32.xlu1 %v1099_v58, %s1516_s26 }
 0x23c   : > { %1087 = vrot.lane.b32.xlu0 %v1079_v22, %s1517_s27 }
 0x23d   : > { %961 = vrot.lane.b32.xlu1 %v955_v30, %s1514_s24 }
 0x240   : > { %940 = vrot.lane.b32.xlu0 %v932_v21, %s1516_s26 }
 0x241   : > { %982 = vrot.lane.b32.xlu1 %v976_v44, %s1515_s25 }
 0x244   : > { %1108 = vrot.lane.b32.xlu0 %v1100_v33, %s1516_s26 }
 0x245   : > { %880 = vrot.lane.b32.xlu1 %v872_v39, %s1518_s28 }
 0x248   : > { %1150 = vrot.lane.b32.xlu0 %v1144_v40, %s1515_s25 }
 0x249   : > { %1048 = vrot.lane.b32.xlu1 %v1040_v24, %s1518_s28 }
 0x24c   : > { %1491 = vrot.lane.b32.xlu0 %v1520_v25, %s1521_s30  ;;  %v1184_v25 = vmul.bf16 %v1842_v19, %v1716_v2  ;;  %v977_v2 = vmul.bf16 %v1834_v6, %v1667_v50  ;;  %v1487_v50 = vpop.permute.xlu0 %1486 }
 0x24d   : > { %1002 = vrot.lane.b32.xlu1 %v1834_v6, %s1521_s30  ;;  %v1488_v14 = vunpack.i.l.bf16 %v1487_v50  ;;  %v1489_v47 = vunpack.i.h.bf16 %v1487_v50 }
 0x250   : > { %1000 = vrot.lane.b32.xlu0 %v1832_v5, %s1521_s30  ;;  %v1084_v46 = vpop.permute.xlu0 %1083 }
 0x251   : > { %1170 = vrot.lane.b32.xlu1 %v1842_v19, %s1521_s30 }
 0x254   : > { %1023 = vrot.lane.b32.xlu0 %v1016_v27, %s1513_s23  ;;  %v1944_v48 = vpop.permute.xlu0 %1104 }
 0x255   : > { %1168 = vrot.lane.b32.xlu1 %v1840_v18, %s1521_s30 }
 0x258   : > { %1191 = vrot.lane.b32.xlu0 %v1184_v25, %s1513_s23  ;;  %v1946_v36 = vpop.permute.xlu0 %965 }
 0x259   : > { %963 = vrot.lane.b32.xlu1 %v956_v31, %s1514_s24 }
 0x25c   : > { %1021 = vrot.lane.b32.xlu0 %v1015_v41, %s1513_s23  ;;  %v1948_v49 = vpop.permute.xlu0 %1133 }
 0x25d   : > { %1131 = vrot.lane.b32.xlu1 %v1124_v42, %s1514_s24 }
 0x260   : > { %v1950_v35 = vpop.permute.xlu0 %986 }
 0x261   : > { %984 = vrot.lane.b32.xlu1 %v977_v2, %s1515_s25 }
 0x264   : > { %v1952_v53 = vpop.permute.xlu0 %1154 }
 0x265   : > { %1152 = vrot.lane.b32.xlu1 %v1145_v23, %s1515_s25 }
 0x269   : > { %1025 = vrot.lane.b32.xlu1 %v1745_v8, %s1513_s23 }
 0x26d   : > { %1193 = vrot.lane.b32.xlu1 %v1745_v8, %s1513_s23  ;;  %v937_v8 = vpop.permute.xlu1 %936 }
 0x271   : > { %1189 = vrot.lane.b32.xlu1 %v1183_v45, %s1513_s23 }
 0x293   : > { %v897_v16 = vpop.permute.xlu0 %896 }
 0x294   : > { %v899_v54 = vpop.permute.xlu1 %898  ;;  %v900_v29 = vsel %vm338_vm6, %v1488_v14, %v897_v16 }
 0x295   : > { %v901_v13 = vsel %vm338_vm6, %v897_v16, %v899_v54 }
 0x29a   : > { %v1065_v17 = vpop.permute.xlu0 %1064 }
 0x29b   : > { %v1067_v0 = vpop.permute.xlu1 %1066  ;;  %v1068_v22 = vsel %vm338_vm6, %v1489_v47, %v1065_v17 }
 0x29c   : > { %v1069_v28 = vsel %vm338_vm6, %v1065_v17, %v1067_v0 }
 0x29e   : > { %v879_v37 = vpop.permute.xlu0 %878 }
 0x29f   : > { %v918_v55 = vpop.permute.xlu1 %917  ;;  %v882_v12 = vsel %vm319_vm5, %v877_v43, %v879_v37 }
 0x2a0   : > { %v921_v30 = vsel %vm385_vm2, %v916_v52, %v918_v55 }
 0x2a2   : > { %v1047_v56 = vpop.permute.xlu0 %1046 }
 0x2a3   : > { %v1086_v57 = vpop.permute.xlu1 %1085  ;;  %v1050_v32 = vsel %vm319_vm5, %v1045_v51, %v1047_v56 }
 0x2a4   : > { %v1089_v40 = vsel %vm385_vm2, %v1084_v46, %v1086_v57 }
 0x2a6   : > { %v1954_v59 = vpop.permute.xlu0 %1129 }
 0x2a7   : > { %v939_v60 = vpop.permute.xlu1 %938 }
 0x2a8   : > { %v942_v24 = vsel %vm416_vm4, %v937_v8, %v939_v60 }
 0x2aa   : > { %v920_v61 = vpop.permute.xlu0 %919 }
 0x2ab   : > { %v1107_v62 = vpop.permute.xlu1 %1106  ;;  %v922_v38 = vsel %vm385_vm2, %v918_v55, %v920_v61 }
 0x2ac   : > { %v1110_v41 = vsel %vm416_vm4, %v1944_v48, %v1107_v62 }
 0x2ae   : > { %v1088_v63 = vpop.permute.xlu0 %1087 }
 0x2af   : > { %v962_v3 = vpop.permute.xlu1 %961  ;;  %v1090_v33 = vsel %vm385_vm2, %v1086_v57, %v1088_v63 }
 0x2b2   : > { %v941_v4 = vpop.permute.xlu0 %940 }
 0x2b3   : > { %v1956_v7 = vpop.permute.xlu1 %982  ;;  %v943_v44 = vsel %vm416_vm4, %v939_v60, %v941_v4 }
 0x2b6   : > { %v1109_v9 = vpop.permute.xlu0 %1108 }
 0x2b7   : > { %v881_v10 = vpop.permute.xlu1 %880  ;;  %v1111_v27 = vsel %vm416_vm4, %v1107_v62, %v1109_v9 }
 0x2b8   : > { %v883_v11 = vsel %vm319_vm5, %v879_v37, %v881_v10 }
 0x2b9   : > { %1251 = vmatprep.subr.bf16.mxu0 %v883_v11 }
 0x2ba   : > { %1252 = vmatpush1.bf16.msra.mxu0 %v882_v12  ;;  %v1151_v20 = vpop.permute.xlu0 %1150 }
 0x2bb   : > { %v1049_v15 = vpop.permute.xlu1 %1048  ;;  %1253 = vmatprep.subr.bf16.mxu0 %v901_v13 }
 0x2bc   : > { %v1051_v26 = vsel %vm319_vm5, %v1047_v56, %v1049_v15 }
 0x2bd   : > { %1292 = vmatprep.subr.bf16.mxu1 %v1051_v26 }
 0x2be   : > { %1293 = vmatpush1.bf16.msra.mxu1 %v1050_v32  ;;  %1254 = vmatpush1.bf16.msra.mxu0 %v900_v29  ;;  %v1492_v21 = vpop.permute.xlu0 %1491 }
 0x2bf   : > { %v1003_v58 = vpop.permute.xlu1 %1002  ;;  %1255 = vmatprep.subr.bf16.mxu0 %v922_v38  ;;  %1294 = vmatprep.subr.bf16.mxu1 %v1069_v28  ;;  %v1493_v50 = vunpack.i.l.bf16 %v1492_v21 }
 0x2c2   : > { %1256 = vmatpush1.bf16.msra.mxu0 %v921_v30  ;;  %1295 = vmatpush1.bf16.msra.mxu1 %v1068_v22  ;;  %v1001_v31 = vpop.permute.xlu0 %1000 }
 0x2c3   : > { %v1171_v39 = vpop.permute.xlu1 %1170  ;;  %1257 = vmatprep.subr.bf16.mxu0 %v943_v44  ;;  %1296 = vmatprep.subr.bf16.mxu1 %v1090_v33  ;;  %v1006_v8 = vsel %vm497_vm7, %v1001_v31, %v1003_v58 }
 0x2c6   : > { %1258 = vmatpush1.bf16.msra.mxu0 %v942_v24  ;;  %1297 = vmatpush1.bf16.msra.mxu1 %v1089_v40  ;;  %v1024_v1 = vpop.permute.xlu0 %1023 }
 0x2c7   : > { %v1169_v25 = vpop.permute.xlu1 %1168  ;;  %1259 = vmatprep.subr.bf16.mxu0 %v1834_v6  ;;  %1298 = vmatprep.subr.bf16.mxu1 %v1111_v27 }
 0x2c8   : > { %v1174_v0 = vsel %vm497_vm7, %v1169_v25, %v1171_v39 }
 0x2ca   : > { %1260 = vmatpush1.bf16.msra.mxu0 %v1832_v5  ;;  %1299 = vmatpush1.bf16.msra.mxu1 %v1110_v41  ;;  %v1192_v45 = vpop.permute.xlu0 %1191 }
 0x2cb   : > { %v964_v42 = vpop.permute.xlu1 %963  ;;  %1300 = vmatprep.subr.bf16.mxu1 %v1842_v19 }
 0x2cc   : > { %v967_v2 = vsel %vm399_vm0, %v962_v3, %v964_v42  ;;  %v968_v23 = vsel %vm399_vm0, %v964_v42, %v1946_v36  ;;  %v1007_v36 = vsel %vm497_vm7, %v1003_v58, %v1493_v50 }
 0x2cd   : > { %1261 = vmatprep.subr.bf16.mxu0 %v968_v23 }
 0x2ce   : > { %1262 = vmatpush1.bf16.msra.mxu0 %v967_v2  ;;  %1301 = vmatpush1.bf16.msra.mxu1 %v1840_v18  ;;  %v1494_v18 = vunpack.i.h.bf16 %v1492_v21  ;;  %v1022_v16 = vpop.permute.xlu0 %1021 }
 0x2cf   : > { %v1132_v6 = vpop.permute.xlu1 %1131  ;;  %v1027_v37 = vsel %vm302_vm1, %v1022_v16, %v1024_v1 }
 0x2d0   : > { %v1135_v43 = vsel %vm399_vm0, %v1954_v59, %v1132_v6  ;;  %v1136_v5 = vsel %vm399_vm0, %v1132_v6, %v1948_v49 }
 0x2d1   : > { %1302 = vmatprep.subr.bf16.mxu1 %v1136_v5 }
 0x2d2   : > { %1303 = vmatpush1.bf16.msra.mxu1 %v1135_v43 }
 0x2d3   : > { %v985_v19 = vpop.permute.xlu1 %984 }
 0x2d4   : > { %v988_v46 = vsel %vm368_vm3, %v1956_v7, %v985_v19  ;;  %v989_v48 = vsel %vm368_vm3, %v985_v19, %v1950_v35  ;;  %v1175_v35 = vsel %vm497_vm7, %v1171_v39, %v1494_v18 }
 0x2d5   : > { %1263 = vmatprep.subr.bf16.mxu0 %v989_v48 }
 0x2d6   : > { %1264 = vmatpush1.bf16.msra.mxu0 %v988_v46 }
 0x2d7   : > { %v1153_v51 = vpop.permute.xlu1 %1152  ;;  %1265 = vmatprep.subr.bf16.mxu0 %v1007_v36 }
 0x2d8   : > { %v1156_v49 = vsel %vm368_vm3, %v1151_v20, %v1153_v51  ;;  %v1157_v52 = vsel %vm368_vm3, %v1153_v51, %v1952_v53 }
 0x2d9   : > { %1304 = vmatprep.subr.bf16.mxu1 %v1157_v52 }
 0x2da   : > { %1266 = vmatpush1.bf16.msra.mxu0 %v1006_v8  ;;  %1305 = vmatpush1.bf16.msra.mxu1 %v1156_v49 }
 0x2db   : > { %v1026_v54 = vpop.permute.xlu1 %1025  ;;  %1306 = vmatprep.subr.bf16.mxu1 %v1175_v35 }
 0x2dc   : > { %v1028_v17 = vsel %vm302_vm1, %v1024_v1, %v1026_v54 }
 0x2dd   : > { %1267 = vmatprep.subr.bf16.mxu0 %v1028_v17 }
 0x2de   : > { %1268 = vmatpush1.bf16.msra.mxu0 %v1027_v37  ;;  %1307 = vmatpush1.bf16.msra.mxu1 %v1174_v0 }
 0x2df   : > { %v1194_v53 = vpop.permute.xlu1 %1193 }
 0x2e0   : > { %v1196_v55 = vsel %vm302_vm1, %v1192_v45, %v1194_v53 }
 0x2e1   : > { %1308 = vmatprep.subr.bf16.mxu1 %v1196_v55  ;;  %1284 = vmatmul.mubr.bf16.vlgmr.msra.gmra.mrb[4].mxu0 %v1930_v34 }
 0x2e3   : > { %v1190_v56 = vpop.permute.xlu1 %1189 }
 0x2e4   : > { %v1195_v57 = vsel %vm302_vm1, %v1190_v56, %v1192_v45 }
 0x2e5   : > { %1309 = vmatpush1.bf16.msra.mxu1 %v1195_v57 }
 0x2e8   : > { %1325 = vmatmul.mubr.bf16.vlgmr.msra.gmra.mrb[4].mxu1 %v1930_v34 }
 0x3b4   : > { %v1285_v59 = vpop.f32.mrb[4].mxu0 }
 0x3b5   : > { %v1287_v60 = vpop.f32.mrb[5].mxu0 }
 0x3b6   : > { %v1335_v61 = vcombine.low %v1285_v59, %v1287_v60  ;;  %v1289_v62 = vpop.f32.mrb[6].mxu0 }
 0x3b7   : > { %v1290_v63 = vpop.f32.mrb[7].mxu0 }
 0x3b8   : > { %1337 = vst [vmem:[%s237_s17] sm:$0xff] %v1335_v61 }
 0x3bb   : > { %v1326_v3 = vpop.f32.mrb[4].mxu1 }
 0x3bc   : > { %v1328_v4 = vpop.f32.mrb[5].mxu1 }
 0x3bd   : > { %v1340_v7 = vcombine.low %v1326_v3, %v1328_v4  ;;  %v1330_v9 = vpop.f32.mrb[6].mxu1 }
 0x3be   : > { %v1331_v10 = vpop.f32.mrb[7].mxu1 }
 0x3bf   : > { %1450 = vst [vmem:[%s237_s17 + $0x8] sm:$0xff] %v1340_v7 }
 0x3c0 PF: > { %s14_s15 = sadd.s32 1, %s1510_s15  }
 0x3c1   : > { %p11_p4 = scmp.ge.s32.totalorder %s14_s15, 4  }
 0x3c3   :  { %13 = sbr.rel (!%p11_p4) target bundleno = 1 (0x1), region = 74 }

</bundles_post_ra>
